<compile_context>
chip_gen: v7x
topology: tpu7x:2x2x1
jax: 0.10.0
libtpu: 0.0.40
codegen_flags: <defaults>
</compile_context>

<pallas_src>
import math
import functools

import jax
import jax.numpy as jnp
from jax.experimental import pallas as pl
from jax.experimental.pallas import tpu as pltpu


def _encoder_layer_kernel(x_ref, bias_ref,
                          wqkv_ref, bqkv_ref, wo_ref, bo_ref,
                          w1_ref, b1_ref, w2_ref, b2_ref,
                          o_ref,
                          *, h, d_k, eps):
    """One block of Bt batch elements per grid step.

    x_ref    : (Bt, S, D) f32 activations
    bias_ref : (Bm, S, S) f32 additive attention bias (0 keep / -1e9 masked), Bm in {1, Bt}
    w*_ref   : pre-transposed (in, out) bf16 weights (LN gamma folded into wqkv / w1)
    b*_ref   : (1, out) f32 biases (LN beta folded into bqkv / b1)
    """
    bt, s, d = x_ref.shape
    n = bt * s
    x = x_ref[...].reshape(n, d)                     # already f32 — no cast needed

    def layer_norm(v):
        # PyTorch x.std(-1) default: unbiased (divide by D-1); module divides by (std+eps).
        # gamma/beta are folded into the following linear layers host-side.
        mean = jnp.mean(v, axis=-1, keepdims=True)
        cent = v - mean
        std = jnp.sqrt(jnp.sum(cent * cent, axis=-1, keepdims=True) * (1.0 / (d - 1.0)))
        inv = pl.reciprocal(std + eps, approx=True)  # (n, 1) on the EUP slot
        return cent * inv

    bf16 = jnp.bfloat16
    f32 = jnp.float32

    # ---------------- sublayer 0: pre-norm + multi-head self-attention + residual -------
    xn = layer_norm(x)
    # fused Q|K|V projection: one MXU matmul, N = 3*D, bf16 operands / f32 accumulate
    qkv = jnp.dot(xn.astype(bf16), wqkv_ref[...],
                  preferred_element_type=f32) + bqkv_ref[...]
    qkv = qkv.reshape(bt, s, 3 * d)

    bias = bias_ref[...]                             # f32, hoisted out of the head loop
    inv_sqrt_dk = 1.0 / math.sqrt(d_k)

    attn_acc = None                                  # (n, D) f32, Wo folded per head
    for hh in range(h):                              # static unroll (h small); use
        lo = hh * d_k                                # lax.fori_loop(unroll=True) if h grows
        q_h = qkv[:, :, lo:lo + d_k].astype(bf16)              # (Bt, S, d_k)
        k_h = qkv[:, :, d + lo:d + lo + d_k].astype(bf16)
        v_h = qkv[:, :, 2 * d + lo:2 * d + lo + d_k].astype(bf16)

        # contract over d_k without materializing k_h.T (no XLU transpose)
        scores = jnp.einsum('bqd,bkd->bqk', q_h, k_h,
                            preferred_element_type=f32) * inv_sqrt_dk + bias
        m = jnp.max(scores, axis=-1, keepdims=True)
        e = jnp.exp(scores - m)
        p = e * pl.reciprocal(jnp.sum(e, axis=-1, keepdims=True), approx=True)

        ctx_h = jnp.einsum('bqk,bkd->bqd', p.astype(bf16), v_h,
                           preferred_element_type=f32)          # (Bt, S, d_k) f32
        # fold the output projection into the loop: 128-lane-dense output, no scratch
        part = jnp.dot(ctx_h.reshape(n, d_k).astype(bf16),
                       wo_ref[lo:lo + d_k, :],                  # sublane-aligned view
                       preferred_element_type=f32)              # (n, D)
        attn_acc = part if attn_acc is None else attn_acc + part

    x = x + attn_acc + bo_ref[...]                   # residual (dropout = identity in eval)

    # ---------------- sublayer 1: pre-norm + position-wise FFN + residual ---------------
    xn2 = layer_norm(x)
    hidden = jnp.dot(xn2.astype(bf16), w1_ref[...],
                     preferred_element_type=f32) + b1_ref[...]
    hidden = jnp.maximum(hidden, 0.0)
    ffn = jnp.dot(hidden.astype(bf16), w2_ref[...],
                  preferred_element_type=f32) + b2_ref[...]
    x = x + ffn

    o_ref[...] = x.reshape(bt, s, d).astype(o_ref.dtype)


def _parallel_tensorcores_per_chip():
    """2 on v7x (grid axes marked 'parallel' shard across its 2 TCs), else 1."""
    try:
        kind = jax.devices()[0].device_kind.lower()
    except Exception:
        return 1
    return 2 if "v7" in kind else 1


def encoder_layer(x, mask, params, *, h, eps=1e-6, block_b=None):
    """Fused EncoderLayer forward.

    x: (B, S, D) f32; mask: (S, S), (1, S, S), (B, 1, S) or (B, S, S); nonzero = keep.
    params: PyTorch layouts — Wq/Wk/Wv/Wo (D,D), W1 (Dff,D), W2 (D,Dff), ln*_g/ln*_b (D,).
    """
    B, S, D = x.shape
    assert D % h == 0
    d_k = D // h
    Dff = params["W1"].shape[0]

    if block_b is None:
        # Single grid step on single-TC chips (v5e/v6e); split only where "parallel"
        # actually shards (v7x, 2 TCs). For production shapes also aim for Bt*S >= 256.
        n_tc = _parallel_tensorcores_per_chip()
        if n_tc >= 2 and B % 2 == 0 and B >= 2:
            block_b = B // 2
        else:
            block_b = B
    assert B % block_b == 0
    grid = (B // block_b,)

    f32, bf16 = jnp.float32, jnp.bfloat16

    # ---- host-side weight prep: transpose to (in, out), fold LN gamma/beta, cast bf16 --
    ln1_g = params["ln1_g"].astype(f32)
    ln1_b = params["ln1_b"].astype(f32)
    ln2_g = params["ln2_g"].astype(f32)
    ln2_b = params["ln2_b"].astype(f32)

    wqkv_f = jnp.concatenate(
        [params["Wq"].T, params["Wk"].T, params["Wv"].T], axis=1).astype(f32)   # (D, 3D)
    bqkv_f = jnp.concatenate([params["bq"], params["bk"], params["bv"]]).astype(f32)
    wqkv = (ln1_g[:, None] * wqkv_f).astype(bf16)
    bqkv = (bqkv_f + ln1_b @ wqkv_f).reshape(1, 3 * D).astype(f32)

    wo = params["Wo"].T.astype(bf16)                                             # (D, D)
    bo = params["bo"].reshape(1, D).astype(f32)

    w1_f = params["W1"].T.astype(f32)                                            # (D, Dff)
    b1_f = params["b1"].astype(f32)
    w1 = (ln2_g[:, None] * w1_f).astype(bf16)
    b1 = (b1_f + ln2_b @ w1_f).reshape(1, Dff).astype(f32)

    w2 = params["W2"].T.astype(bf16)                                             # (Dff, D)
    b2 = params["b2"].reshape(1, D).astype(f32)

    # ---- additive attention bias: keep the mask's own batch extent (no B-fold copy) ----
    mask_b = jnp.asarray(mask)
    if mask_b.ndim == 2:
        mask_b = mask_b[None]
    Bm = mask_b.shape[0]
    assert Bm in (1, B), f"mask batch dim must be 1 or {B}, got {Bm}"
    bias = jnp.broadcast_to(jnp.where(mask_b == 0, f32(-1e9), f32(0.0)),
                            (Bm, S, S)).astype(f32)

    kernel = functools.partial(_encoder_layer_kernel, h=h, d_k=d_k, eps=eps)

    x_spec = pl.BlockSpec((block_b, S, D), lambda b: (b, 0, 0))
    if Bm == 1:
        bias_spec = pl.BlockSpec((1, S, S), lambda b: (0, 0, 0))
    else:
        bias_spec = pl.BlockSpec((block_b, S, S), lambda b: (b, 0, 0))

    def rep(shape):
        # Weights: same block every step -> stays resident in VMEM.
        # For production v7x shapes consider pipeline_mode=pl.Buffered(1) here.
        return pl.BlockSpec(shape, lambda b: (0,) * len(shape))

    flops = (2 * B * S * D * 3 * D          # fused QKV projection
             + 4 * B * h * S * S * d_k      # scores + p @ v
             + 2 * B * S * D * D            # output projection (folded per head)
             + 4 * B * S * D * Dff)         # FFN
    transcendentals = B * h * S * S + B * h * S + 2 * B * S
    bytes_accessed = (4 * 2 * x.size + 4 * bias.size
                      + 2 * (wqkv.size + wo.size + w1.size + w2.size)      # bf16 weights
                      + 4 * (bqkv.size + bo.size + b1.size + b2.size))     # f32 biases
    cost = pl.CostEstimate(flops=flops, transcendentals=transcendentals,
                           bytes_accessed=bytes_accessed)

    return pl.pallas_call(
        kernel,
        out_shape=jax.ShapeDtypeStruct((B, S, D), x.dtype),
        grid_spec=pltpu.PrefetchScalarGridSpec(
            num_scalar_prefetch=0,
            grid=grid,
            in_specs=[x_spec, bias_spec,
                      rep((D, 3 * D)), rep((1, 3 * D)), rep((D, D)), rep((1, D)),
                      rep((D, Dff)), rep((1, Dff)), rep((Dff, D)), rep((1, D))],
            out_specs=pl.BlockSpec((block_b, S, D), lambda b: (b, 0, 0)),
            scratch_shapes=[],
        ),
        compiler_params=pltpu.CompilerParams(
            dimension_semantics=("parallel",),
            vmem_limit_bytes=32 * 1024 * 1024),
        cost_estimate=cost,
    )(x, bias, wqkv, bqkv, wo, bo, w1, b1, w2, b2)


def _reference_encoder_layer(x, mask, params, *, h, eps=1e-6):
    """Pure-JAX replica of the PyTorch EncoderLayer forward (eval mode, no dropout)."""
    B, S, D = x.shape
    d_k = D // h
    m = jnp.asarray(mask)
    if m.ndim == 2:
        m = m[None]

    def layer_norm(v, g, b):
        mean = v.mean(-1, keepdims=True)
        cent = v - mean
        std = jnp.sqrt((cent ** 2).sum(-1, keepdims=True) / (D - 1.0))
        return g * cent / (std + eps) + b

    def linear(v, w, b):
        return v @ w.T + b

    def self_attn(xq, xk, xv):
        def split(t):
            return t.reshape(B, S, h, d_k).transpose(0, 2, 1, 3)
        q = split(linear(xq, params["Wq"], params["bq"]))
        k = split(linear(xk, params["Wk"], params["bk"]))
        v = split(linear(xv, params["Wv"], params["bv"]))
        scores = jnp.einsum("bhqd,bhkd->bhqk", q, k) / math.sqrt(d_k)
        scores = jnp.where(m[:, None, :, :] == 0, -1e9, scores)
        p = jax.nn.softmax(scores, axis=-1)
        ctx = jnp.einsum("bhqk,bhkd->bhqd", p, v).transpose(0, 2, 1, 3).reshape(B, S, D)
        return linear(ctx, params["Wo"], params["bo"])

    xn = layer_norm(x, params["ln1_g"], params["ln1_b"])
    x = x + self_attn(xn, xn, xn)
    xn = layer_norm(x, params["ln2_g"], params["ln2_b"])
    ffn = linear(jnp.maximum(linear(xn, params["W1"], params["b1"]), 0.0),
                 params["W2"], params["b2"])
    return x + ffn


if __name__ == "__main__":
    # d_model=128 keeps stores lane-dense (128-lane vst); d_ff=512 likewise.
    B, S, D, H, DFF = 4, 16, 128, 4, 512   # d_k = 32

    key = jax.random.PRNGKey(0)
    ks = jax.random.split(key, 20)

    x = jax.random.normal(ks[0], (B, S, D), dtype=jnp.float32)

    # batch-invariant causal mask, passed as (1, S, S) so the kernel gets a single
    # resident (1, S, S) bias block instead of a materialized (B, S, S) copy.
    mask = jnp.tril(jnp.ones((S, S), dtype=jnp.int32))[None]

    scale = 1.0 / math.sqrt(D)

    def u(k, shape):
        return jax.random.uniform(k, shape, jnp.float32, -scale, scale)

    params = {
        "Wq": u(ks[1], (D, D)), "bq": u(ks[2], (D,)),
        "Wk": u(ks[3], (D, D)), "bk": u(ks[4], (D,)),
        "Wv": u(ks[5], (D, D)), "bv": u(ks[6], (D,)),
        "Wo": u(ks[7], (D, D)), "bo": u(ks[8], (D,)),
        "W1": u(ks[9], (DFF, D)), "b1": u(ks[10], (DFF,)),
        "W2": u(ks[11], (D, DFF)), "b2": u(ks[12], (D,)),
        "ln1_g": 1.0 + 0.1 * jax.random.normal(ks[13], (D,), jnp.float32),
        "ln1_b": 0.1 * jax.random.normal(ks[14], (D,), jnp.float32),
        "ln2_g": 1.0 + 0.1 * jax.random.normal(ks[15], (D,), jnp.float32),
        "ln2_b": 0.1 * jax.random.normal(ks[16], (D,), jnp.float32),
    }

    out = encoder_layer(x, mask, params, h=H)
    out = jax.block_until_ready(out)

    ref = _reference_encoder_layer(x, mask, params, h=H)
    assert out.shape == (B, S, D)
    err = float(jnp.max(jnp.abs(out - ref)))
    # tolerance 2e-2: bf16 MXU operands (f32 accumulation) + pl.reciprocal(approx=True)
    # in softmax/LayerNorm; LN stats, softmax, bias add and residuals stay f32.
    assert jnp.allclose(out, ref, atol=2e-2, rtol=2e-2), f"max abs err {err}"

    print("KERNEL_OK")
</pallas_src>

<mosaic_0001>
module attributes {stable_mosaic.version = 11 : i64} {
  func.func @_encoder_layer_kernel(%arg0: i32, %arg1: memref<4x16x128xf32, #tpu.memory_space<vmem>>, %arg2: memref<1x16x16xf32, #tpu.memory_space<vmem>>, %arg3: memref<128x384xbf16, #tpu.memory_space<vmem>>, %arg4: memref<1x384xf32, #tpu.memory_space<vmem>>, %arg5: memref<128x128xbf16, #tpu.memory_space<vmem>>, %arg6: memref<1x128xf32, #tpu.memory_space<vmem>>, %arg7: memref<128x512xbf16, #tpu.memory_space<vmem>>, %arg8: memref<1x512xf32, #tpu.memory_space<vmem>>, %arg9: memref<512x128xbf16, #tpu.memory_space<vmem>>, %arg10: memref<1x128xf32, #tpu.memory_space<vmem>>, %arg11: memref<4x16x128xf32, #tpu.memory_space<vmem>>) attributes {dimension_semantics = [#tpu.dimension_semantics<parallel>], iteration_bounds = array<i64: 1>, scalar_prefetch = 0 : i64, scratch_operands = 0 : i64, tpu.core_type = #tpu.core_type<tc>, window_params = [{transform_indices = @transform_0, window_bounds = array<i64: 4, 16, 128>}, {pipeline_mode = #tpu.pipeline_mode<synchronous>, transform_indices = @transform_1, window_bounds = array<i64: 1, 16, 16>}, {pipeline_mode = #tpu.pipeline_mode<synchronous>, transform_indices = @transform_2, window_bounds = array<i64: 128, 384>}, {pipeline_mode = #tpu.pipeline_mode<synchronous>, transform_indices = @transform_3, window_bounds = array<i64: 1, 384>}, {pipeline_mode = #tpu.pipeline_mode<synchronous>, transform_indices = @transform_4, window_bounds = array<i64: 128, 128>}, {pipeline_mode = #tpu.pipeline_mode<synchronous>, transform_indices = @transform_5, window_bounds = array<i64: 1, 128>}, {pipeline_mode = #tpu.pipeline_mode<synchronous>, transform_indices = @transform_6, window_bounds = array<i64: 128, 512>}, {pipeline_mode = #tpu.pipeline_mode<synchronous>, transform_indices = @transform_7, window_bounds = array<i64: 1, 512>}, {pipeline_mode = #tpu.pipeline_mode<synchronous>, transform_indices = @transform_8, window_bounds = array<i64: 512, 128>}, {pipeline_mode = #tpu.pipeline_mode<synchronous>, transform_indices = @transform_9, window_bounds = array<i64: 1, 128>}, {transform_indices = @transform_10, window_bounds = array<i64: 4, 16, 128>}]} {
    %c0 = arith.constant 0 : index
    %c0_0 = arith.constant 0 : index
    %c0_1 = arith.constant 0 : index
    %0 = vector.load %arg1[%c0, %c0_0, %c0_1] : memref<4x16x128xf32, #tpu.memory_space<vmem>>, vector<4x16x128xf32>
    %1 = vector.shape_cast %0 : vector<4x16x128xf32> to vector<64x128xf32>
    %cst = arith.constant dense<0.000000e+00> : vector<64xf32>
    %2 = vector.multi_reduction <add>, %1, %cst [1] : vector<64x128xf32> to vector<64xf32>
    %3 = vector.shape_cast %2 : vector<64xf32> to vector<64x1xf32>
    %cst_2 = arith.constant 1.280000e+02 : f32
    %4 = vector.broadcast %cst_2 : f32 to vector<64x1xf32>
    %5 = arith.divf %3, %4 : vector<64x1xf32>
    %6 = vector.broadcast %5 : vector<64x1xf32> to vector<64x128xf32>
    %7 = arith.subf %1, %6 : vector<64x128xf32>
    %8 = arith.mulf %7, %7 : vector<64x128xf32>
    %cst_3 = arith.constant dense<0.000000e+00> : vector<64xf32>
    %9 = vector.multi_reduction <add>, %8, %cst_3 [1] : vector<64x128xf32> to vector<64xf32>
    %10 = vector.shape_cast %9 : vector<64xf32> to vector<64x1xf32>
    %cst_4 = arith.constant 0.00787401571 : f32
    %11 = vector.broadcast %cst_4 : f32 to vector<64x1xf32>
    %12 = arith.mulf %10, %11 : vector<64x1xf32>
    %13 = math.sqrt %12 : vector<64x1xf32>
    %cst_5 = arith.constant 9.99999997E-7 : f32
    %14 = vector.broadcast %cst_5 : f32 to vector<64x1xf32>
    %15 = arith.addf %13, %14 : vector<64x1xf32>
    %16 = tpu.reciprocal %15 {approx = true} : vector<64x1xf32> -> vector<64x1xf32>
    %17 = vector.broadcast %16 : vector<64x1xf32> to vector<64x128xf32>
    %18 = arith.mulf %7, %17 : vector<64x128xf32>
    %19 = arith.truncf %18 : vector<64x128xf32> to vector<64x128xbf16>
    %c0_6 = arith.constant 0 : index
    %c0_7 = arith.constant 0 : index
    %20 = vector.load %arg3[%c0_6, %c0_7] : memref<128x384xbf16, #tpu.memory_space<vmem>>, vector<128x384xbf16>
    %cst_8 = arith.constant dense<0.000000e+00> : vector<64x384xf32>
    %21 = tpu.matmul %19, %20, %cst_8 {dimension_numbers = #tpu.dot_dimension_numbers<[1], [0], [0], [1], [0, 0, 1, 1], [], []>} : vector<64x128xbf16>, vector<128x384xbf16>, vector<64x384xf32> -> vector<64x384xf32>
    %c0_9 = arith.constant 0 : index
    %c0_10 = arith.constant 0 : index
    %22 = vector.load %arg4[%c0_9, %c0_10] : memref<1x384xf32, #tpu.memory_space<vmem>>, vector<1x384xf32>
    %23 = vector.broadcast %22 : vector<1x384xf32> to vector<64x384xf32>
    %24 = arith.addf %21, %23 : vector<64x384xf32>
    %25 = vector.shape_cast %24 : vector<64x384xf32> to vector<4x16x384xf32>
    %c0_11 = arith.constant 0 : index
    %c0_12 = arith.constant 0 : index
    %c0_13 = arith.constant 0 : index
    %26 = vector.load %arg2[%c0_11, %c0_12, %c0_13] : memref<1x16x16xf32, #tpu.memory_space<vmem>>, vector<1x16x16xf32>
    %27 = vector.extract_strided_slice %25 {offsets = [0, 0, 0], sizes = [4, 16, 32], strides = [1, 1, 1]} : vector<4x16x384xf32> to vector<4x16x32xf32>
    %28 = arith.truncf %27 : vector<4x16x32xf32> to vector<4x16x32xbf16>
    %29 = vector.extract_strided_slice %25 {offsets = [0, 0, 128], sizes = [4, 16, 32], strides = [1, 1, 1]} : vector<4x16x384xf32> to vector<4x16x32xf32>
    %30 = arith.truncf %29 : vector<4x16x32xf32> to vector<4x16x32xbf16>
    %31 = vector.extract_strided_slice %25 {offsets = [0, 0, 256], sizes = [4, 16, 32], strides = [1, 1, 1]} : vector<4x16x384xf32> to vector<4x16x32xf32>
    %32 = arith.truncf %31 : vector<4x16x32xf32> to vector<4x16x32xbf16>
    "tpu.trace_start"() <{level = 10 : i32, message = "bqd,bkd->bqk"}> : () -> ()
    %cst_14 = arith.constant dense<0.000000e+00> : vector<4x16x16xf32>
    %33 = tpu.matmul %28, %30, %cst_14 {dimension_numbers = #tpu.dot_dimension_numbers<[2], [2], [1], [1], [0, 0, 0, 1, 1, 1], [0], [0]>} : vector<4x16x32xbf16>, vector<4x16x32xbf16>, vector<4x16x16xf32> -> vector<4x16x16xf32>
    "tpu.trace_stop"() : () -> ()
    %cst_15 = arith.constant 0.176776692 : f32
    %34 = vector.broadcast %cst_15 : f32 to vector<4x16x16xf32>
    %35 = arith.mulf %33, %34 : vector<4x16x16xf32>
    %36 = vector.broadcast %26 : vector<1x16x16xf32> to vector<4x16x16xf32>
    %37 = arith.addf %35, %36 : vector<4x16x16xf32>
    %cst_16 = arith.constant dense<0xFF800000> : vector<4x16xf32>
    %38 = vector.multi_reduction <maximumf>, %37, %cst_16 [2] : vector<4x16x16xf32> to vector<4x16xf32>
    %39 = vector.shape_cast %38 : vector<4x16xf32> to vector<4x16x1xf32>
    %40 = vector.broadcast %39 : vector<4x16x1xf32> to vector<4x16x16xf32>
    %41 = arith.subf %37, %40 : vector<4x16x16xf32>
    %42 = math.exp %41 : vector<4x16x16xf32>
    %cst_17 = arith.constant dense<0.000000e+00> : vector<4x16xf32>
    %43 = vector.multi_reduction <add>, %42, %cst_17 [2] : vector<4x16x16xf32> to vector<4x16xf32>
    %44 = vector.shape_cast %43 : vector<4x16xf32> to vector<4x16x1xf32>
    %45 = tpu.reciprocal %44 {approx = true} : vector<4x16x1xf32> -> vector<4x16x1xf32>
    %46 = vector.broadcast %45 : vector<4x16x1xf32> to vector<4x16x16xf32>
    %47 = arith.mulf %42, %46 : vector<4x16x16xf32>
    %48 = arith.truncf %47 : vector<4x16x16xf32> to vector<4x16x16xbf16>
    "tpu.trace_start"() <{level = 10 : i32, message = "bqk,bkd->bqd"}> : () -> ()
    %cst_18 = arith.constant dense<0.000000e+00> : vector<4x16x32xf32>
    %49 = tpu.matmul %48, %32, %cst_18 {dimension_numbers = #tpu.dot_dimension_numbers<[2], [1], [1], [2], [0, 0, 0, 1, 1, 2], [0], [0]>} : vector<4x16x16xbf16>, vector<4x16x32xbf16>, vector<4x16x32xf32> -> vector<4x16x32xf32>
    "tpu.trace_stop"() : () -> ()
    %50 = vector.shape_cast %49 : vector<4x16x32xf32> to vector<64x32xf32>
    %51 = arith.truncf %50 : vector<64x32xf32> to vector<64x32xbf16>
    %c0_19 = arith.constant 0 : index
    %c0_20 = arith.constant 0 : index
    %52 = vector.load %arg5[%c0_19, %c0_20] : memref<128x128xbf16, #tpu.memory_space<vmem>>, vector<32x128xbf16>
    %cst_21 = arith.constant dense<0.000000e+00> : vector<64x128xf32>
    %53 = tpu.matmul %51, %52, %cst_21 {dimension_numbers = #tpu.dot_dimension_numbers<[1], [0], [0], [1], [0, 0, 1, 1], [], []>} : vector<64x32xbf16>, vector<32x128xbf16>, vector<64x128xf32> -> vector<64x128xf32>
    %54 = vector.extract_strided_slice %25 {offsets = [0, 0, 32], sizes = [4, 16, 32], strides = [1, 1, 1]} : vector<4x16x384xf32> to vector<4x16x32xf32>
    %55 = arith.truncf %54 : vector<4x16x32xf32> to vector<4x16x32xbf16>
    %56 = vector.extract_strided_slice %25 {offsets = [0, 0, 160], sizes = [4, 16, 32], strides = [1, 1, 1]} : vector<4x16x384xf32> to vector<4x16x32xf32>
    %57 = arith.truncf %56 : vector<4x16x32xf32> to vector<4x16x32xbf16>
    %58 = vector.extract_strided_slice %25 {offsets = [0, 0, 288], sizes = [4, 16, 32], strides = [1, 1, 1]} : vector<4x16x384xf32> to vector<4x16x32xf32>
    %59 = arith.truncf %58 : vector<4x16x32xf32> to vector<4x16x32xbf16>
    "tpu.trace_start"() <{level = 10 : i32, message = "bqd,bkd->bqk"}> : () -> ()
    %cst_22 = arith.constant dense<0.000000e+00> : vector<4x16x16xf32>
    %60 = tpu.matmul %55, %57, %cst_22 {dimension_numbers = #tpu.dot_dimension_numbers<[2], [2], [1], [1], [0, 0, 0, 1, 1, 1], [0], [0]>} : vector<4x16x32xbf16>, vector<4x16x32xbf16>, vector<4x16x16xf32> -> vector<4x16x16xf32>
    "tpu.trace_stop"() : () -> ()
    %cst_23 = arith.constant 0.176776692 : f32
    %61 = vector.broadcast %cst_23 : f32 to vector<4x16x16xf32>
    %62 = arith.mulf %60, %61 : vector<4x16x16xf32>
    %63 = vector.broadcast %26 : vector<1x16x16xf32> to vector<4x16x16xf32>
    %64 = arith.addf %62, %63 : vector<4x16x16xf32>
    %cst_24 = arith.constant dense<0xFF800000> : vector<4x16xf32>
    %65 = vector.multi_reduction <maximumf>, %64, %cst_24 [2] : vector<4x16x16xf32> to vector<4x16xf32>
    %66 = vector.shape_cast %65 : vector<4x16xf32> to vector<4x16x1xf32>
    %67 = vector.broadcast %66 : vector<4x16x1xf32> to vector<4x16x16xf32>
    %68 = arith.subf %64, %67 : vector<4x16x16xf32>
    %69 = math.exp %68 : vector<4x16x16xf32>
    %cst_25 = arith.constant dense<0.000000e+00> : vector<4x16xf32>
    %70 = vector.multi_reduction <add>, %69, %cst_25 [2] : vector<4x16x16xf32> to vector<4x16xf32>
    %71 = vector.shape_cast %70 : vector<4x16xf32> to vector<4x16x1xf32>
    %72 = tpu.reciprocal %71 {approx = true} : vector<4x16x1xf32> -> vector<4x16x1xf32>
    %73 = vector.broadcast %72 : vector<4x16x1xf32> to vector<4x16x16xf32>
    %74 = arith.mulf %69, %73 : vector<4x16x16xf32>
    %75 = arith.truncf %74 : vector<4x16x16xf32> to vector<4x16x16xbf16>
    "tpu.trace_start"() <{level = 10 : i32, message = "bqk,bkd->bqd"}> : () -> ()
    %cst_26 = arith.constant dense<0.000000e+00> : vector<4x16x32xf32>
    %76 = tpu.matmul %75, %59, %cst_26 {dimension_numbers = #tpu.dot_dimension_numbers<[2], [1], [1], [2], [0, 0, 0, 1, 1, 2], [0], [0]>} : vector<4x16x16xbf16>, vector<4x16x32xbf16>, vector<4x16x32xf32> -> vector<4x16x32xf32>
    "tpu.trace_stop"() : () -> ()
    %77 = vector.shape_cast %76 : vector<4x16x32xf32> to vector<64x32xf32>
    %78 = arith.truncf %77 : vector<64x32xf32> to vector<64x32xbf16>
    %c32 = arith.constant 32 : index
    %c0_27 = arith.constant 0 : index
    %79 = vector.load %arg5[%c32, %c0_27] : memref<128x128xbf16, #tpu.memory_space<vmem>>, vector<32x128xbf16>
    %cst_28 = arith.constant dense<0.000000e+00> : vector<64x128xf32>
    %80 = tpu.matmul %78, %79, %cst_28 {dimension_numbers = #tpu.dot_dimension_numbers<[1], [0], [0], [1], [0, 0, 1, 1], [], []>} : vector<64x32xbf16>, vector<32x128xbf16>, vector<64x128xf32> -> vector<64x128xf32>
    %81 = arith.addf %53, %80 : vector<64x128xf32>
    %82 = vector.extract_strided_slice %25 {offsets = [0, 0, 64], sizes = [4, 16, 32], strides = [1, 1, 1]} : vector<4x16x384xf32> to vector<4x16x32xf32>
    %83 = arith.truncf %82 : vector<4x16x32xf32> to vector<4x16x32xbf16>
    %84 = vector.extract_strided_slice %25 {offsets = [0, 0, 192], sizes = [4, 16, 32], strides = [1, 1, 1]} : vector<4x16x384xf32> to vector<4x16x32xf32>
    %85 = arith.truncf %84 : vector<4x16x32xf32> to vector<4x16x32xbf16>
    %86 = vector.extract_strided_slice %25 {offsets = [0, 0, 320], sizes = [4, 16, 32], strides = [1, 1, 1]} : vector<4x16x384xf32> to vector<4x16x32xf32>
    %87 = arith.truncf %86 : vector<4x16x32xf32> to vector<4x16x32xbf16>
    "tpu.trace_start"() <{level = 10 : i32, message = "bqd,bkd->bqk"}> : () -> ()
    %cst_29 = arith.constant dense<0.000000e+00> : vector<4x16x16xf32>
    %88 = tpu.matmul %83, %85, %cst_29 {dimension_numbers = #tpu.dot_dimension_numbers<[2], [2], [1], [1], [0, 0, 0, 1, 1, 1], [0], [0]>} : vector<4x16x32xbf16>, vector<4x16x32xbf16>, vector<4x16x16xf32> -> vector<4x16x16xf32>
    "tpu.trace_stop"() : () -> ()
    %cst_30 = arith.constant 0.176776692 : f32
    %89 = vector.broadcast %cst_30 : f32 to vector<4x16x16xf32>
    %90 = arith.mulf %88, %89 : vector<4x16x16xf32>
    %91 = vector.broadcast %26 : vector<1x16x16xf32> to vector<4x16x16xf32>
    %92 = arith.addf %90, %91 : vector<4x16x16xf32>
    %cst_31 = arith.constant dense<0xFF800000> : vector<4x16xf32>
    %93 = vector.multi_reduction <maximumf>, %92, %cst_31 [2] : vector<4x16x16xf32> to vector<4x16xf32>
    %94 = vector.shape_cast %93 : vector<4x16xf32> to vector<4x16x1xf32>
    %95 = vector.broadcast %94 : vector<4x16x1xf32> to vector<4x16x16xf32>
    %96 = arith.subf %92, %95 : vector<4x16x16xf32>
    %97 = math.exp %96 : vector<4x16x16xf32>
    %cst_32 = arith.constant dense<0.000000e+00> : vector<4x16xf32>
    %98 = vector.multi_reduction <add>, %97, %cst_32 [2] : vector<4x16x16xf32> to vector<4x16xf32>
    %99 = vector.shape_cast %98 : vector<4x16xf32> to vector<4x16x1xf32>
    %100 = tpu.reciprocal %99 {approx = true} : vector<4x16x1xf32> -> vector<4x16x1xf32>
    %101 = vector.broadcast %100 : vector<4x16x1xf32> to vector<4x16x16xf32>
    %102 = arith.mulf %97, %101 : vector<4x16x16xf32>
    %103 = arith.truncf %102 : vector<4x16x16xf32> to vector<4x16x16xbf16>
    "tpu.trace_start"() <{level = 10 : i32, message = "bqk,bkd->bqd"}> : () -> ()
    %cst_33 = arith.constant dense<0.000000e+00> : vector<4x16x32xf32>
    %104 = tpu.matmul %103, %87, %cst_33 {dimension_numbers = #tpu.dot_dimension_numbers<[2], [1], [1], [2], [0, 0, 0, 1, 1, 2], [0], [0]>} : vector<4x16x16xbf16>, vector<4x16x32xbf16>, vector<4x16x32xf32> -> vector<4x16x32xf32>
    "tpu.trace_stop"() : () -> ()
    %105 = vector.shape_cast %104 : vector<4x16x32xf32> to vector<64x32xf32>
    %106 = arith.truncf %105 : vector<64x32xf32> to vector<64x32xbf16>
    %c64 = arith.constant 64 : index
    %c0_34 = arith.constant 0 : index
    %107 = vector.load %arg5[%c64, %c0_34] : memref<128x128xbf16, #tpu.memory_space<vmem>>, vector<32x128xbf16>
    %cst_35 = arith.constant dense<0.000000e+00> : vector<64x128xf32>
    %108 = tpu.matmul %106, %107, %cst_35 {dimension_numbers = #tpu.dot_dimension_numbers<[1], [0], [0], [1], [0, 0, 1, 1], [], []>} : vector<64x32xbf16>, vector<32x128xbf16>, vector<64x128xf32> -> vector<64x128xf32>
    %109 = arith.addf %81, %108 : vector<64x128xf32>
    %110 = vector.extract_strided_slice %25 {offsets = [0, 0, 96], sizes = [4, 16, 32], strides = [1, 1, 1]} : vector<4x16x384xf32> to vector<4x16x32xf32>
    %111 = arith.truncf %110 : vector<4x16x32xf32> to vector<4x16x32xbf16>
    %112 = vector.extract_strided_slice %25 {offsets = [0, 0, 224], sizes = [4, 16, 32], strides = [1, 1, 1]} : vector<4x16x384xf32> to vector<4x16x32xf32>
    %113 = arith.truncf %112 : vector<4x16x32xf32> to vector<4x16x32xbf16>
    %114 = vector.extract_strided_slice %25 {offsets = [0, 0, 352], sizes = [4, 16, 32], strides = [1, 1, 1]} : vector<4x16x384xf32> to vector<4x16x32xf32>
    %115 = arith.truncf %114 : vector<4x16x32xf32> to vector<4x16x32xbf16>
    "tpu.trace_start"() <{level = 10 : i32, message = "bqd,bkd->bqk"}> : () -> ()
    %cst_36 = arith.constant dense<0.000000e+00> : vector<4x16x16xf32>
    %116 = tpu.matmul %111, %113, %cst_36 {dimension_numbers = #tpu.dot_dimension_numbers<[2], [2], [1], [1], [0, 0, 0, 1, 1, 1], [0], [0]>} : vector<4x16x32xbf16>, vector<4x16x32xbf16>, vector<4x16x16xf32> -> vector<4x16x16xf32>
    "tpu.trace_stop"() : () -> ()
    %cst_37 = arith.constant 0.176776692 : f32
    %117 = vector.broadcast %cst_37 : f32 to vector<4x16x16xf32>
    %118 = arith.mulf %116, %117 : vector<4x16x16xf32>
    %119 = vector.broadcast %26 : vector<1x16x16xf32> to vector<4x16x16xf32>
    %120 = arith.addf %118, %119 : vector<4x16x16xf32>
    %cst_38 = arith.constant dense<0xFF800000> : vector<4x16xf32>
    %121 = vector.multi_reduction <maximumf>, %120, %cst_38 [2] : vector<4x16x16xf32> to vector<4x16xf32>
    %122 = vector.shape_cast %121 : vector<4x16xf32> to vector<4x16x1xf32>
    %123 = vector.broadcast %122 : vector<4x16x1xf32> to vector<4x16x16xf32>
    %124 = arith.subf %120, %123 : vector<4x16x16xf32>
    %125 = math.exp %124 : vector<4x16x16xf32>
    %cst_39 = arith.constant dense<0.000000e+00> : vector<4x16xf32>
    %126 = vector.multi_reduction <add>, %125, %cst_39 [2] : vector<4x16x16xf32> to vector<4x16xf32>
    %127 = vector.shape_cast %126 : vector<4x16xf32> to vector<4x16x1xf32>
    %128 = tpu.reciprocal %127 {approx = true} : vector<4x16x1xf32> -> vector<4x16x1xf32>
    %129 = vector.broadcast %128 : vector<4x16x1xf32> to vector<4x16x16xf32>
    %130 = arith.mulf %125, %129 : vector<4x16x16xf32>
    %131 = arith.truncf %130 : vector<4x16x16xf32> to vector<4x16x16xbf16>
    "tpu.trace_start"() <{level = 10 : i32, message = "bqk,bkd->bqd"}> : () -> ()
    %cst_40 = arith.constant dense<0.000000e+00> : vector<4x16x32xf32>
    %132 = tpu.matmul %131, %115, %cst_40 {dimension_numbers = #tpu.dot_dimension_numbers<[2], [1], [1], [2], [0, 0, 0, 1, 1, 2], [0], [0]>} : vector<4x16x16xbf16>, vector<4x16x32xbf16>, vector<4x16x32xf32> -> vector<4x16x32xf32>
    "tpu.trace_stop"() : () -> ()
    %133 = vector.shape_cast %132 : vector<4x16x32xf32> to vector<64x32xf32>
    %134 = arith.truncf %133 : vector<64x32xf32> to vector<64x32xbf16>
    %c96 = arith.constant 96 : index
    %c0_41 = arith.constant 0 : index
    %135 = vector.load %arg5[%c96, %c0_41] : memref<128x128xbf16, #tpu.memory_space<vmem>>, vector<32x128xbf16>
    %cst_42 = arith.constant dense<0.000000e+00> : vector<64x128xf32>
    %136 = tpu.matmul %134, %135, %cst_42 {dimension_numbers = #tpu.dot_dimension_numbers<[1], [0], [0], [1], [0, 0, 1, 1], [], []>} : vector<64x32xbf16>, vector<32x128xbf16>, vector<64x128xf32> -> vector<64x128xf32>
    %137 = arith.addf %109, %136 : vector<64x128xf32>
    %138 = arith.addf %1, %137 : vector<64x128xf32>
    %c0_43 = arith.constant 0 : index
    %c0_44 = arith.constant 0 : index
    %139 = vector.load %arg6[%c0_43, %c0_44] : memref<1x128xf32, #tpu.memory_space<vmem>>, vector<1x128xf32>
    %140 = vector.broadcast %139 : vector<1x128xf32> to vector<64x128xf32>
    %141 = arith.addf %138, %140 : vector<64x128xf32>
    %cst_45 = arith.constant dense<0.000000e+00> : vector<64xf32>
    %142 = vector.multi_reduction <add>, %141, %cst_45 [1] : vector<64x128xf32> to vector<64xf32>
    %143 = vector.shape_cast %142 : vector<64xf32> to vector<64x1xf32>
    %cst_46 = arith.constant 1.280000e+02 : f32
    %144 = vector.broadcast %cst_46 : f32 to vector<64x1xf32>
    %145 = arith.divf %143, %144 : vector<64x1xf32>
    %146 = vector.broadcast %145 : vector<64x1xf32> to vector<64x128xf32>
    %147 = arith.subf %141, %146 : vector<64x128xf32>
    %148 = arith.mulf %147, %147 : vector<64x128xf32>
    %cst_47 = arith.constant dense<0.000000e+00> : vector<64xf32>
    %149 = vector.multi_reduction <add>, %148, %cst_47 [1] : vector<64x128xf32> to vector<64xf32>
    %150 = vector.shape_cast %149 : vector<64xf32> to vector<64x1xf32>
    %cst_48 = arith.constant 0.00787401571 : f32
    %151 = vector.broadcast %cst_48 : f32 to vector<64x1xf32>
    %152 = arith.mulf %150, %151 : vector<64x1xf32>
    %153 = math.sqrt %152 : vector<64x1xf32>
    %cst_49 = arith.constant 9.99999997E-7 : f32
    %154 = vector.broadcast %cst_49 : f32 to vector<64x1xf32>
    %155 = arith.addf %153, %154 : vector<64x1xf32>
    %156 = tpu.reciprocal %155 {approx = true} : vector<64x1xf32> -> vector<64x1xf32>
    %157 = vector.broadcast %156 : vector<64x1xf32> to vector<64x128xf32>
    %158 = arith.mulf %147, %157 : vector<64x128xf32>
    %159 = arith.truncf %158 : vector<64x128xf32> to vector<64x128xbf16>
    %c0_50 = arith.constant 0 : index
    %c0_51 = arith.constant 0 : index
    %160 = vector.load %arg7[%c0_50, %c0_51] : memref<128x512xbf16, #tpu.memory_space<vmem>>, vector<128x512xbf16>
    %cst_52 = arith.constant dense<0.000000e+00> : vector<64x512xf32>
    %161 = tpu.matmul %159, %160, %cst_52 {dimension_numbers = #tpu.dot_dimension_numbers<[1], [0], [0], [1], [0, 0, 1, 1], [], []>} : vector<64x128xbf16>, vector<128x512xbf16>, vector<64x512xf32> -> vector<64x512xf32>
    %c0_53 = arith.constant 0 : index
    %c0_54 = arith.constant 0 : index
    %162 = vector.load %arg8[%c0_53, %c0_54] : memref<1x512xf32, #tpu.memory_space<vmem>>, vector<1x512xf32>
    %163 = vector.broadcast %162 : vector<1x512xf32> to vector<64x512xf32>
    %164 = arith.addf %161, %163 : vector<64x512xf32>
    %cst_55 = arith.constant 0.000000e+00 : f32
    %165 = vector.broadcast %cst_55 : f32 to vector<64x512xf32>
    %166 = arith.maximumf %164, %165 : vector<64x512xf32>
    %167 = arith.truncf %166 : vector<64x512xf32> to vector<64x512xbf16>
    %c0_56 = arith.constant 0 : index
    %c0_57 = arith.constant 0 : index
    %168 = vector.load %arg9[%c0_56, %c0_57] : memref<512x128xbf16, #tpu.memory_space<vmem>>, vector<512x128xbf16>
    %cst_58 = arith.constant dense<0.000000e+00> : vector<64x128xf32>
    %169 = tpu.matmul %167, %168, %cst_58 {dimension_numbers = #tpu.dot_dimension_numbers<[1], [0], [0], [1], [0, 0, 1, 1], [], []>} : vector<64x512xbf16>, vector<512x128xbf16>, vector<64x128xf32> -> vector<64x128xf32>
    %c0_59 = arith.constant 0 : index
    %c0_60 = arith.constant 0 : index
    %170 = vector.load %arg10[%c0_59, %c0_60] : memref<1x128xf32, #tpu.memory_space<vmem>>, vector<1x128xf32>
    %171 = vector.broadcast %170 : vector<1x128xf32> to vector<64x128xf32>
    %172 = arith.addf %169, %171 : vector<64x128xf32>
    %173 = arith.addf %141, %172 : vector<64x128xf32>
    %174 = vector.shape_cast %173 : vector<64x128xf32> to vector<4x16x128xf32>
    %c0_61 = arith.constant 0 : index
    %c0_62 = arith.constant 0 : index
    %c0_63 = arith.constant 0 : index
    %175 = vector.load %arg11[%c0_61, %c0_62, %c0_63] : memref<4x16x128xf32, #tpu.memory_space<vmem>>, vector<4x16x128xf32>
    tpu.vector_store %arg11[%c0_61, %c0_62, %c0_63], %174 {strides = array<i32>} : memref<4x16x128xf32, #tpu.memory_space<vmem>>, vector<4x16x128xf32>,
    return
  }
  func.func @transform_0(%arg0: i32) -> (i32, i32, i32) {
    %c0_i32 = arith.constant 0 : i32
    %c0_i32_0 = arith.constant 0 : i32
    %c0_i32_1 = arith.constant 0 : i32
    return %arg0, %c0_i32, %c0_i32_0 : i32, i32, i32
  }
  func.func @transform_1(%arg0: i32) -> (i32, i32, i32) {
    %c0_i32 = arith.constant 0 : i32
    %c0_i32_0 = arith.constant 0 : i32
    %c0_i32_1 = arith.constant 0 : i32
    %c0_i32_2 = arith.constant 0 : i32
    return %c0_i32, %c0_i32_0, %c0_i32_1 : i32, i32, i32
  }
  func.func @transform_2(%arg0: i32) -> (i32, i32) {
    %c0_i32 = arith.constant 0 : i32
    %c0_i32_0 = arith.constant 0 : i32
    %c0_i32_1 = arith.constant 0 : i32
    return %c0_i32, %c0_i32_0 : i32, i32
  }
  func.func @transform_3(%arg0: i32) -> (i32, i32) {
    %c0_i32 = arith.constant 0 : i32
    %c0_i32_0 = arith.constant 0 : i32
    %c0_i32_1 = arith.constant 0 : i32
    return %c0_i32, %c0_i32_0 : i32, i32
  }
  func.func @transform_4(%arg0: i32) -> (i32, i32) {
    %c0_i32 = arith.constant 0 : i32
    %c0_i32_0 = arith.constant 0 : i32
    %c0_i32_1 = arith.constant 0 : i32
    return %c0_i32, %c0_i32_0 : i32, i32
  }
  func.func @transform_5(%arg0: i32) -> (i32, i32) {
    %c0_i32 = arith.constant 0 : i32
    %c0_i32_0 = arith.constant 0 : i32
    %c0_i32_1 = arith.constant 0 : i32
    return %c0_i32, %c0_i32_0 : i32, i32
  }
  func.func @transform_6(%arg0: i32) -> (i32, i32) {
    %c0_i32 = arith.constant 0 : i32
    %c0_i32_0 = arith.constant 0 : i32
    %c0_i32_1 = arith.constant 0 : i32
    return %c0_i32, %c0_i32_0 : i32, i32
  }
  func.func @transform_7(%arg0: i32) -> (i32, i32) {
    %c0_i32 = arith.constant 0 : i32
    %c0_i32_0 = arith.constant 0 : i32
    %c0_i32_1 = arith.constant 0 : i32
    return %c0_i32, %c0_i32_0 : i32, i32
  }
  func.func @transform_8(%arg0: i32) -> (i32, i32) {
    %c0_i32 = arith.constant 0 : i32
    %c0_i32_0 = arith.constant 0 : i32
    %c0_i32_1 = arith.constant 0 : i32
    return %c0_i32, %c0_i32_0 : i32, i32
  }
  func.func @transform_9(%arg0: i32) -> (i32, i32) {
    %c0_i32 = arith.constant 0 : i32
    %c0_i32_0 = arith.constant 0 : i32
    %c0_i32_1 = arith.constant 0 : i32
    return %c0_i32, %c0_i32_0 : i32, i32
  }
  func.func @transform_10(%arg0: i32) -> (i32, i32, i32) {
    %c0_i32 = arith.constant 0 : i32
    %c0_i32_0 = arith.constant 0 : i32
    %c0_i32_1 = arith.constant 0 : i32
    return %arg0, %c0_i32, %c0_i32_0 : i32, i32, i32
  }
}

</mosaic_0001>

<bundles_post_ra>
// kernel: tpu_custom_call.1
= control target key start
LH: loop header
LB: loop body
LE: loop exit
PB: predicated region body
PF: predicated region fallthrough
CT: control target
= control target key end

     0   :  { %15 = vsyncpa [#allocation3], 0  ;;  %s6080_s0 = inlined_call_operand.hbm [shape: f32[4,16,128], index: 0, kind: input, shape index: {}]   ;;  %s6081_s1 = inlined_call_operand.hbm [shape: f32[1,16,16], index: 1, kind: input, shape index: {}]   ;;  %s6082_s2 = inlined_call_operand.hbm [shape: bf16[128,384], index: 2, kind: input, shape index: {}]   ;;  %s6083_s3 = inlined_call_operand.vmem [shape: f32[1,384], index: 3, kind: input, shape index: {}]   ;;  %s6084_s4 = inlined_call_operand.hbm [shape: bf16[128,128], index: 4, kind: input, shape index: {}]   ;;  %s6085_s5 = inlined_call_operand.vmem [shape: f32[1,128], index: 5, kind: input, shape index: {}]   ;;  %s6086_s6 = inlined_call_operand.hbm [shape: bf16[128,512], index: 6, kind: input, shape index: {}]   ;;  %s6087_s7 = inlined_call_operand.vmem [shape: f32[1,512], index: 7, kind: input, shape index: {}]   ;;  %s6088_s8 = inlined_call_operand.hbm [shape: bf16[512,128], index: 8, kind: input, shape index: {}]   ;;  %s6089_s9 = inlined_call_operand.vmem [shape: f32[1,128], index: 9, kind: input, shape index: {}]   ;;  %s6090_s10 = inlined_call_operand.hbm [shape: f32[4,16,128], index: 10, kind: output, shape index: {}]  }
   0x1   :  { %16 = vsyncpa [#allocation6], 0 }
   0x2   :  { %17 = vsyncpa [#allocation9], 0 }
   0x3   :  { %18 = vsyncpa [#allocation12], 0 }
   0x4   :  { %19 = vsyncpa [#allocation4], 0  ;;  %s5123_s13 = smov [#allocation5]   ;;  %s5124_s15 = smov [#allocation8]  }
   0x5   :  { %s37_s14 = sshll.u32 %s5123_s13, 4  ;;  %s63_s16 = sshll.u32 %s5124_s15, 4  ;;  %s38_s14 = int_to_ptr.vmem [resolvable:$true] %s37_s14  ;;  %s5198_s16 = int_to_ptr.vmem [resolvable:$true] %s63_s16 }
   0x6   :  { %s4959_s19 = scalar_lea.hbm %s6081_s1, 256 }
   0x7   :  { %p4960_p0 = scmp.ne.s32.totalorder %s6081_s1, %s4959_s19  ;;  %p4963_p1 = scmp.lt.u32.totalorder %s4959_s19, %s6081_s1 }
   0x9   :  { %p4965_p2 = pnand %p4963_p1, %p4960_p0 }
   0xb   :  { %4968 = shalt.err (!%p4965_p2)
}
   0xc   :  { %s4969_s24 = scalar_lea.vmem %s38_s14, 256  ;;  %p4974_p4 = scmp.lt.s32.totalorder %s38_s14, %s38_s14 }
   0xd   :  { %p4970_p3 = scmp.ne.s32.totalorder %s38_s14, %s4969_s24  ;;  %p4975_p5 = scmp.lt.s32.totalorder %s4969_s24, %s4969_s24 }
   0xf   :  { %p4976_p6 = por %p4975_p5, %p4974_p4 }
  0x11   :  { %p4977_p7 = pnand %p4976_p6, %p4970_p3 }
  0x13   :  { %4980 = shalt.err (!%p4977_p7)
}
  0x14   :  { %s5125_s25 = smov 128   ;;  %s5126_s26 = smov 8  }
  0x15   :  { %43 = dma.hbm_to_vmem [thread:$0]  %s6081_s1, 256, %s38_s14, [#allocation6], %s5125_s25, %s5125_s25, %s5126_s26  }
  0x16   :  { %s4981_s11 = scalar_lea.hbm %s6084_s4, 1024 }
  0x17   :  { %p4982_p8 = scmp.ne.s32.totalorder %s6084_s4, %s4981_s11  ;;  %p4985_p9 = scmp.lt.u32.totalorder %s4981_s11, %s6084_s4 }
  0x19   :  { %p4987_p10 = pnand %p4985_p9, %p4982_p8 }
  0x1b   :  { %4990 = shalt.err (!%p4987_p10)
}
  0x1c   :  { %s4991_s18 = scalar_lea.vmem %s5198_s16, 1024  ;;  %p4996_p12 = scmp.lt.s32.totalorder %s5198_s16, %s5198_s16 }
  0x1d   :  { %p4992_p11 = scmp.ne.s32.totalorder %s5198_s16, %s4991_s18  ;;  %p4997_p13 = scmp.lt.s32.totalorder %s4991_s18, %s4991_s18 }
  0x1f   :  { %p4998_p0 = por %p4997_p13, %p4996_p12 }
  0x21   :  { %p4999_p1 = pnand %p4998_p0, %p4992_p11 }
  0x23   :  { %5002 = shalt.err (!%p4999_p1)
}
  0x24   :  { %s5127_s1 = smov 64   ;;  %s5128_s14 = smov 4  }
  0x25   :  { %69 = dma.hbm_to_vmem [thread:$0]  %s6084_s4, 1024, %s5198_s16, [#allocation9], %s5127_s1, %s5127_s1, %s5128_s14  }
  0x26   :  { %s5129_s21 = smov [#allocation2]   ;;  %s5130_s23 = smov [#allocation7]  }
  0x27   :  { %s25_s22 = sshll.u32 %s5129_s21, 4  ;;  %s49_s24 = sshll.u32 %s5130_s23, 4  ;;  %s26_s22 = int_to_ptr.vmem [resolvable:$true] %s25_s22  ;;  %s5235_s24 = int_to_ptr.vmem [resolvable:$true] %s49_s24 }
  0x28   :  { %s5003_s29 = scalar_lea.hbm %s6080_s0, 1024 }
  0x29   :  { %p5004_p2 = scmp.ne.s32.totalorder %s6080_s0, %s5003_s29  ;;  %p5007_p3 = scmp.lt.u32.totalorder %s5003_s29, %s6080_s0 }
  0x2b   :  { %p5009_p4 = pnand %p5007_p3, %p5004_p2 }
  0x2d   :  { %5012 = shalt.err (!%p5009_p4)
}
  0x2e   :  { %s5013_s4 = scalar_lea.vmem %s26_s22, 1024  ;;  %p5018_p6 = scmp.lt.s32.totalorder %s26_s22, %s26_s22 }
  0x2f   :  { %p5014_p5 = scmp.ne.s32.totalorder %s26_s22, %s5013_s4  ;;  %p5019_p7 = scmp.lt.s32.totalorder %s5013_s4, %s5013_s4 }
  0x31   :  { %p5020_p8 = por %p5019_p7, %p5018_p6 }
  0x33   :  { %p5021_p9 = pnand %p5020_p8, %p5014_p5 }
  0x35   :  { %5024 = shalt.err (!%p5021_p9)
}
  0x36   :  { %31 = dma.hbm_to_vmem [thread:$0]  %s6080_s0, 1024, %s26_s22, [#allocation3], %s5125_s25, %s5125_s25, %s5126_s26  }
  0x37   :  { %s5025_s19 = scalar_lea.hbm %s6082_s2, 3072 }
  0x38   :  { %p5026_p10 = scmp.ne.s32.totalorder %s6082_s2, %s5025_s19  ;;  %p5029_p11 = scmp.lt.u32.totalorder %s5025_s19, %s6082_s2 }
  0x3a   :  { %p5031_p12 = pnand %p5029_p11, %p5026_p10 }
  0x3c   :  { %5034 = shalt.err (!%p5031_p12)
}
  0x3d   :  { %s5035_s28 = scalar_lea.vmem %s5235_s24, 3072  ;;  %p5040_p0 = scmp.lt.s32.totalorder %s5235_s24, %s5235_s24 }
  0x3e   :  { %p5036_p13 = scmp.ne.s32.totalorder %s5235_s24, %s5035_s28  ;;  %p5041_p1 = scmp.lt.s32.totalorder %s5035_s28, %s5035_s28 }
  0x40   :  { %p5042_p2 = por %p5041_p1, %p5040_p0 }
  0x42   :  { %p5043_p3 = pnand %p5042_p2, %p5036_p13 }
  0x44   :  { %5046 = shalt.err (!%p5043_p3)
}
  0x45   :  { %s5131_s0 = smov 192   ;;  %s5132_s22 = smov 12  }
  0x46   :  { %55 = dma.hbm_to_vmem [thread:$0]  %s6082_s2, 3072, %s5235_s24, [#allocation6], %s5131_s0, %s5131_s0, %s5132_s22  }
  0x47   :  { %s5133_s11 = smov [#allocation10]   ;;  %s5047_s16 = scalar_lea.hbm %s6086_s6, 4096 }
  0x48   :  { %s77_s12 = sshll.u32 %s5133_s11, 4  ;;  %p5048_p4 = scmp.ne.s32.totalorder %s6086_s6, %s5047_s16  ;;  %s78_s12 = int_to_ptr.vmem [resolvable:$true] %s77_s12 }
  0x49   :  { %p5051_p5 = scmp.lt.u32.totalorder %s5047_s16, %s6086_s6 }
  0x4b   :  { %p5053_p6 = pnand %p5051_p5, %p5048_p4 }
  0x4d   :  { %5056 = shalt.err (!%p5053_p6)
}
  0x4e   :  { %s5057_s20 = scalar_lea.vmem %s78_s12, 4096  ;;  %p5062_p8 = scmp.lt.s32.totalorder %s78_s12, %s78_s12 }
  0x4f   :  { %p5058_p7 = scmp.ne.s32.totalorder %s78_s12, %s5057_s20  ;;  %p5063_p9 = scmp.lt.s32.totalorder %s5057_s20, %s5057_s20 }
  0x51   :  { %p5064_p10 = por %p5063_p9, %p5062_p8 }
  0x53   :  { %p5065_p11 = pnand %p5064_p10, %p5058_p7 }
  0x55   :  { %5068 = shalt.err (!%p5065_p11)
}
  0x56   :  { %s5134_s2 = smov 256   ;;  %s5135_s24 = smov 16  }
  0x57   :  { %83 = dma.hbm_to_vmem [thread:$0]  %s6086_s6, 4096, %s78_s12, [#allocation9], %s5134_s2, %s5134_s2, %s5135_s24  }
  0x58   :  { %s5136_s27 = smov [#allocation11]   ;;  %s5069_s29 = scalar_lea.hbm %s6088_s8, 4096 }
  0x59   :  { %s91_s28 = sshll.u32 %s5136_s27, 4  ;;  %p5070_p12 = scmp.ne.s32.totalorder %s6088_s8, %s5069_s29  ;;  %s92_s28 = int_to_ptr.vmem [resolvable:$true] %s91_s28 }
  0x5a   :  { %p5073_p13 = scmp.lt.u32.totalorder %s5069_s29, %s6088_s8 }
  0x5c   :  { %p5075_p0 = pnand %p5073_p13, %p5070_p12 }
  0x5e   :  { %5078 = shalt.err (!%p5075_p0)
}
  0x5f   :  { %s5079_s16 = scalar_lea.vmem %s92_s28, 4096  ;;  %p5084_p2 = scmp.lt.s32.totalorder %s92_s28, %s92_s28 }
  0x60   :  { %p5080_p1 = scmp.ne.s32.totalorder %s92_s28, %s5079_s16  ;;  %p5085_p3 = scmp.lt.s32.totalorder %s5079_s16, %s5079_s16 }
  0x62   :  { %p5086_p4 = por %p5085_p3, %p5084_p2 }
  0x64   :  { %p5087_p5 = pnand %p5086_p4, %p5080_p1 }
  0x66   :  { %5090 = shalt.err (!%p5087_p5)
}
  0x67   :  { %97 = dma.hbm_to_vmem [thread:$0]  %s6088_s8, 4096, %s92_s28, [#allocation12], %s5127_s1, %s5127_s1, %s5128_s14  }
  0x68   :  { %5113 = dma.done.wait [#allocation3], 1024  }
  0x69   :  { %5114 = vsyncadd [#allocation3], 4294966272 }
  0x6a   :  { %5115 = dma.done.wait [#allocation6], 3328  }
  0x6b   :  { %5116 = vsyncadd [#allocation6], 4294963968 }
  0x6c   :  { %5117 = dma.done.wait [#allocation9], 5120  }
  0x6d   :  { %5118 = vsyncadd [#allocation9], 4294962176 }
  0x6e   :  { %5119 = dma.done.wait [#allocation12], 4096  }
  0x6f   :  { %5120 = vsyncadd [#allocation12], 4294963200  ;;  %v119_v0 = vld [vmem:[#allocation2] sm:$0xff]  ;;  %v121_v1 = vld [vmem:[#allocation2 + $0x10] sm:$0xff]  ;;  %v5137_v63 = vmov 0   ;;  %s5141_s15 = smov 32  }
  0x70   :  { %127 = vadd.xlane.f32.xlu0 %v119_v0  ;;  %131 = vadd.xlane.f32.xlu1 %v121_v1  ;;  %v120_v2 = vld [vmem:[#allocation2 + $0x8] sm:$0xff]  ;;  %v122_v3 = vld [vmem:[#allocation2 + $0x18] sm:$0xff]  ;;  %v123_v4 = vld [vmem:[#allocation2 + $0x20] sm:$0xff] }
  0x71   :  { %v124_v5 = vld [vmem:[#allocation2 + $0x28] sm:$0xff]  ;;  %v125_v6 = vld [vmem:[#allocation2 + $0x30] sm:$0xff]  ;;  %v126_v7 = vld [vmem:[#allocation2 + $0x38] sm:$0xff]  ;;  %485 = vmatprep.mubr.bf16.mxu0 %v5137_v63 }
  0x72   :  { %v4637_v40 = vld [vmem:[#allocation7 + $0x4] ss:$12 sps:$4 sm:$0xff]   ;;  %v4639_v41 = vld [vmem:[#allocation7] ss:$12 sps:$4 sm:$0xff]   ;;  %v4640_v42 = vld [vmem:[#allocation7 + $0x1c] ss:$12 sps:$4 sm:$0xff]  }
  0x73   :  { %453 = vmatprep.subr.bf16.mxu0 %v4637_v40  ;;  %v4642_v43 = vld [vmem:[#allocation7 + $0x8] ss:$12 sps:$4 sm:$0xff]   ;;  %v4643_v44 = vld [vmem:[#allocation7 + $0x18] ss:$12 sps:$4 sm:$0xff]   ;;  %v4646_v46 = vld [vmem:[#allocation7 + $0x20] ss:$12 sps:$4 sm:$0xff]  }
  0x74   :  { %129 = vadd.xlane.f32.xlu0 %v120_v2  ;;  %133 = vadd.xlane.f32.xlu1 %v122_v3  ;;  %v4644_v45 = vld [vmem:[#allocation7 + $0x34] ss:$12 sps:$4 sm:$0xff]   ;;  %v4647_v47 = vld [vmem:[#allocation7 + $0x30] ss:$12 sps:$4 sm:$0xff]   ;;  %v4648_v48 = vld [vmem:[#allocation7 + $0x4c] ss:$12 sps:$4 sm:$0xff]  }
  0x75   :  { %454 = vmatpush1.bf16.msra.mxu0 %v4639_v41  ;;  %4329 = vmatprep.subr.bf16.mxu1 %v4642_v43  ;;  %v4650_v49 = vld [vmem:[#allocation7 + $0x38] ss:$12 sps:$4 sm:$0xff]   ;;  %v4651_v50 = vld [vmem:[#allocation7 + $0x48] ss:$12 sps:$4 sm:$0xff]   ;;  %v4654_v52 = vld [vmem:[#allocation7 + $0x50] ss:$12 sps:$4 sm:$0xff]  }
  0x76   :  { %455 = vmatprep.subr.bf16.mxu0 %v4640_v42  ;;  %4330 = vmatpush3.bf16.msra.mxu1 %v4642_v43  ;;  %v4652_v51 = vld [vmem:[#allocation7 + $0x64] ss:$12 sps:$4 sm:$0xff]   ;;  %v4655_v53 = vld [vmem:[#allocation7 + $0x60] ss:$12 sps:$4 sm:$0xff]   ;;  %v4656_v54 = vld [vmem:[#allocation7 + $0x7c] ss:$12 sps:$4 sm:$0xff]  }
  0x77   :  { %4331 = vmatprep.subr.bf16.mxu1 %v4646_v46  ;;  %v4658_v55 = vld [vmem:[#allocation7 + $0x68] ss:$12 sps:$4 sm:$0xff]   ;;  %v4659_v56 = vld [vmem:[#allocation7 + $0x78] ss:$12 sps:$4 sm:$0xff]   ;;  %v4662_v58 = vld [vmem:[#allocation7 + $0x80] ss:$12 sps:$4 sm:$0xff]  }
  0x78   :  { %135 = vadd.xlane.f32.xlu0 %v123_v4  ;;  %137 = vadd.xlane.f32.xlu1 %v124_v5  ;;  %v4660_v57 = vld [vmem:[#allocation7 + $0x94] ss:$12 sps:$4 sm:$0xff]   ;;  %v4663_v59 = vld [vmem:[#allocation7 + $0x90] ss:$12 sps:$4 sm:$0xff]   ;;  %v4664_v60 = vld [vmem:[#allocation7 + $0xac] ss:$12 sps:$4 sm:$0xff]  }
  0x79   :  { %456 = vmatpush1.bf16.msra.mxu0 %v4643_v44  ;;  %v4666_v61 = vld [vmem:[#allocation7 + $0x98] ss:$12 sps:$4 sm:$0xff]   ;;  %v4667_v62 = vld [vmem:[#allocation7 + $0xa8] ss:$12 sps:$4 sm:$0xff]  }
  0x7a   :  { %457 = vmatprep.subr.bf16.mxu0 %v4644_v45  ;;  %4332 = vmatpush3.bf16.msra.mxu1 %v4646_v46 }
  0x7b   :  { %4333 = vmatprep.subr.bf16.mxu1 %v4650_v49 }
  0x7c   :  { %139 = vadd.xlane.f32.xlu0 %v125_v6  ;;  %141 = vadd.xlane.f32.xlu1 %v126_v7 }
  0x7d   :  { %458 = vmatpush1.bf16.msra.mxu0 %v4647_v47 }
  0x7e   :  { %459 = vmatprep.subr.bf16.mxu0 %v4648_v48  ;;  %4334 = vmatpush3.bf16.msra.mxu1 %v4650_v49 }
  0x7f   :  { %4335 = vmatprep.subr.bf16.mxu1 %v4654_v52 }
  0x81   :  { %460 = vmatpush1.bf16.msra.mxu0 %v4651_v50 }
  0x82   :  { %461 = vmatprep.subr.bf16.mxu0 %v4652_v51  ;;  %4336 = vmatpush3.bf16.msra.mxu1 %v4654_v52 }
  0x83   :  { %4337 = vmatprep.subr.bf16.mxu1 %v4658_v55 }
  0x85   :  { %462 = vmatpush1.bf16.msra.mxu0 %v4655_v53 }
  0x86   :  { %463 = vmatprep.subr.bf16.mxu0 %v4656_v54  ;;  %4338 = vmatpush3.bf16.msra.mxu1 %v4658_v55 }
  0x87   :  { %4339 = vmatprep.subr.bf16.mxu1 %v4662_v58 }
  0x89   :  { %464 = vmatpush1.bf16.msra.mxu0 %v4659_v56 }
  0x8a   :  { %465 = vmatprep.subr.bf16.mxu0 %v4660_v57  ;;  %4340 = vmatpush3.bf16.msra.mxu1 %v4662_v58 }
  0x8b   :  { %4341 = vmatprep.subr.bf16.mxu1 %v4666_v61 }
  0x8d   :  { %466 = vmatpush1.bf16.msra.mxu0 %v4663_v59 }
  0x8e   :  { %467 = vmatprep.subr.bf16.mxu0 %v4664_v60  ;;  %4342 = vmatpush3.bf16.msra.mxu1 %v4666_v61 }
  0x91   :  { %468 = vmatpush1.bf16.msra.mxu0 %v4667_v62 }
  0xfd   :  { %v128_v8 = vpop.xlane.xlu0 %127  ;;  %v132_v9 = vpop.xlane.xlu1 %131 }
  0xfe   :  { %v144_v10 = vmul.f32 0.0078125, %v128_v8  ;;  %v146_v11 = vmul.f32 0.0078125, %v132_v9 }
 0x100   :  { %v5296_v12 = vsub.f32 %v119_v0, %v144_v10  ;;  %v5298_v13 = vsub.f32 %v121_v1, %v146_v11  ;;  %v4668_v0 = vld [vmem:[#allocation7 + $0xb0] ss:$12 sps:$4 sm:$0xff]  }
 0x101   :  { %v130_v14 = vpop.xlane.xlu0 %129  ;;  %v134_v15 = vpop.xlane.xlu1 %133  ;;  %4343 = vmatprep.subr.bf16.mxu1 %v4668_v0 }
 0x102   :  { %v145_v16 = vmul.f32 0.0078125, %v130_v14  ;;  %v160_v17 = vmul.f32 %v5296_v12, %v5296_v12  ;;  %v147_v18 = vmul.f32 0.0078125, %v134_v15  ;;  %v162_v19 = vmul.f32 %v5298_v13, %v5298_v13  ;;  %4344 = vmatpush3.bf16.msra.mxu1 %v4668_v0 }
 0x104   :  { %168 = vadd.xlane.f32.xlu0 %v160_v17  ;;  %v5304_v20 = vsub.f32 %v120_v2, %v145_v16  ;;  %v5306_v21 = vsub.f32 %v122_v3, %v147_v18 }
 0x105   :  { %v136_v22 = vpop.xlane.xlu0 %135  ;;  %v138_v23 = vpop.xlane.xlu1 %137 }
 0x106   :  { %v148_v24 = vmul.f32 0.0078125, %v136_v22  ;;  %v161_v25 = vmul.f32 %v5304_v20, %v5304_v20  ;;  %v149_v26 = vmul.f32 0.0078125, %v138_v23  ;;  %v163_v27 = vmul.f32 %v5306_v21, %v5306_v21 }
 0x108   :  { %172 = vadd.xlane.f32.xlu0 %v162_v19  ;;  %170 = vadd.xlane.f32.xlu1 %v161_v25  ;;  %v5312_v28 = vsub.f32 %v123_v4, %v148_v24  ;;  %v5314_v29 = vsub.f32 %v124_v5, %v149_v26 }
 0x109   :  { %v140_v30 = vpop.xlane.xlu0 %139  ;;  %v142_v31 = vpop.xlane.xlu1 %141 }
 0x10a   :  { %v150_v32 = vmul.f32 0.0078125, %v140_v30  ;;  %v164_v33 = vmul.f32 %v5312_v28, %v5312_v28  ;;  %v151_v34 = vmul.f32 0.0078125, %v142_v31  ;;  %v165_v35 = vmul.f32 %v5314_v29, %v5314_v29 }
 0x10c   :  { %174 = vadd.xlane.f32.xlu1 %v163_v27  ;;  %176 = vadd.xlane.f32.xlu0 %v164_v33  ;;  %v5320_v36 = vsub.f32 %v125_v6, %v150_v32  ;;  %v5322_v37 = vsub.f32 %v126_v7, %v151_v34 }
 0x10e   :  { %v166_v38 = vmul.f32 %v5320_v36, %v5320_v36  ;;  %v167_v39 = vmul.f32 %v5322_v37, %v5322_v37 }
 0x110   :  { %178 = vadd.xlane.f32.xlu1 %v165_v35  ;;  %180 = vadd.xlane.f32.xlu0 %v166_v38 }
 0x114   :  { %182 = vadd.xlane.f32.xlu1 %v167_v39 }
 0x191   :  { %v169_v1 = vpop.xlane.xlu0 %168 }
 0x192   :  { %v184_v2 = vmul.f32 0.007874016, %v169_v1 }
 0x194   :  { %4757 = vrsqrt.f32 %v184_v2  ;;  %vm194_vm0 = vcmp.eq.f32.partialorder %v184_v2, inf  ;;  %v197_v19 = vand.u32 2147483648, %v184_v2  ;;  %vm196_vm1 = vcmp.eq.f32.partialorder %v184_v2, 0.0 }
 0x195   :  { %v171_v3 = vpop.xlane.xlu1 %170  ;;  %v173_v4 = vpop.xlane.xlu0 %172 }
 0x196   :  { %v185_v5 = vmul.f32 0.007874016, %v171_v3  ;;  %v186_v6 = vmul.f32 0.007874016, %v173_v4 }
 0x198   :  { %4759 = vrsqrt.f32 %v185_v5  ;;  %vm201_vm2 = vcmp.eq.f32.partialorder %v185_v5, inf  ;;  %vm203_vm3 = vcmp.eq.f32.partialorder %v185_v5, 0.0  ;;  %v204_v32 = vand.u32 2147483648, %v185_v5 }
 0x199   :  { %4761 = vrsqrt.f32 %v186_v6  ;;  %v175_v7 = vpop.xlane.xlu1 %174  ;;  %v177_v8 = vpop.xlane.xlu0 %176  ;;  %vm208_vm4 = vcmp.eq.f32.partialorder %v186_v6, inf  ;;  %vm210_vm5 = vcmp.eq.f32.partialorder %v186_v6, 0.0  ;;  %v211_v35 = vand.u32 2147483648, %v186_v6 }
 0x19a   :  { %v187_v9 = vmul.f32 0.007874016, %v175_v7  ;;  %v188_v10 = vmul.f32 0.007874016, %v177_v8 }
 0x19c   :  { %4763 = vrsqrt.f32 %v187_v9  ;;  %vm215_vm6 = vcmp.eq.f32.partialorder %v187_v9, inf  ;;  %vm222_vm7 = vcmp.eq.f32.partialorder %v188_v10, inf  ;;  %v225_v40 = vand.u32 2147483648, %v188_v10 }
 0x19d   :  { %4765 = vrsqrt.f32 %v188_v10  ;;  %v179_v11 = vpop.xlane.xlu1 %178  ;;  %v181_v14 = vpop.xlane.xlu0 %180  ;;  %v218_v46 = vand.u32 2147483648, %v187_v9  ;;  %vm224_vm8 = vcmp.eq.f32.partialorder %v188_v10, 0.0  ;;  %vm217_vm9 = vcmp.eq.f32.partialorder %v187_v9, 0.0 }
 0x19e   :  { %v4758_v15 = vpop.eup %4757  ;;  %v5329_v16 = vmul.f32 0.007874016, %v179_v11  ;;  %v5331_v17 = vmul.f32 0.007874016, %v181_v14 }
 0x19f   :  { %v193_v18 = vmul.f32 %v4758_v15, %v184_v2 }
 0x1a0   :  { %4767 = vrsqrt.f32 %v5329_v16  ;;  %vm229_vm10 = vcmp.eq.f32.partialorder %v5329_v16, inf  ;;  %vm236_vm11 = vcmp.eq.f32.partialorder %v5331_v17, inf  ;;  %v239_v52 = vand.u32 2147483648, %v5331_v17 }
 0x1a1   :  { %v195_v22 = vsel %vm194_vm0, %v184_v2, %v193_v18  ;;  %4769 = vrsqrt.f32 %v5331_v17  ;;  %v183_v23 = vpop.xlane.xlu1 %182  ;;  %v232_v58 = vand.u32 2147483648, %v5329_v16  ;;  %vm238_vm12 = vcmp.eq.f32.partialorder %v5331_v17, 0.0 }
 0x1a2   :  { %v4760_v24 = vpop.eup %4759  ;;  %v5335_v25 = vmul.f32 0.007874016, %v183_v23  ;;  %v198_v26 = vsel %vm196_vm1, %v197_v19, %v195_v22  ;;  %vm231_vm13 = vcmp.eq.f32.partialorder %v5329_v16, 0.0  ;;  %vm5139_vm0 = vmmov 0  }
 0x1a3   :  { %v4762_v27 = vpop.eup %4761  ;;  %v200_v30 = vmul.f32 %v4760_v24, %v185_v5  ;;  %v248_v31 = vadd.f32 1e-06, %v198_v26  ;;  %vm605_vm1 = vcmask 261120  }
 0x1a4   :  { %v207_v33 = vmul.f32 %v4762_v27, %v186_v6  ;;  %4771 = vrsqrt.f32 %v5335_v25  ;;  %vm243_vm14 = vcmp.eq.f32.partialorder %v5335_v25, inf  ;;  %vm245_vm15 = vcmp.eq.f32.partialorder %v5335_v25, 0.0 }
 0x1a5   :  { %v202_v34 = vsel %vm201_vm2, %v185_v5, %v200_v30  ;;  %4773 = vrcp.f32 %v248_v31  ;;  %v246_v1 = vand.u32 2147483648, %v5335_v25  ;;  %vm810_vm2 = vcmask 130048  }
 0x1a6   :  { %v4764_v38 = vpop.eup %4763  ;;  %v209_v39 = vsel %vm208_vm4, %v186_v6, %v207_v33  ;;  %v205_v41 = vsel %vm203_vm3, %v204_v32, %v202_v34  ;;  %v308_v32 = vld [vmem:[%s6083_s3] sm:$0x7]  ;;  %s5140_s3 = smov 96  }
 0x1a7   :  { %v4766_v42 = vpop.eup %4765  ;;  %v214_v43 = vmul.f32 %v4764_v38, %v187_v9  ;;  %v249_v44 = vadd.f32 1e-06, %v205_v41  ;;  %v212_v45 = vsel %vm210_vm5, %v211_v35, %v209_v39 }
 0x1a8   :  { %v221_v47 = vmul.f32 %v4766_v42, %v188_v10  ;;  %v250_v48 = vadd.f32 1e-06, %v212_v45 }
 0x1a9   :  { %v216_v49 = vsel %vm215_vm6, %v187_v9, %v214_v43  ;;  %4775 = vrcp.f32 %v249_v44 }
 0x1aa   :  { %v4768_v50 = vpop.eup %4767  ;;  %v223_v51 = vsel %vm222_vm7, %v188_v10, %v221_v47  ;;  %v219_v53 = vsel %vm217_vm9, %v218_v46, %v216_v49  ;;  %4777 = vrcp.f32 %v250_v48 }
 0x1ab   :  { %v4770_v54 = vpop.eup %4769  ;;  %v228_v55 = vmul.f32 %v4768_v50, %v5329_v16  ;;  %v251_v56 = vadd.f32 1e-06, %v219_v53  ;;  %v226_v57 = vsel %vm224_vm8, %v225_v40, %v223_v51 }
 0x1ac   :  { %v235_v59 = vmul.f32 %v4770_v54, %v5331_v17  ;;  %v252_v60 = vadd.f32 1e-06, %v226_v57 }
 0x1ad   :  { %v230_v61 = vsel %vm229_vm10, %v5329_v16, %v228_v55  ;;  %4779 = vrcp.f32 %v251_v56 }
 0x1ae   :  { %v4772_v62 = vpop.eup %4771  ;;  %v237_v0 = vsel %vm236_vm11, %v5331_v17, %v235_v59  ;;  %v233_v2 = vsel %vm231_vm13, %v232_v58, %v230_v61  ;;  %4781 = vrcp.f32 %v252_v60 }
 0x1af   :  { %v242_v3 = vmul.f32 %v4772_v62, %v5335_v25  ;;  %v253_v4 = vadd.f32 1e-06, %v233_v2  ;;  %v240_v5 = vsel %vm238_vm12, %v239_v52, %v237_v0  ;;  %v4774_v7 = vpop.eup %4773 }
 0x1b0   :  { %v254_v6 = vadd.f32 1e-06, %v240_v5  ;;  %v264_v14 = vmul.f32 %v4774_v7, %v5296_v12 }
 0x1b1   :  { %v244_v8 = vsel %vm243_vm14, %v5335_v25, %v242_v3  ;;  %4783 = vrcp.f32 %v253_v4 }
 0x1b2   :  { %v247_v9 = vsel %vm245_vm15, %v246_v1, %v244_v8  ;;  %4785 = vrcp.f32 %v254_v6 }
 0x1b3   :  { %v4776_v10 = vpop.eup %4775  ;;  %v255_v11 = vadd.f32 1e-06, %v247_v9 }
 0x1b4   :  { %v265_v15 = vmul.f32 %v4776_v10, %v5304_v20  ;;  %v4778_v16 = vpop.eup %4777 }
 0x1b5   :  { %4787 = vrcp.f32 %v255_v11  ;;  %v266_v19 = vmul.f32 %v4778_v16, %v5298_v13 }
 0x1b6   :  { %v272_v17 = vpack.c.bf16 %v265_v15, %v264_v14 }
 0x1b7   :  { %v4780_v18 = vpop.eup %4779 }
 0x1b8   :  { %486 = vmatmul.mubr.bf16.vlgmr.msra.gmra.mrb[0].mxu0 %v272_v17  ;;  %4345 = vmatprep.mubr.bf16.mxu1 %v272_v17  ;;  %v267_v22 = vmul.f32 %v4780_v18, %v5306_v21  ;;  %v4782_v23 = vpop.eup %4781 }
 0x1b9   :  { %495 = vmatprep.mubr.bf16.mxu0 %v5137_v63  ;;  %v268_v12 = vmul.f32 %v4782_v23, %v5312_v28  ;;  %v5138_v28 = vmov 0.0  }
 0x1ba   :  { %v273_v24 = vpack.c.bf16 %v267_v22, %v266_v19  ;;  %4353 = vmatprep.subr.bf16.mxu1 %v5138_v28  ;;  %4365 = vmatprep.subr.bf16.mxu0 %v5138_v28 }
 0x1bb   :  { %v4784_v25 = vpop.eup %4783 }
 0x1bc   :  { %4346 = vmatmul.mubr.bf16.vlgmr.msra.gmra.mrb[0].mxu1 %v273_v24  ;;  %v269_v20 = vmul.f32 %v4784_v25, %v5314_v29  ;;  %v4786_v26 = vpop.eup %4785  ;;  %v310_v29 = vlaneseq }
 0x1bd   :  { %v270_v31 = vmul.f32 %v4786_v26, %v5320_v36 }
 0x1be   :  { %v274_v27 = vpack.c.bf16 %v269_v20, %v268_v12  ;;  %v5375_v36 = vshrl.u32 %v310_v29, 7 }
 0x1bf   :  { %v4788_v30 = vpop.eup %4787 }
 0x1c0   :  { %496 = vmatmul.mubr.bf16.gmra.mrb[4].mxu0 %v273_v24  ;;  %4349 = vmatprep.mubr.bf16.mxu1 %v274_v27  ;;  %v271_v13 = vmul.f32 %v4788_v30, %v5322_v37  ;;  %v312_v37 = vsub.s32 0, %v5375_v36  ;;  %v316_v33 = vsub.s32 1, %v5375_v36  ;;  %v320_v35 = vsub.s32 2, %v5375_v36 }
 0x1c1   :  { %505 = vmatprep.mubr.bf16.mxu0 %v5137_v63 }
 0x1c2   :  { %v275_v21 = vpack.c.bf16 %v271_v13, %v270_v31  ;;  %v5384_v34 = vrot.slane %v308_v32, %v312_v37  ;;  %v5389_v39 = vrot.slane %v308_v32, %v316_v33  ;;  %v321_v45 = vrot.slane %v308_v32, %v320_v35 }
 0x1c4   :  { %4350 = vmatmul.mubr.bf16.gmra.mrb[4].mxu1 %v275_v21 }
 0x1c5   :  { %4355 = vmatprep.mubr.msk.bf16.mxu1 %vm5139_vm0, %v5138_v28 }
 0x1c8   :  { %506 = vmatmul.mubr.bf16.gmra.mrb[8].mxu0 %v274_v27 }
 0x1c9   :  { %515 = vmatprep.mubr.bf16.mxu0 %v5137_v63 }
 0x1d0   :  { %516 = vmatmul.mubr.bf16.gmra.mrb[12].mxu0 %v275_v21 }
 0x1d1   :  { %4367 = vmatprep.mubr.msk.bf16.mxu0 %vm5139_vm0, %v5138_v28 }
 0x28b   :  { %v487_v38 = vpop.f32.mrb[0].mxu0 }
 0x28c   :  { %v489_v40 = vpop.f32.mrb[1].mxu0  ;;  %v488_v42 = vadd.f32 %v487_v38, %v5384_v34 }
 0x28d   :  { %v491_v41 = vpop.f32.mrb[2].mxu0  ;;  %v490_v46 = vadd.f32 %v489_v40, %v5389_v39 }
 0x28e   :  { %v492_v43 = vadd.f32 %v491_v41, %v5384_v34  ;;  %v493_v44 = vpop.f32.mrb[3].mxu0 }
 0x28f   :  { %v494_v47 = vadd.f32 %v493_v44, %v5389_v39  ;;  %v4347_v48 = vpop.f32.mrb[0].mxu1 }
 0x290   :  { %v5397_v49 = vpack.c.bf16 %v492_v43, %v488_v42  ;;  %v560_v50 = vpop.f32.mrb[1].mxu1  ;;  %v569_v53 = vadd.f32 %v4347_v48, %v321_v45 }
 0x291   :  { %v5399_v51 = vpack.c.bf16 %v494_v47, %v490_v46  ;;  %v4348_v52 = vpop.f32.mrb[2].mxu1  ;;  %v561_v56 = vadd.f32 %v560_v50, %v321_v45 }
 0x292   :  { %v572_v54 = vadd.f32 %v4348_v52, %v321_v45  ;;  %v563_v55 = vpop.f32.mrb[3].mxu1 }
 0x293   :  { %v564_v57 = vadd.f32 %v563_v55, %v321_v45  ;;  %v497_v58 = vpop.f32.mrb[4].mxu0  ;;  %v610_v59 = vsel %vm605_vm1, %v5399_v51, 0 }
 0x294   :  { %v5403_v60 = vpack.c.bf16 %v572_v54, %v569_v53  ;;  %v499_v61 = vpop.f32.mrb[5].mxu0  ;;  %4354 = vmatpush3.bf16.xpose.msra.mxu1 %v610_v59  ;;  %v498_v1 = vadd.f32 %v497_v58, %v5384_v34 }
 0x295   :  { %v5405_v62 = vpack.c.bf16 %v564_v57, %v561_v56  ;;  %v501_v0 = vpop.f32.mrb[6].mxu0  ;;  %4359 = vmatprep.subr.bf16.mxu1 %v5138_v28  ;;  %v500_v4 = vadd.f32 %v499_v61, %v5389_v39  ;;  %v5469_v56 = vld [vmem:[#allocation5] sm:$0xff]  ;;  %v5472_v61 = vld [vmem:[#allocation5 + $0x8] sm:$0xff] }
 0x296   :  { %v502_v2 = vadd.f32 %v501_v0, %v5384_v34  ;;  %v503_v3 = vpop.f32.mrb[7].mxu0 }
 0x297   :  { %v504_v5 = vadd.f32 %v503_v3, %v5389_v39  ;;  %v4351_v6 = vpop.f32.mrb[4].mxu1 }
 0x298   :  { %v5412_v7 = vpack.c.bf16 %v502_v2, %v498_v1  ;;  %v585_v8 = vadd.f32 %v4351_v6, %v321_v45  ;;  %v576_v9 = vpop.f32.mrb[5].mxu1 }
 0x299   :  { %v5414_v10 = vpack.c.bf16 %v504_v5, %v500_v4  ;;  %v577_v11 = vadd.f32 %v576_v9, %v321_v45  ;;  %v4352_v14 = vpop.f32.mrb[6].mxu1 }
 0x29a   :  { %v588_v15 = vadd.f32 %v4352_v14, %v321_v45  ;;  %v579_v16 = vpop.f32.mrb[7].mxu1 }
 0x29b   :  { %v580_v17 = vadd.f32 %v579_v16, %v321_v45  ;;  %v507_v18 = vpop.f32.mrb[8].mxu0  ;;  %4356 = vmatmul.mubr.msk.bf16.vlgmr.msra.gmra.mrb[8].mxu1 %vm605_vm1, %v5397_v49  ;;  %v657_v19 = vsel %vm605_vm1, %v5414_v10, 0 }
 0x29c   :  { %v5420_v22 = vpack.c.bf16 %v588_v15, %v585_v8  ;;  %v509_v23 = vpop.f32.mrb[9].mxu0  ;;  %4360 = vmatpush3.bf16.xpose.msra.mxu1 %v657_v19  ;;  %4361 = vmatprep.mubr.msk.bf16.mxu1 %vm5139_vm0, %v5138_v28  ;;  %v508_v12 = vadd.f32 %v507_v18, %v5384_v34 }
 0x29d   :  { %v5424_v24 = vpack.c.bf16 %v580_v17, %v577_v11  ;;  %v511_v25 = vpop.f32.mrb[10].mxu0  ;;  %4371 = vmatprep.subr.bf16.mxu1 %v5138_v28  ;;  %v510_v27 = vadd.f32 %v509_v23, %v5389_v39 }
 0x29e   :  { %v512_v20 = vadd.f32 %v511_v25, %v5384_v34  ;;  %v513_v26 = vpop.f32.mrb[11].mxu0 }
 0x29f   :  { %v514_v30 = vadd.f32 %v513_v26, %v5389_v39 }
 0x2a0   :  { %v5431_v31 = vpack.c.bf16 %v512_v20, %v508_v12 }
 0x2a1   :  { %v5433_v13 = vpack.c.bf16 %v514_v30, %v510_v27 }
 0x2a3   :  { %v517_v21 = vpop.f32.mrb[12].mxu0  ;;  %4362 = vmatmul.mubr.msk.bf16.vlgmr.msra.gmra.mrb[12].mxu1 %vm605_vm1, %v5412_v7  ;;  %v704_v29 = vsel %vm605_vm1, %v5433_v13, 0 }
 0x2a4   :  { %v519_v32 = vpop.f32.mrb[13].mxu0  ;;  %4366 = vmatpush3.bf16.xpose.msra.mxu0 %v704_v29  ;;  %4373 = vmatprep.mubr.msk.bf16.mxu1 %vm5139_vm0, %v5138_v28  ;;  %v518_v40 = vadd.f32 %v517_v21, %v5384_v34 }
 0x2a5   :  { %v521_v38 = vpop.f32.mrb[14].mxu0  ;;  %4377 = vmatprep.subr.bf16.mxu0 %v5138_v28  ;;  %v520_v43 = vadd.f32 %v519_v32, %v5389_v39 }
 0x2a6   :  { %v522_v41 = vadd.f32 %v521_v38, %v5384_v34  ;;  %v523_v42 = vpop.f32.mrb[15].mxu0 }
 0x2a7   :  { %v524_v44 = vadd.f32 %v523_v42, %v5389_v39 }
 0x2a8   :  { %v5446_v45 = vpack.c.bf16 %v522_v41, %v518_v40 }
 0x2a9   :  { %v5448_v46 = vpack.c.bf16 %v524_v44, %v520_v43 }
 0x2ab   :  { %4368 = vmatmul.mubr.msk.bf16.vlgmr.msra.gmra.mrb[16].mxu0 %vm605_vm1, %v5431_v31  ;;  %v751_v47 = vsel %vm605_vm1, %v5448_v46, 0 }
 0x2ac   :  { %4372 = vmatpush3.bf16.xpose.msra.mxu1 %v751_v47  ;;  %4378 = vmatpush3.bf16.msra.mxu0 %v5405_v62 }
 0x2ad   :  { %4383 = vmatprep.subr.bf16.mxu1 %v5138_v28  ;;  %4379 = vmatprep.mubr.msk.bf16.mxu0 %vm5139_vm0, %v5138_v28 }
 0x2ae   :  { %4389 = vmatprep.subr.bf16.mxu0 %v5138_v28 }
 0x2b3   :  { %4374 = vmatmul.mubr.msk.bf16.vlgmr.msra.gmra.mrb[16].mxu1 %vm605_vm1, %v5446_v45 }
 0x2b4   :  { %4384 = vmatpush3.bf16.msra.mxu1 %v5403_v60  ;;  %4385 = vmatprep.mubr.msk.bf16.mxu1 %vm5139_vm0, %v5138_v28 }
 0x2b5   :  { %4395 = vmatprep.subr.bf16.mxu1 %v5138_v28 }
 0x36e   :  { %v5465_v34 = vpop.f32.mrb[8].mxu1 }
 0x36f   :  { %v4357_v39 = vpop.f32.mrb[9].mxu1 }
 0x370   :  { %v5467_v48 = vpop.f32.mrb[10].mxu1 }
 0x371   :  { %v4358_v50 = vpop.f32.mrb[11].mxu1 }
 0x376   :  { %v693_v52 = vpop.f32.mrb[12].mxu1 }
 0x377   :  { %v796_v53 = vmul.f32 0.17677669, %v693_v52  ;;  %v4363_v54 = vpop.f32.mrb[13].mxu1 }
 0x378   :  { %v696_v55 = vpop.f32.mrb[14].mxu1  ;;  %v794_v54 = vmul.f32 0.17677669, %v5465_v34 }
 0x379   :  { %v797_v57 = vmul.f32 0.17677669, %v696_v55  ;;  %v4364_v58 = vpop.f32.mrb[15].mxu1  ;;  %v804_v59 = vadd.f32 %v796_v53, %v5469_v56 }
 0x37b   :  { %v817_v0 = vsel %vm810_vm2, %v804_v59, -inf  ;;  %v805_v1 = vadd.f32 %v797_v57, %v5472_v61  ;;  %v802_v57 = vadd.f32 %v794_v54, %v5469_v56 }
 0x37c   :  { %818 = vmax.xlane.f32.xlu0 %v817_v0 }
 0x37d   :  { %v820_v2 = vsel %vm810_vm2, %v805_v1, -inf }
 0x37e   :  { %821 = vmax.xlane.f32.xlu1 %v820_v2  ;;  %v740_v3 = vpop.f32.mrb[16].mxu0 }
 0x37f   :  { %v4369_v4 = vpop.f32.mrb[17].mxu0  ;;  %v798_v55 = vmul.f32 0.17677669, %v740_v3 }
 0x380   :  { %v743_v5 = vpop.f32.mrb[18].mxu0 }
 0x381   :  { %v4370_v6 = vpop.f32.mrb[19].mxu0  ;;  %v799_v58 = vmul.f32 0.17677669, %v743_v5  ;;  %v806_v0 = vadd.f32 %v798_v55, %v5469_v56 }
 0x383   :  { %v823_v2 = vsel %vm810_vm2, %v806_v0, -inf  ;;  %v807_v4 = vadd.f32 %v799_v58, %v5472_v61 }
 0x385   :  { %v826_v34 = vsel %vm810_vm2, %v807_v4, -inf }
 0x386   :  { %v787_v8 = vpop.f32.mrb[16].mxu1 }
 0x387   :  { %v800_v9 = vmul.f32 0.17677669, %v787_v8  ;;  %v4375_v11 = vpop.f32.mrb[17].mxu1 }
 0x388   :  { %v790_v14 = vpop.f32.mrb[18].mxu1 }
 0x389   :  { %v801_v15 = vmul.f32 0.17677669, %v790_v14  ;;  %v4376_v16 = vpop.f32.mrb[19].mxu1  ;;  %v808_v17 = vadd.f32 %v800_v9, %v5469_v56 }
 0x38b   :  { %v829_v18 = vsel %vm810_vm2, %v808_v17, -inf  ;;  %v809_v19 = vadd.f32 %v801_v15, %v5472_v61 }
 0x38c   :  { %830 = vmax.xlane.f32.xlu0 %v829_v18 }
 0x38d   :  { %v832_v23 = vsel %vm810_vm2, %v809_v19, -inf }
 0x38e   :  { %833 = vmax.xlane.f32.xlu1 %v832_v23 }
 0x409   :  { %v819_v25 = vpop.xlane.xlu0 %818 }
 0x40a   :  { %v837_v12 = vsub.f32 %v804_v59, %v819_v25  ;;  %v811_v59 = vsel %vm810_vm2, %v802_v57, -inf }
 0x40b   :  { %v822_v20 = vpop.xlane.xlu1 %821 }
 0x40c   :  { %v847_v26 = vmul.f32 1.442695, %v837_v12  ;;  %v838_v27 = vsub.f32 %v805_v1, %v822_v20  ;;  %v795_v1 = vmul.f32 0.17677669, %v5467_v48 }
 0x40e   :  { %4789 = vpow2.f32 %v847_v26  ;;  %v849_v30 = vmul.f32 1.442695, %v838_v27  ;;  %v803_v6 = vadd.f32 %v795_v1, %v5472_v61 }
 0x410   :  { %4791 = vpow2.f32 %v849_v30  ;;  %v814_v3 = vsel %vm810_vm2, %v803_v6, -inf }
 0x418   :  { %v4790_v21 = vpop.eup %4789 }
 0x419   :  { %v831_v29 = vpop.xlane.xlu0 %830  ;;  %v865_v32 = vsel %vm810_vm2, %v4790_v21, 0.0 }
 0x41a   :  { %v4792_v38 = vpop.eup %4791  ;;  %v841_v40 = vsub.f32 %v808_v17, %v831_v29  ;;  %866 = vadd.xlane.f32.xlu0 %v865_v32 }
 0x41b   :  { %v834_v41 = vpop.xlane.xlu1 %833  ;;  %v868_v42 = vsel %vm810_vm2, %v4792_v38, 0.0 }
 0x41c   :  { %v855_v43 = vmul.f32 1.442695, %v841_v40  ;;  %v842_v44 = vsub.f32 %v809_v19, %v834_v41  ;;  %869 = vadd.xlane.f32.xlu1 %v868_v42 }
 0x41e   :  { %4793 = vpow2.f32 %v855_v43  ;;  %v857_v47 = vmul.f32 1.442695, %v842_v44 }
 0x420   :  { %4795 = vpow2.f32 %v857_v47 }
 0x428   :  { %v4794_v39 = vpop.eup %4793 }
 0x429   :  { %v877_v50 = vsel %vm810_vm2, %v4794_v39, 0.0 }
 0x42a   :  { %v4796_v52 = vpop.eup %4795  ;;  %878 = vadd.xlane.f32.xlu0 %v877_v50 }
 0x42b   :  { %v880_v53 = vsel %vm810_vm2, %v4796_v52, 0.0 }
 0x42c   :  { %881 = vadd.xlane.f32.xlu1 %v880_v53 }
 0x43d   :  { %1141 = vrot.lane.b32.xlu1 %v5412_v7, %s5140_s3 }
 0x440   :  { %1144 = vrot.lane.b32.xlu0 %v5414_v10, %s5140_s3 }
 0x441   :  { %1250 = vrot.lane.b32.xlu1 %v5448_v46, %s5140_s3 }
 0x445   :  { %1247 = vrot.lane.b32.xlu1 %v5446_v45, %s5140_s3 }
 0x45f   :  { %812 = vmax.xlane.f32.xlu0 %v811_v59 }
 0x463   :  { %824 = vmax.xlane.f32.xlu0 %v823_v2 }
 0x467   :  { %827 = vmax.xlane.f32.xlu0 %v826_v34 }
 0x469   :  { %815 = vmax.xlane.f32.xlu1 %v814_v3 }
 0x4a7   :  { %v867_v5 = vpop.xlane.xlu0 %866 }
 0x4a8   :  { %4797 = vrcp.f32 %v867_v5 }
 0x4a9   :  { %v870_v8 = vpop.xlane.xlu1 %869 }
 0x4aa   :  { %4799 = vrcp.f32 %v870_v8 }
 0x4b2   :  { %v4798_v9 = vpop.eup %4797 }
 0x4b3   :  { %v893_v48 = vmul.f32 %v4798_v9, %v4790_v21 }
 0x4b4   :  { %v4800_v11 = vpop.eup %4799 }
 0x4b5   :  { %v894_v14 = vmul.f32 %v4800_v11, %v4792_v38 }
 0x4b7   :  { %v879_v15 = vpop.xlane.xlu0 %878  ;;  %v900_v16 = vpack.c.bf16 %v894_v14, %v893_v48 }
 0x4b8   :  { %4801 = vrcp.f32 %v879_v15 }
 0x4b9   :  { %4386 = vmatmul.mubr.msk.bf16.vlgmr.msra.gmra.mrb[20].mxu1 %vm810_vm2, %v900_v16  ;;  %v882_v17 = vpop.xlane.xlu1 %881 }
 0x4ba   :  { %4396 = vmatpush3.bf16.msra.mxu1 %v5420_v22  ;;  %4803 = vrcp.f32 %v882_v17  ;;  %4397 = vmatprep.mubr.msk.bf16.mxu1 %vm5139_vm0, %v5138_v28 }
 0x4bb   :  { %4407 = vmatprep.subr.bf16.mxu1 %v5138_v28  ;;  %v1145_v12 = vpop.permute.xlu0 %1144 }
 0x4bc   :  { %v1150_v27 = vsel %vm605_vm1, %v1145_v12, 0 }
 0x4bd   :  { %v1142_v26 = vpop.permute.xlu1 %1141 }
 0x4c1   :  { %v1251_v30 = vpop.permute.xlu1 %1250 }
 0x4c2   :  { %v4802_v18 = vpop.eup %4801  ;;  %v1256_v21 = vsel %vm605_vm1, %v1251_v30, 0 }
 0x4c3   :  { %v897_v23 = vmul.f32 %v4802_v18, %v4794_v39 }
 0x4c4   :  { %v4804_v19 = vpop.eup %4803 }
 0x4c5   :  { %v898_v25 = vmul.f32 %v4804_v19, %v4796_v52  ;;  %v1248_v29 = vpop.permute.xlu1 %1247 }
 0x4c7   :  { %v902_v20 = vpack.c.bf16 %v898_v25, %v897_v23 }
 0x4c9   :  { %4398 = vmatmul.mubr.msk.bf16.vlgmr.msra.gmra.mrb[24].mxu1 %vm810_vm2, %v902_v20 }
 0x4ca   :  { %4408 = vmatpush3.bf16.xpose.msra.mxu1 %v1150_v27  ;;  %4409 = vmatprep.mubr.msk.bf16.mxu1 %vm5139_vm0, %v5138_v28 }
 0x4cb   :  { %4419 = vmatprep.subr.bf16.mxu1 %v5138_v28 }
 0x4d1   :  { %4410 = vmatmul.mubr.msk.bf16.vlgmr.msra.gmra.mrb[28].mxu1 %vm605_vm1, %v1142_v26 }
 0x4d2   :  { %4420 = vmatpush3.bf16.xpose.msra.mxu1 %v1256_v21  ;;  %4421 = vmatprep.mubr.msk.bf16.mxu1 %vm5139_vm0, %v5138_v28 }
 0x4d3   :  { %4431 = vmatprep.subr.bf16.mxu1 %v5138_v28 }
 0x4d9   :  { %4422 = vmatmul.mubr.msk.bf16.vlgmr.msra.gmra.mrb[32].mxu1 %vm605_vm1, %v1248_v29 }
 0x4da   :  { %4433 = vmatprep.mubr.msk.bf16.mxu1 %vm5139_vm0, %v5138_v28 }
 0x4ec   :  { %v813_v32 = vpop.xlane.xlu0 %812 }
 0x4ed   :  { %v835_v38 = vsub.f32 %v802_v57, %v813_v32 }
 0x4ef   :  { %v843_v40 = vmul.f32 1.442695, %v835_v38 }
 0x4f0   :  { %v825_v41 = vpop.xlane.xlu0 %824 }
 0x4f1   :  { %4805 = vpow2.f32 %v843_v40  ;;  %v839_v42 = vsub.f32 %v806_v0, %v825_v41 }
 0x4f3   :  { %v851_v43 = vmul.f32 1.442695, %v839_v42 }
 0x4f4   :  { %v828_v44 = vpop.xlane.xlu0 %827 }
 0x4f5   :  { %4807 = vpow2.f32 %v851_v43  ;;  %v840_v47 = vsub.f32 %v807_v4, %v828_v44 }
 0x4f6   :  { %v816_v39 = vpop.xlane.xlu1 %815 }
 0x4f7   :  { %v836_v50 = vsub.f32 %v803_v6, %v816_v39  ;;  %v853_v52 = vmul.f32 1.442695, %v840_v47 }
 0x4f9   :  { %v845_v53 = vmul.f32 1.442695, %v836_v50 }
 0x4fb   :  { %v4806_v54 = vpop.eup %4805  ;;  %4809 = vpow2.f32 %v845_v53 }
 0x4fc   :  { %v859_v55 = vsel %vm810_vm2, %v4806_v54, 0.0  ;;  %4811 = vpow2.f32 %v853_v52 }
 0x4fd   :  { %860 = vadd.xlane.f32.xlu0 %v859_v55 }
 0x4ff   :  { %v4808_v58 = vpop.eup %4807 }
 0x500   :  { %v871_v57 = vsel %vm810_vm2, %v4808_v58, 0.0 }
 0x501   :  { %872 = vadd.xlane.f32.xlu0 %v871_v57 }
 0x505   :  { %v4810_v59 = vpop.eup %4809 }
 0x506   :  { %v862_v0 = vsel %vm810_vm2, %v4810_v59, 0.0  ;;  %v4812_v1 = vpop.eup %4811 }
 0x507   :  { %863 = vadd.xlane.f32.xlu1 %v862_v0  ;;  %v874_v2 = vsel %vm810_vm2, %v4812_v1, 0.0 }
 0x50b   :  { %875 = vadd.xlane.f32.xlu1 %v874_v2 }
 0x517   :  { %1091 = vrot.lane.b32.xlu0 %v5399_v51, %s5140_s3 }
 0x51c   :  { %1088 = vrot.lane.b32.xlu1 %v5397_v49, %s5140_s3 }
 0x520   :  { %1197 = vrot.lane.b32.xlu1 %v5433_v13, %s5140_s3 }
 0x524   :  { %1194 = vrot.lane.b32.xlu1 %v5431_v31, %s5140_s3 }
 0x58a   :  { %v861_v8 = vpop.xlane.xlu0 %860 }
 0x58b   :  { %4813 = vrcp.f32 %v861_v8 }
 0x58c   :  { %v5533_v4 = vpop.f32.mrb[20].mxu1 }
 0x58d   :  { %v4387_v6 = vpop.f32.mrb[21].mxu1 }
 0x58e   :  { %v5535_v34 = vpop.f32.mrb[22].mxu1  ;;  %v873_v11 = vpop.xlane.xlu0 %872 }
 0x58f   :  { %v1080_v3 = vpack.c.bf16 %v5535_v34, %v5533_v4  ;;  %v4388_v5 = vpop.f32.mrb[23].mxu1 }
 0x592   :  { %v1092_v39 = vpop.permute.xlu0 %1091 }
 0x593   :  { %v1097_v55 = vsel %vm605_vm1, %v1092_v39, 0 }
 0x594   :  { %v864_v9 = vpop.xlane.xlu1 %863 }
 0x595   :  { %4815 = vrcp.f32 %v864_v9  ;;  %v4814_v15 = vpop.eup %4813 }
 0x596   :  { %v891_v25 = vmul.f32 %v4814_v15, %v4806_v54 }
 0x598   :  { %v876_v48 = vpop.xlane.xlu1 %875 }
 0x599   :  { %4817 = vrcp.f32 %v876_v48 }
 0x59a   :  { %4819 = vrcp.f32 %v873_v11 }
 0x59c   :  { %v5539_v14 = vpop.f32.mrb[24].mxu1  ;;  %v1089_v53 = vpop.permute.xlu1 %1088 }
 0x59d   :  { %v4399_v16 = vpop.f32.mrb[25].mxu1 }
 0x59e   :  { %v5541_v17 = vpop.f32.mrb[26].mxu1 }
 0x59f   :  { %v4816_v18 = vpop.eup %4815  ;;  %v1082_v19 = vpack.c.bf16 %v5541_v17, %v5539_v14  ;;  %v4400_v23 = vpop.f32.mrb[27].mxu1 }
 0x5a0   :  { %v892_v12 = vmul.f32 %v4816_v18, %v4810_v59  ;;  %v1198_v8 = vpop.permute.xlu1 %1197 }
 0x5a1   :  { %v1203_v9 = vsel %vm605_vm1, %v1198_v8, 0 }
 0x5a2   :  { %v899_v20 = vpack.c.bf16 %v892_v12, %v891_v25 }
 0x5a3   :  { %v4818_v26 = vpop.eup %4817 }
 0x5a4   :  { %4380 = vmatmul.mubr.msk.bf16.vlgmr.msra.gmra.mrb[20].mxu0 %vm810_vm2, %v899_v20  ;;  %v1186_v27 = vpop.f32.mrb[28].mxu1  ;;  %v4820_v30 = vpop.eup %4819  ;;  %v896_v32 = vmul.f32 %v4818_v26, %v4812_v1 }
 0x5a5   :  { %4390 = vmatpush3.bf16.msra.mxu0 %v5424_v24  ;;  %v1301_v21 = vmul.f32 0.17677669, %v1186_v27  ;;  %v4411_v29 = vpop.f32.mrb[29].mxu1  ;;  %4391 = vmatprep.mubr.msk.bf16.mxu0 %vm5139_vm0, %v5138_v28  ;;  %v895_v43 = vmul.f32 %v4820_v30, %v4808_v58  ;;  %v1195_v48 = vpop.permute.xlu1 %1194 }
 0x5a6   :  { %v1189_v38 = vpop.f32.mrb[30].mxu1  ;;  %4401 = vmatprep.subr.bf16.mxu0 %v5138_v28 }
 0x5a7   :  { %v1302_v40 = vmul.f32 0.17677669, %v1189_v38  ;;  %v4412_v41 = vpop.f32.mrb[31].mxu1  ;;  %v1309_v42 = vadd.f32 %v1301_v21, %v5469_v56  ;;  %v901_v50 = vpack.c.bf16 %v896_v32, %v895_v43 }
 0x5a9   :  { %v1321_v44 = vsel %vm810_vm2, %v1309_v42, -inf  ;;  %v1310_v47 = vadd.f32 %v1302_v40, %v5472_v61 }
 0x5aa   :  { %1322 = vmax.xlane.f32.xlu0 %v1321_v44 }
 0x5ab   :  { %v1324_v52 = vsel %vm810_vm2, %v1310_v47, -inf }
 0x5ac   :  { %4392 = vmatmul.mubr.msk.bf16.vlgmr.msra.gmra.mrb[24].mxu0 %vm810_vm2, %v901_v50  ;;  %1325 = vmax.xlane.f32.xlu1 %v1324_v52  ;;  %v1292_v54 = vpop.f32.mrb[32].mxu1 }
 0x5ad   :  { %v1305_v57 = vmul.f32 0.17677669, %v1292_v54  ;;  %v4423_v59 = vpop.f32.mrb[33].mxu1  ;;  %4403 = vmatprep.mubr.msk.bf16.mxu0 %vm5139_vm0, %v5138_v28 }
 0x5ae   :  { %4402 = vmatpush3.bf16.xpose.msra.mxu0 %v1097_v55  ;;  %v1295_v58 = vpop.f32.mrb[34].mxu1 }
 0x5af   :  { %v1306_v0 = vmul.f32 0.17677669, %v1295_v58  ;;  %v4424_v1 = vpop.f32.mrb[35].mxu1  ;;  %v1313_v2 = vadd.f32 %v1305_v57, %v5469_v56  ;;  %4413 = vmatprep.subr.bf16.mxu0 %v5138_v28 }
 0x5b1   :  { %v1333_v6 = vsel %vm810_vm2, %v1313_v2, -inf  ;;  %v1314_v5 = vadd.f32 %v1306_v0, %v5472_v61 }
 0x5b2   :  { %1334 = vmax.xlane.f32.xlu0 %v1333_v6 }
 0x5b3   :  { %v1336_v11 = vsel %vm810_vm2, %v1314_v5, -inf }
 0x5b5   :  { %4404 = vmatmul.mubr.msk.bf16.vlgmr.msra.gmra.mrb[28].mxu0 %vm605_vm1, %v1089_v53 }
 0x5b6   :  { %4414 = vmatpush3.bf16.xpose.msra.mxu0 %v1203_v9  ;;  %1337 = vmax.xlane.f32.xlu0 %v1336_v11 }
 0x5b7   :  { %4415 = vmatprep.mubr.msk.bf16.mxu0 %vm5139_vm0, %v5138_v28  ;;  %4425 = vmatprep.subr.bf16.mxu0 %v5138_v28 }
 0x5bd   :  { %4416 = vmatmul.mubr.msk.bf16.vlgmr.msra.gmra.mrb[32].mxu0 %vm605_vm1, %v1195_v48 }
 0x5be   :  { %4427 = vmatprep.mubr.msk.bf16.mxu0 %vm5139_vm0, %v5138_v28 }
 0x637   :  { %v1323_v15 = vpop.xlane.xlu0 %1322 }
 0x638   :  { %v1341_v16 = vsub.f32 %v1309_v42, %v1323_v15 }
 0x639   :  { %v1326_v18 = vpop.xlane.xlu1 %1325 }
 0x63a   :  { %v1351_v23 = vmul.f32 1.442695, %v1341_v16  ;;  %v1342_v25 = vsub.f32 %v1310_v47, %v1326_v18 }
 0x63c   :  { %4821 = vpow2.f32 %v1351_v23  ;;  %v1353_v12 = vmul.f32 1.442695, %v1342_v25 }
 0x63e   :  { %4823 = vpow2.f32 %v1353_v12 }
 0x63f   :  { %v1335_v20 = vpop.xlane.xlu0 %1334 }
 0x640   :  { %v1345_v26 = vsub.f32 %v1313_v2, %v1335_v20 }
 0x642   :  { %v1359_v27 = vmul.f32 1.442695, %v1345_v26 }
 0x643   :  { %v1338_v41 = vpop.xlane.xlu0 %1337 }
 0x644   :  { %4825 = vpow2.f32 %v1359_v27  ;;  %v1346_v42 = vsub.f32 %v1314_v5, %v1338_v41 }
 0x646   :  { %v5571_v30 = vpop.eup %4821  ;;  %v1361_v43 = vmul.f32 1.442695, %v1346_v42 }
 0x647   :  { %v1369_v21 = vsel %vm810_vm2, %v5571_v30, 0.0 }
 0x648   :  { %v5575_v29 = vpop.eup %4823  ;;  %1370 = vadd.xlane.f32.xlu0 %v1369_v21  ;;  %4827 = vpow2.f32 %v1361_v43 }
 0x649   :  { %v1372_v32 = vsel %vm810_vm2, %v5575_v29, 0.0 }
 0x64a   :  { %1373 = vadd.xlane.f32.xlu1 %v1372_v32 }
 0x64e   :  { %v5579_v38 = vpop.eup %4825 }
 0x64f   :  { %v1381_v40 = vsel %vm810_vm2, %v5579_v38, 0.0 }
 0x650   :  { %1382 = vadd.xlane.f32.xlu0 %v1381_v40 }
 0x652   :  { %v5599_v53 = vpop.eup %4827 }
 0x653   :  { %v1384_v54 = vsel %vm810_vm2, %v5599_v53, 0.0 }
 0x65b   :  { %1552 = vrot.lane.b32.xlu1 %v5420_v22, %s5140_s3 }
 0x666   :  { %1456 = vrot.lane.b32.xlu0 %v5403_v60, %s5140_s3 }
 0x66a   :  { %1838 = vrot.lane.b32.xlu0 %v5414_v10, %s5127_s1 }
 0x66e   :  { %1889 = vrot.lane.b32.xlu0 %v5433_v13, %s5127_s1 }
 0x672   :  { %1940 = vrot.lane.b32.xlu0 %v5448_v46, %s5127_s1 }
 0x677   :  { %v5593_v44 = vpop.f32.mrb[20].mxu0 }
 0x678   :  { %v4381_v47 = vpop.f32.mrb[21].mxu0 }
 0x679   :  { %v5595_v39 = vpop.f32.mrb[22].mxu0 }
 0x67a   :  { %v1079_v50 = vpack.c.bf16 %v5595_v39, %v5593_v44  ;;  %v4382_v52 = vpop.f32.mrb[23].mxu0 }
 0x67f   :  { %v5603_v55 = vpop.f32.mrb[24].mxu0  ;;  %1385 = vadd.xlane.f32.xlu1 %v1384_v54 }
 0x680   :  { %v4393_v57 = vpop.f32.mrb[25].mxu0 }
 0x681   :  { %v5605_v59 = vpop.f32.mrb[26].mxu0 }
 0x682   :  { %v1081_v58 = vpack.c.bf16 %v5605_v59, %v5603_v55  ;;  %v4394_v0 = vpop.f32.mrb[27].mxu0 }
 0x688   :  { %v1133_v1 = vpop.f32.mrb[28].mxu0 }
 0x689   :  { %v1299_v2 = vmul.f32 0.17677669, %v1133_v1  ;;  %v4405_v6 = vpop.f32.mrb[29].mxu0 }
 0x68a   :  { %v1136_v5 = vpop.f32.mrb[30].mxu0 }
 0x68b   :  { %v4406_v8 = vpop.f32.mrb[31].mxu0  ;;  %v1307_v9 = vadd.f32 %v1299_v2, %v5469_v56  ;;  %v1300_v21 = vmul.f32 0.17677669, %v1136_v5 }
 0x68d   :  { %v1315_v48 = vsel %vm810_vm2, %v1307_v9, -inf  ;;  %v5629_v32 = vadd.f32 %v1300_v21, %v5472_v61 }
 0x68f   :  { %v1318_v40 = vsel %vm810_vm2, %v5629_v32, -inf }
 0x690   :  { %v1239_v11 = vpop.f32.mrb[32].mxu0  ;;  %1787 = vrot.lane.b32.xlu1 %v5399_v51, %s5127_s1 }
 0x691   :  { %v1303_v15 = vmul.f32 0.17677669, %v1239_v11  ;;  %v4417_v16 = vpop.f32.mrb[33].mxu0  ;;  %1316 = vmax.xlane.f32.xlu0 %v1315_v48 }
 0x692   :  { %v1242_v18 = vpop.f32.mrb[34].mxu0 }
 0x693   :  { %v1304_v23 = vmul.f32 0.17677669, %v1242_v18  ;;  %v4418_v25 = vpop.f32.mrb[35].mxu0  ;;  %v1311_v12 = vadd.f32 %v1303_v15, %v5469_v56 }
 0x694   :  { %1785 = vrot.lane.b32.xlu1 %v5397_v49, %s5127_s1 }
 0x695   :  { %v1327_v20 = vsel %vm810_vm2, %v1311_v12, -inf  ;;  %v5618_v26 = vadd.f32 %v1304_v23, %v5472_v61 }
 0x696   :  { %1328 = vmax.xlane.f32.xlu0 %v1327_v20 }
 0x697   :  { %v1330_v27 = vsel %vm810_vm2, %v5618_v26, -inf }
 0x698   :  { %1836 = vrot.lane.b32.xlu1 %v5412_v7, %s5127_s1 }
 0x69a   :  { %1331 = vmax.xlane.f32.xlu0 %v1330_v27 }
 0x69c   :  { %1887 = vrot.lane.b32.xlu1 %v5431_v31, %s5127_s1 }
 0x6a0   :  { %1938 = vrot.lane.b32.xlu1 %v5446_v45, %s5127_s1 }
 0x6c4   :  { %1319 = vmax.xlane.f32.xlu1 %v1318_v40 }
 0x6d5   :  { %v1371_v41 = vpop.xlane.xlu0 %1370 }
 0x6d6   :  { %4829 = vrcp.f32 %v1371_v41 }
 0x6d7   :  { %v1374_v42 = vpop.xlane.xlu1 %1373 }
 0x6d8   :  { %4831 = vrcp.f32 %v1374_v42 }
 0x6db   :  { %v1553_v2 = vpop.permute.xlu1 %1552 }
 0x6dd   :  { %v1383_v43 = vpop.xlane.xlu0 %1382 }
 0x6de   :  { %4833 = vrcp.f32 %v1383_v43 }
 0x6e0   :  { %v4830_v47 = vpop.eup %4829 }
 0x6e1   :  { %v1457_v52 = vpop.permute.xlu0 %1456  ;;  %v1397_v57 = vmul.f32 %v4830_v47, %v5571_v30 }
 0x6e2   :  { %v4832_v54 = vpop.eup %4831  ;;  %4432 = vmatpush3.bf16.msra.mxu1 %v1457_v52 }
 0x6e3   :  { %v1398_v0 = vmul.f32 %v4832_v54, %v5575_v29  ;;  %4443 = vmatprep.subr.bf16.mxu1 %v5138_v28 }
 0x6e5   :  { %v1404_v1 = vpack.c.bf16 %v1398_v0, %v1397_v57  ;;  %v1839_v5 = vpop.permute.xlu0 %1838 }
 0x6e7   :  { %4434 = vmatmul.mubr.msk.bf16.vlgmr.msra.gmra.mrb[36].mxu1 %vm810_vm2, %v1404_v1 }
 0x6e8   :  { %4444 = vmatpush3.bf16.msra.mxu1 %v1553_v2  ;;  %4445 = vmatprep.mubr.msk.bf16.mxu1 %vm5139_vm0, %v5138_v28  ;;  %v4834_v30 = vpop.eup %4833 }
 0x6e9   :  { %4473 = vmatprep.subr.bf16.mxu1 %v5138_v28  ;;  %v1890_v8 = vpop.permute.xlu0 %1889  ;;  %v1401_v29 = vmul.f32 %v4834_v30, %v5579_v38 }
 0x6ed   :  { %v1941_v16 = vpop.permute.xlu0 %1940 }
 0x6ee   :  { %v1946_v57 = vsel %vm605_vm1, %v1941_v16, 0 }
 0x70c   :  { %v1386_v6 = vpop.xlane.xlu1 %1385 }
 0x70d   :  { %4835 = vrcp.f32 %v1386_v6 }
 0x710   :  { %v1788_v15 = vpop.permute.xlu1 %1787 }
 0x711   :  { %v1793_v23 = vsel %vm605_vm1, %v1788_v15, 0 }
 0x714   :  { %v1786_v21 = vpop.permute.xlu1 %1785 }
 0x717   :  { %v4836_v11 = vpop.eup %4835 }
 0x718   :  { %v1402_v48 = vmul.f32 %v4836_v11, %v5599_v53  ;;  %v1844_v53 = vsel %vm605_vm1, %v1839_v5, 0  ;;  %v1837_v42 = vpop.permute.xlu1 %1836 }
 0x71a   :  { %v1406_v18 = vpack.c.bf16 %v1402_v48, %v1401_v29 }
 0x71c   :  { %4446 = vmatmul.mubr.msk.bf16.vlgmr.msra.gmra.mrb[40].mxu1 %vm810_vm2, %v1406_v18  ;;  %v1888_v52 = vpop.permute.xlu1 %1887 }
 0x71d   :  { %4474 = vmatpush3.bf16.xpose.msra.mxu1 %v1793_v23  ;;  %4475 = vmatprep.mubr.msk.bf16.mxu1 %vm5139_vm0, %v5138_v28 }
 0x71e   :  { %v1317_v25 = vpop.xlane.xlu0 %1316  ;;  %4479 = vmatprep.subr.bf16.mxu1 %v5138_v28 }
 0x71f   :  { %v1339_v20 = vsub.f32 %v1307_v9, %v1317_v25  ;;  %v1895_v9 = vsel %vm605_vm1, %v1890_v8, 0 }
 0x720   :  { %v1939_v0 = vpop.permute.xlu1 %1938 }
 0x721   :  { %v1347_v27 = vmul.f32 1.442695, %v1339_v20 }
 0x723   :  { %4837 = vpow2.f32 %v1347_v27  ;;  %v1329_v38 = vpop.xlane.xlu0 %1328 }
 0x724   :  { %v1343_v40 = vsub.f32 %v1311_v12, %v1329_v38  ;;  %4476 = vmatmul.mubr.msk.bf16.vlgmr.msra.gmra.mrb[44].mxu1 %vm605_vm1, %v1786_v21 }
 0x725   :  { %4480 = vmatpush3.bf16.xpose.msra.mxu1 %v1844_v53  ;;  %4481 = vmatprep.mubr.msk.bf16.mxu1 %vm5139_vm0, %v5138_v28 }
 0x726   :  { %v1355_v41 = vmul.f32 1.442695, %v1343_v40  ;;  %4485 = vmatprep.subr.bf16.mxu1 %v5138_v28 }
 0x727   :  { %v1332_v1 = vpop.xlane.xlu0 %1331 }
 0x728   :  { %4839 = vpow2.f32 %v1355_v41  ;;  %v1344_v2 = vsub.f32 %v5618_v26, %v1332_v1 }
 0x72a   :  { %v1357_v8 = vmul.f32 1.442695, %v1344_v2 }
 0x72c   :  { %4482 = vmatmul.mubr.msk.bf16.vlgmr.msra.gmra.mrb[48].mxu1 %vm605_vm1, %v1837_v42 }
 0x72d   :  { %v5654_v43 = vpop.eup %4837  ;;  %4486 = vmatpush3.bf16.xpose.msra.mxu1 %v1895_v9  ;;  %4487 = vmatprep.mubr.msk.bf16.mxu1 %vm5139_vm0, %v5138_v28 }
 0x72e   :  { %v1363_v12 = vsel %vm810_vm2, %v5654_v43, 0.0  ;;  %4491 = vmatprep.subr.bf16.mxu1 %v5138_v28 }
 0x72f   :  { %1364 = vadd.xlane.f32.xlu0 %v1363_v12 }
 0x732   :  { %v5661_v47 = vpop.eup %4839 }
 0x733   :  { %v1375_v54 = vsel %vm810_vm2, %v5661_v47, 0.0 }
 0x734   :  { %1376 = vadd.xlane.f32.xlu0 %v1375_v54  ;;  %4488 = vmatmul.mubr.msk.bf16.vlgmr.msra.gmra.mrb[52].mxu1 %vm605_vm1, %v1888_v52 }
 0x735   :  { %4492 = vmatpush3.bf16.xpose.msra.mxu1 %v1946_v57  ;;  %4493 = vmatprep.mubr.msk.bf16.mxu1 %vm5139_vm0, %v5138_v28 }
 0x736   :  { %4503 = vmatprep.subr.bf16.mxu1 %v5138_v28 }
 0x73c   :  { %4494 = vmatmul.mubr.msk.bf16.vlgmr.msra.gmra.mrb[56].mxu1 %vm605_vm1, %v1939_v0 }
 0x73d   :  { %4505 = vmatprep.mubr.msk.bf16.mxu1 %vm5139_vm0, %v5138_v28 }
 0x74a   :  { %1408 = vrot.lane.b32.xlu0 %v5405_v62, %s5140_s3 }
 0x751   :  { %v1320_v6 = vpop.xlane.xlu1 %1319 }
 0x752   :  { %v1340_v5 = vsub.f32 %v5629_v32, %v1320_v6 }
 0x754   :  { %v1349_v30 = vmul.f32 1.442695, %v1340_v5 }
 0x756   :  { %4841 = vpow2.f32 %v1349_v30 }
 0x757   :  { %4843 = vpow2.f32 %v1357_v8 }
 0x760   :  { %v4842_v11 = vpop.eup %4841 }
 0x761   :  { %v1366_v29 = vsel %vm810_vm2, %v4842_v11, 0.0  ;;  %v4844_v48 = vpop.eup %4843 }
 0x762   :  { %1367 = vadd.xlane.f32.xlu1 %v1366_v29  ;;  %v1378_v15 = vsel %vm810_vm2, %v4844_v48, 0.0 }
 0x766   :  { %1379 = vadd.xlane.f32.xlu1 %v1378_v15 }
 0x777   :  { %1504 = vrot.lane.b32.xlu1 %v5424_v24, %s5140_s3 }
 0x7ba   :  { %v5681_v16 = vpop.f32.mrb[36].mxu1 }
 0x7bb   :  { %v4435_v26 = vpop.f32.mrb[37].mxu1 }
 0x7bc   :  { %v1365_v18 = vpop.xlane.xlu0 %1364  ;;  %v5683_v32 = vpop.f32.mrb[38].mxu1 }
 0x7bd   :  { %v1600_v23 = vpack.c.bf16 %v5683_v32, %v5681_v16  ;;  %v4436_v25 = vpop.f32.mrb[39].mxu1  ;;  %4845 = vrcp.f32 %v1365_v18 }
 0x7c1   :  { %v1377_v20 = vpop.xlane.xlu0 %1376 }
 0x7c5   :  { %v1409_v27 = vpop.permute.xlu0 %1408 }
 0x7c6   :  { %4426 = vmatpush3.bf16.msra.mxu0 %v1409_v27 }
 0x7c7   :  { %4437 = vmatprep.subr.bf16.mxu0 %v5138_v28  ;;  %v4846_v52 = vpop.eup %4845 }
 0x7c8   :  { %v1395_v8 = vmul.f32 %v4846_v52, %v5654_v43 }
 0x7ef   :  { %v1368_v21 = vpop.xlane.xlu1 %1367  ;;  %v5688_v38 = vpop.f32.mrb[40].mxu1 }
 0x7f0   :  { %4847 = vrcp.f32 %v1368_v21  ;;  %v4447_v53 = vpop.f32.mrb[41].mxu1 }
 0x7f1   :  { %v5690_v40 = vpop.f32.mrb[42].mxu1 }
 0x7f2   :  { %v1602_v41 = vpack.c.bf16 %v5690_v40, %v5688_v38  ;;  %v4448_v42 = vpop.f32.mrb[43].mxu1  ;;  %v4673_v40 = vld [vmem:[#allocation8 + $0x20] sm:$0xff]  }
 0x7f3   :  { %v1380_v9 = vpop.xlane.xlu1 %1379 }
 0x7f4   :  { %4849 = vrcp.f32 %v1380_v9 }
 0x7f5   :  { %4851 = vrcp.f32 %v1377_v20 }
 0x7f7   :  { %v1829_v12 = vpop.f32.mrb[44].mxu1  ;;  %v1505_v20 = vpop.permute.xlu1 %1504 }
 0x7f8   :  { %v1989_v54 = vmul.f32 0.17677669, %v1829_v12  ;;  %v4477_v57 = vpop.f32.mrb[45].mxu1 }
 0x7f9   :  { %v1832_v0 = vpop.f32.mrb[46].mxu1 }
 0x7fa   :  { %v4848_v1 = vpop.eup %4847  ;;  %v1990_v2 = vmul.f32 0.17677669, %v1832_v0  ;;  %v4478_v6 = vpop.f32.mrb[47].mxu1  ;;  %v5695_v5 = vadd.f32 %v1989_v54, %v5469_v56 }
 0x7fb   :  { %v1396_v30 = vmul.f32 %v4848_v1, %v4842_v11 }
 0x7fc   :  { %v2005_v29 = vsel %vm810_vm2, %v5695_v5, -inf  ;;  %v5701_v15 = vadd.f32 %v1990_v2, %v5472_v61 }
 0x7fd   :  { %2006 = vmax.xlane.f32.xlu1 %v2005_v29  ;;  %v1403_v26 = vpack.c.bf16 %v1396_v30, %v1395_v8 }
 0x7fe   :  { %v4850_v18 = vpop.eup %4849  ;;  %v2008_v25 = vsel %vm810_vm2, %v5701_v15, -inf }
 0x7ff   :  { %4428 = vmatmul.mubr.msk.bf16.vlgmr.msra.gmra.mrb[36].mxu0 %vm810_vm2, %v1403_v26  ;;  %2009 = vmax.xlane.f32.xlu0 %v2008_v25  ;;  %v1880_v27 = vpop.f32.mrb[48].mxu1  ;;  %v4852_v21 = vpop.eup %4851  ;;  %v1400_v53 = vmul.f32 %v4850_v18, %v4844_v48 }
 0x800   :  { %4438 = vmatpush3.bf16.msra.mxu0 %v1505_v20  ;;  %v1991_v43 = vmul.f32 0.17677669, %v1880_v27  ;;  %v4483_v11 = vpop.f32.mrb[49].mxu1  ;;  %4439 = vmatprep.mubr.msk.bf16.mxu0 %vm5139_vm0, %v5138_v28  ;;  %v1399_v54 = vmul.f32 %v4852_v21, %v5661_v47 }
 0x801   :  { %v1883_v42 = vpop.f32.mrb[50].mxu1 }
 0x802   :  { %v1992_v9 = vmul.f32 0.17677669, %v1883_v42  ;;  %v4484_v12 = vpop.f32.mrb[51].mxu1  ;;  %v1999_v52 = vadd.f32 %v1991_v43, %v5469_v56  ;;  %v1405_v1 = vpack.c.bf16 %v1400_v53, %v1399_v54 }
 0x804   :  { %v2011_v57 = vsel %vm810_vm2, %v1999_v52, -inf  ;;  %v2000_v0 = vadd.f32 %v1992_v9, %v5472_v61 }
 0x805   :  { %2012 = vmax.xlane.f32.xlu0 %v2011_v57 }
 0x806   :  { %v2014_v2 = vsel %vm810_vm2, %v2000_v0, -inf }
 0x807   :  { %4440 = vmatmul.mubr.msk.bf16.vlgmr.msra.gmra.mrb[40].mxu0 %vm810_vm2, %v1405_v1  ;;  %2015 = vmax.xlane.f32.xlu1 %v2014_v2  ;;  %v1931_v6 = vpop.f32.mrb[52].mxu1  ;;  %v4669_v1 = vld [vmem:[#allocation8 + $0x10] sm:$0xff]   ;;  %v4670_v2 = vld [vmem:[#allocation8 + $0x18] sm:$0xff]  }
 0x808   :  { %v1993_v48 = vmul.f32 0.17677669, %v1931_v6  ;;  %v4489_v8 = vpop.f32.mrb[53].mxu1  ;;  %4449 = vmatprep.subr.bf16.mxu0 %v4669_v1  ;;  %v5725_v6 = vld [vmem:[#allocation8] sm:$0xff]  }
 0x809   :  { %v1934_v30 = vpop.f32.mrb[54].mxu1  ;;  %4450 = vmatpush3.bf16.msra.mxu0 %v4669_v1 }
 0x80a   :  { %v1994_v29 = vmul.f32 0.17677669, %v1934_v30  ;;  %v4490_v26 = vpop.f32.mrb[55].mxu1  ;;  %v2001_v18 = vadd.f32 %v1993_v48, %v5469_v56  ;;  %4451 = vmatprep.subr.bf16.mxu0 %v4670_v2 }
 0x80c   :  { %v2017_v47 = vsel %vm810_vm2, %v2001_v18, -inf  ;;  %v2002_v25 = vadd.f32 %v1994_v29, %v5472_v61 }
 0x80d   :  { %2018 = vmax.xlane.f32.xlu0 %v2017_v47  ;;  %4452 = vmatpush3.bf16.msra.mxu0 %v4670_v2 }
 0x80e   :  { %v2020_v20 = vsel %vm810_vm2, %v2002_v25, -inf  ;;  %4461 = vmatprep.subr.bf16.mxu0 %v5725_v6 }
 0x80f   :  { %2021 = vmax.xlane.f32.xlu1 %v2020_v20  ;;  %v1982_v27 = vpop.f32.mrb[56].mxu1 }
 0x810   :  { %v1995_v21 = vmul.f32 0.17677669, %v1982_v27  ;;  %v4495_v43 = vpop.f32.mrb[57].mxu1 }
 0x811   :  { %v1985_v11 = vpop.f32.mrb[58].mxu1 }
 0x812   :  { %v1996_v53 = vmul.f32 0.17677669, %v1985_v11  ;;  %v4496_v42 = vpop.f32.mrb[59].mxu1  ;;  %v2003_v9 = vadd.f32 %v1995_v21, %v5469_v56 }
 0x814   :  { %v2023_v12 = vsel %vm810_vm2, %v2003_v9, -inf  ;;  %v5721_v54 = vadd.f32 %v1996_v53, %v5472_v61 }
 0x815   :  { %2024 = vmax.xlane.f32.xlu0 %v2023_v12 }
 0x816   :  { %v2026_v57 = vsel %vm810_vm2, %v5721_v54, -inf }
 0x817   :  { %2027 = vmax.xlane.f32.xlu1 %v2026_v57 }
 0x88a   :  { %v2007_v56 = vpop.xlane.xlu1 %2006 }
 0x88b   :  { %v2029_v48 = vsub.f32 %v5695_v5, %v2007_v56 }
 0x88c   :  { %v2010_v61 = vpop.xlane.xlu0 %2009 }
 0x88d   :  { %v2037_v8 = vmul.f32 1.442695, %v2029_v48  ;;  %v2030_v30 = vsub.f32 %v5701_v15, %v2010_v61 }
 0x88f   :  { %4853 = vpow2.f32 %v2037_v8  ;;  %v2039_v29 = vmul.f32 1.442695, %v2030_v30 }
 0x891   :  { %4855 = vpow2.f32 %v2039_v29 }
 0x892   :  { %v2013_v26 = vpop.xlane.xlu0 %2012 }
 0x893   :  { %v2031_v47 = vsub.f32 %v1999_v52, %v2013_v26 }
 0x894   :  { %v2016_v20 = vpop.xlane.xlu1 %2015 }
 0x895   :  { %v2041_v27 = vmul.f32 1.442695, %v2031_v47  ;;  %v2032_v21 = vsub.f32 %v2000_v0, %v2016_v20 }
 0x897   :  { %4857 = vpow2.f32 %v2041_v27  ;;  %v2043_v43 = vmul.f32 1.442695, %v2032_v21 }
 0x899   :  { %v5730_v11 = vpop.eup %4853  ;;  %4859 = vpow2.f32 %v2043_v43 }
 0x89a   :  { %v2019_v53 = vpop.xlane.xlu0 %2018  ;;  %v2053_v5 = vsel %vm810_vm2, %v5730_v11, 0.0 }
 0x89b   :  { %v5734_v42 = vpop.eup %4855  ;;  %v2033_v15 = vsub.f32 %v2001_v18, %v2019_v53  ;;  %2054 = vadd.xlane.f32.xlu0 %v2053_v5 }
 0x89c   :  { %v2022_v12 = vpop.xlane.xlu1 %2021  ;;  %v2056_v52 = vsel %vm810_vm2, %v5734_v42, 0.0 }
 0x89d   :  { %v2045_v57 = vmul.f32 1.442695, %v2033_v15  ;;  %v2034_v1 = vsub.f32 %v2002_v25, %v2022_v12  ;;  %2057 = vadd.xlane.f32.xlu1 %v2056_v52 }
 0x89f   :  { %4861 = vpow2.f32 %v2045_v57  ;;  %v2047_v0 = vmul.f32 1.442695, %v2034_v1  ;;  %v4672_v57 = vld [vmem:[#allocation8 + $0x8] sm:$0xff]  }
 0x8a1   :  { %v5738_v2 = vpop.eup %4857  ;;  %4863 = vpow2.f32 %v2047_v0 }
 0x8a2   :  { %v2025_v56 = vpop.xlane.xlu0 %2024  ;;  %v2059_v48 = vsel %vm810_vm2, %v5738_v2, 0.0 }
 0x8a3   :  { %v5742_v61 = vpop.eup %4859  ;;  %v2035_v18 = vsub.f32 %v2003_v9, %v2025_v56  ;;  %2060 = vadd.xlane.f32.xlu0 %v2059_v48 }
 0x8a4   :  { %v2062_v8 = vsel %vm810_vm2, %v5742_v61, 0.0  ;;  %v2028_v27 = vpop.xlane.xlu1 %2027 }
 0x8a5   :  { %v2049_v30 = vmul.f32 1.442695, %v2035_v18  ;;  %2063 = vadd.xlane.f32.xlu1 %v2062_v8  ;;  %v2036_v21 = vsub.f32 %v5721_v54, %v2028_v27 }
 0x8a7   :  { %4865 = vpow2.f32 %v2049_v30  ;;  %v2051_v5 = vmul.f32 1.442695, %v2036_v21 }
 0x8a9   :  { %v5746_v25 = vpop.eup %4861  ;;  %4867 = vpow2.f32 %v2051_v5 }
 0x8aa   :  { %v2065_v29 = vsel %vm810_vm2, %v5746_v25, 0.0 }
 0x8ab   :  { %v5750_v26 = vpop.eup %4863  ;;  %2066 = vadd.xlane.f32.xlu0 %v2065_v29 }
 0x8ac   :  { %v2068_v47 = vsel %vm810_vm2, %v5750_v26, 0.0 }
 0x8ad   :  { %2069 = vadd.xlane.f32.xlu1 %v2068_v47 }
 0x8b1   :  { %v5754_v9 = vpop.eup %4865 }
 0x8b2   :  { %v2071_v20 = vsel %vm810_vm2, %v5754_v9, 0.0 }
 0x8b3   :  { %2072 = vadd.xlane.f32.xlu0 %v2071_v20 }
 0x8be   :  { %2144 = vrot.lane.b32.xlu1 %v5403_v60, %s5127_s1 }
 0x8c2   :  { %2191 = vrot.lane.b32.xlu1 %v5424_v24, %s5127_s1 }
 0x8c9   :  { %2097 = vrot.lane.b32.xlu0 %v5405_v62, %s5127_s1 }
 0x8cd   :  { %2392 = vrot.lane.b32.xlu0 %v5399_v51, %s5141_s15 }
 0x8d1   :  { %2443 = vrot.lane.b32.xlu0 %v5414_v10, %s5141_s15 }
 0x8d2   :  { %v1448_v43 = vpop.f32.mrb[36].mxu0 }
 0x8d3   :  { %v4429_v53 = vpop.f32.mrb[37].mxu0 }
 0x8d4   :  { %v1451_v15 = vpop.f32.mrb[38].mxu0  ;;  %v4674_v53 = vld [vmem:[#allocation8 + $0x28] sm:$0xff]  }
 0x8d5   :  { %v1599_v12 = vpack.c.bf16 %v1451_v15, %v1448_v43  ;;  %v4430_v52 = vpop.f32.mrb[39].mxu0  ;;  %2494 = vrot.lane.b32.xlu0 %v5433_v13, %s5141_s15 }
 0x8d7   :  { %4453 = vmatprep.mubr.msk.bf16.mxu0 %vm605_vm1, %v1599_v12 }
 0x8d8   :  { %4454 = vmatmul.mubr.msk.bf16.vlgmr.msra.gmra.mrb[44].mxu0 %vm605_vm1, %v1600_v23 }
 0x8d9   :  { %2492 = vrot.lane.b32.xlu0 %v5431_v31, %s5141_s15  ;;  %4462 = vmatpush3.bf16.msra.mxu0 %v5725_v6  ;;  %v5789_v31 = vpop.eup %4867 }
 0x8da   :  { %v1544_v51 = vpop.f32.mrb[40].mxu0  ;;  %4463 = vmatprep.subr.bf16.mxu0 %v4672_v57  ;;  %v2074_v16 = vsel %vm810_vm2, %v5789_v31, 0.0 }
 0x8db   :  { %v4441_v10 = vpop.f32.mrb[41].mxu0 }
 0x8dc   :  { %v1547_v54 = vpop.f32.mrb[42].mxu0 }
 0x8dd   :  { %v1601_v1 = vpack.c.bf16 %v1547_v54, %v1544_v51  ;;  %v4442_v13 = vpop.f32.mrb[43].mxu0  ;;  %4464 = vmatpush3.bf16.msra.mxu0 %v4672_v57 }
 0x8de   :  { %4497 = vmatprep.subr.bf16.mxu0 %v5138_v28 }
 0x8df   :  { %4457 = vmatprep.mubr.msk.bf16.mxu0 %vm605_vm1, %v1601_v1 }
 0x8e0   :  { %4458 = vmatmul.mubr.msk.bf16.gmra.mrb[48].mxu0 %vm605_vm1, %v1602_v41 }
 0x8e1   :  { %4465 = vmatprep.mubr.msk.bf16.mxu0 %vm605_vm1, %v1079_v50 }
 0x8e6   :  { %2075 = vadd.xlane.f32.xlu1 %v2074_v16 }
 0x8e8   :  { %4466 = vmatmul.mubr.msk.bf16.vlgmr.msra.gmra.mrb[44].mxu0 %vm605_vm1, %v1080_v3 }
 0x8e9   :  { %4469 = vmatprep.mubr.msk.bf16.mxu0 %vm605_vm1, %v1081_v58 }
 0x8f0   :  { %4470 = vmatmul.mubr.msk.bf16.gmra.mrb[48].mxu0 %vm605_vm1, %v1082_v19 }
 0x8f1   :  { %4499 = vmatprep.mubr.msk.bf16.mxu0 %vm5139_vm0, %v5138_v28 }
 0x8f7   :  { %2238 = vrot.lane.b32.xlu1 %v5420_v22, %s5127_s1 }
 0x8fb   :  { %2390 = vrot.lane.b32.xlu1 %v5397_v49, %s5141_s15 }
 0x8ff   :  { %2441 = vrot.lane.b32.xlu1 %v5412_v7, %s5141_s15 }
 0x903   :  { %2545 = vrot.lane.b32.xlu1 %v5448_v46, %s5141_s15 }
 0x907   :  { %2543 = vrot.lane.b32.xlu1 %v5446_v45, %s5141_s15 }
 0x928   :  { %v2055_v4 = vpop.xlane.xlu0 %2054 }
 0x92a   :  { %v2058_v34 = vpop.xlane.xlu1 %2057 }
 0x930   :  { %v2061_v3 = vpop.xlane.xlu0 %2060 }
 0x931   :  { %4869 = vrcp.f32 %v2061_v3 }
 0x932   :  { %v2064_v14 = vpop.xlane.xlu1 %2063 }
 0x933   :  { %4871 = vrcp.f32 %v2064_v14 }
 0x934   :  { %4873 = vrcp.f32 %v2058_v34 }
 0x935   :  { %4875 = vrcp.f32 %v2055_v4 }
 0x938   :  { %v2067_v49 = vpop.xlane.xlu0 %2066 }
 0x93a   :  { %v2070_v17 = vpop.xlane.xlu1 %2069 }
 0x93b   :  { %v4870_v19 = vpop.eup %4869  ;;  %4877 = vrcp.f32 %v2070_v17 }
 0x93c   :  { %v2087_v7 = vmul.f32 %v4870_v19, %v5738_v2  ;;  %4879 = vrcp.f32 %v2067_v49 }
 0x93d   :  { %v4872_v44 = vpop.eup %4871 }
 0x93e   :  { %v2088_v46 = vmul.f32 %v4872_v44, %v5742_v61  ;;  %v2145_v39 = vpop.permute.xlu1 %2144  ;;  %v4874_v50 = vpop.eup %4873 }
 0x93f   :  { %4504 = vmatpush3.bf16.msra.mxu1 %v2145_v39  ;;  %v4876_v59 = vpop.eup %4875  ;;  %v2086_v58 = vmul.f32 %v4874_v50, %v5734_v42 }
 0x940   :  { %v2073_v45 = vpop.xlane.xlu0 %2072  ;;  %v2094_v55 = vpack.c.bf16 %v2088_v46, %v2087_v7  ;;  %4515 = vmatprep.subr.bf16.mxu1 %v5138_v28  ;;  %v2085_v32 = vmul.f32 %v4876_v59, %v5730_v11 }
 0x941   :  { %4881 = vrcp.f32 %v2073_v45 }
 0x942   :  { %4506 = vmatmul.mubr.msk.bf16.vlgmr.msra.gmra.mrb[60].mxu1 %vm810_vm2, %v2094_v55  ;;  %v2093_v38 = vpack.c.bf16 %v2086_v58, %v2085_v32  ;;  %v2192_v6 = vpop.permute.xlu1 %2191 }
 0x943   :  { %4517 = vmatprep.mubr.msk.bf16.mxu1 %vm5139_vm0, %v5138_v28 }
 0x944   :  { %v2098_v23 = vpop.permute.xlu0 %2097 }
 0x945   :  { %4498 = vmatpush3.bf16.msra.mxu0 %v2098_v23  ;;  %v4878_v41 = vpop.eup %4877  ;;  %v4949_v23 = vld [vmem:[#allocation5] sm:$0xff] }
 0x946   :  { %4509 = vmatprep.subr.bf16.mxu0 %v5138_v28  ;;  %v4880_v0 = vpop.eup %4879  ;;  %v2090_v42 = vmul.f32 %v4878_v41, %v5750_v26  ;;  %v4950_v41 = vld [vmem:[#allocation5 + $0x8] sm:$0xff] }
 0x947   :  { %v2089_v11 = vmul.f32 %v4880_v0, %v5746_v25 }
 0x948   :  { %4500 = vmatmul.mubr.msk.bf16.vlgmr.msra.gmra.mrb[52].mxu0 %vm810_vm2, %v2093_v38  ;;  %v2393_v29 = vpop.permute.xlu0 %2392 }
 0x949   :  { %4510 = vmatpush3.bf16.msra.mxu0 %v2192_v6  ;;  %4511 = vmatprep.mubr.msk.bf16.mxu0 %vm5139_vm0, %v5138_v28  ;;  %v2095_v2 = vpack.c.bf16 %v2090_v42, %v2089_v11  ;;  %v2398_v25 = vsel %vm605_vm1, %v2393_v29, 0 }
 0x94a   :  { %4521 = vmatprep.subr.bf16.mxu0 %v4673_v40 }
 0x94b   :  { %v4882_v61 = vpop.eup %4881 }
 0x94c   :  { %v2091_v8 = vmul.f32 %v4882_v61, %v5754_v9  ;;  %v2444_v20 = vpop.permute.xlu0 %2443 }
 0x94d   :  { %v2449_v21 = vsel %vm605_vm1, %v2444_v20, 0 }
 0x950   :  { %4512 = vmatmul.mubr.msk.bf16.vlgmr.msra.gmra.mrb[56].mxu0 %vm810_vm2, %v2095_v2  ;;  %v2495_v13 = vpop.permute.xlu0 %2494 }
 0x951   :  { %4522 = vmatpush3.bf16.msra.mxu0 %v4673_v40  ;;  %v2500_v4 = vsel %vm605_vm1, %v2495_v13, 0 }
 0x952   :  { %4523 = vmatprep.subr.bf16.mxu0 %v4674_v53 }
 0x954   :  { %v2493_v40 = vpop.permute.xlu0 %2492 }
 0x955   :  { %4524 = vmatpush3.bf16.msra.mxu0 %v4674_v53 }
 0x956   :  { %4545 = vmatprep.subr.bf16.mxu0 %v5138_v28 }
 0x973   :  { %v2076_v56 = vpop.xlane.xlu1 %2075 }
 0x974   :  { %4883 = vrcp.f32 %v2076_v56 }
 0x977   :  { %v2239_v48 = vpop.permute.xlu1 %2238 }
 0x978   :  { %4516 = vmatpush3.bf16.msra.mxu1 %v2239_v48 }
 0x979   :  { %4533 = vmatprep.subr.bf16.mxu1 %v5138_v28 }
 0x97b   :  { %v2391_v47 = vpop.permute.xlu1 %2390 }
 0x97e   :  { %v4884_v18 = vpop.eup %4883 }
 0x97f   :  { %v2092_v30 = vmul.f32 %v4884_v18, %v5789_v31  ;;  %v2442_v27 = vpop.permute.xlu1 %2441 }
 0x981   :  { %v2096_v26 = vpack.c.bf16 %v2092_v30, %v2091_v8 }
 0x983   :  { %4518 = vmatmul.mubr.msk.bf16.vlgmr.msra.gmra.mrb[64].mxu1 %vm810_vm2, %v2096_v26  ;;  %v2546_v9 = vpop.permute.xlu1 %2545 }
 0x984   :  { %4534 = vmatpush3.bf16.xpose.msra.mxu1 %v2398_v25  ;;  %4535 = vmatprep.mubr.msk.bf16.mxu1 %vm5139_vm0, %v5138_v28  ;;  %v2551_v43 = vsel %vm605_vm1, %v2546_v9, 0 }
 0x985   :  { %4539 = vmatprep.subr.bf16.mxu1 %v5138_v28 }
 0x987   :  { %v2544_v5 = vpop.permute.xlu1 %2543 }
 0x98b   :  { %4536 = vmatmul.mubr.msk.bf16.vlgmr.msra.gmra.mrb[68].mxu1 %vm605_vm1, %v2391_v47 }
 0x98c   :  { %4540 = vmatpush3.bf16.xpose.msra.mxu1 %v2449_v21  ;;  %4541 = vmatprep.mubr.msk.bf16.mxu1 %vm5139_vm0, %v5138_v28 }
 0x98d   :  { %4551 = vmatprep.subr.bf16.mxu1 %v5138_v28 }
 0x993   :  { %4542 = vmatmul.mubr.msk.bf16.vlgmr.msra.gmra.mrb[72].mxu1 %vm605_vm1, %v2442_v27 }
 0x994   :  { %4552 = vmatpush3.bf16.xpose.msra.mxu1 %v2551_v43  ;;  %4553 = vmatprep.mubr.msk.bf16.mxu1 %vm5139_vm0, %v5138_v28 }
 0x995   :  { %4563 = vmatprep.subr.bf16.mxu1 %v5138_v28 }
 0x99b   :  { %4554 = vmatmul.mubr.msk.bf16.vlgmr.msra.gmra.mrb[76].mxu1 %vm605_vm1, %v2544_v5 }
 0x99c   :  { %4565 = vmatprep.mubr.msk.bf16.mxu1 %vm5139_vm0, %v5138_v28 }
 0xa15   :  { %v2184_v15 = vpop.f32.mrb[60].mxu1 }
 0xa16   :  { %v4507_v12 = vpop.f32.mrb[61].mxu1 }
 0xa17   :  { %v2187_v52 = vpop.f32.mrb[62].mxu1 }
 0xa18   :  { %v2286_v57 = vpack.c.bf16 %v2187_v52, %v2184_v15  ;;  %v4508_v51 = vpop.f32.mrb[63].mxu1 }
 0xa1b   :  { %v2137_v10 = vpop.f32.mrb[52].mxu0 }
 0xa1c   :  { %v4501_v54 = vpop.f32.mrb[53].mxu0 }
 0xa1d   :  { %v2140_v1 = vpop.f32.mrb[54].mxu0 }
 0xa1e   :  { %v2285_v31 = vpack.c.bf16 %v2140_v1, %v2137_v10  ;;  %v4502_v16 = vpop.f32.mrb[55].mxu0 }
 0xa20   :  { %4525 = vmatprep.mubr.msk.bf16.mxu0 %vm605_vm1, %v2285_v31 }
 0xa21   :  { %4526 = vmatmul.mubr.msk.bf16.vlgmr.msra.gmra.mrb[44].mxu0 %vm605_vm1, %v2286_v57 }
 0xa22   :  { %4546 = vmatpush3.bf16.xpose.msra.mxu0 %v2500_v4 }
 0xa23   :  { %v2231_v34 = vpop.f32.mrb[56].mxu0  ;;  %4557 = vmatprep.subr.bf16.mxu0 %v5138_v28 }
 0xa24   :  { %v4513_v3 = vpop.f32.mrb[57].mxu0 }
 0xa25   :  { %v2234_v14 = vpop.f32.mrb[58].mxu0 }
 0xa26   :  { %v2287_v17 = vpack.c.bf16 %v2234_v14, %v2231_v34  ;;  %v4514_v19 = vpop.f32.mrb[59].mxu0 }
 0xa28   :  { %4529 = vmatprep.mubr.msk.bf16.mxu0 %vm605_vm1, %v2287_v17 }
 0xa56   :  { %v2278_v49 = vpop.f32.mrb[64].mxu1 }
 0xa57   :  { %v4519_v44 = vpop.f32.mrb[65].mxu1 }
 0xa58   :  { %v2281_v7 = vpop.f32.mrb[66].mxu1 }
 0xa59   :  { %v2288_v46 = vpack.c.bf16 %v2281_v7, %v2278_v49  ;;  %v4520_v39 = vpop.f32.mrb[67].mxu1 }
 0xa5b   :  { %4530 = vmatmul.mubr.msk.bf16.gmra.mrb[48].mxu0 %vm605_vm1, %v2288_v46 }
 0xa5c   :  { %4547 = vmatprep.mubr.msk.bf16.mxu0 %vm5139_vm0, %v5138_v28 }
 0xa5e   :  { %v2434_v50 = vpop.f32.mrb[68].mxu1 }
 0xa5f   :  { %v2594_v45 = vmul.f32 0.17677669, %v2434_v50  ;;  %v4537_v55 = vpop.f32.mrb[69].mxu1 }
 0xa60   :  { %v2437_v59 = vpop.f32.mrb[70].mxu1 }
 0xa61   :  { %v2595_v58 = vmul.f32 0.17677669, %v2437_v59  ;;  %v4538_v32 = vpop.f32.mrb[71].mxu1  ;;  %v2602_v38 = vadd.f32 %v4949_v23, %v2594_v45 }
 0xa63   :  { %v2603_v6 = vadd.f32 %v4950_v41, %v2595_v58  ;;  %4548 = vmatmul.mubr.msk.bf16.vlgmr.msra.gmra.mrb[60].mxu0 %vm605_vm1, %v2493_v40  ;;  %v2610_v0 = vsel %vm810_vm2, %v2602_v38, -inf }
 0xa64   :  { %2611 = vmax.xlane.f32.xlu0 %v2610_v0  ;;  %4559 = vmatprep.mubr.msk.bf16.mxu0 %vm5139_vm0, %v5138_v28 }
 0xa65   :  { %v2613_v42 = vsel %vm810_vm2, %v2603_v6, -inf }
 0xa66   :  { %2614 = vmax.xlane.f32.xlu1 %v2613_v42  ;;  %v2485_v11 = vpop.f32.mrb[72].mxu1 }
 0xa67   :  { %v2596_v2 = vmul.f32 0.17677669, %v2485_v11  ;;  %v4543_v56 = vpop.f32.mrb[73].mxu1 }
 0xa68   :  { %v2488_v48 = vpop.f32.mrb[74].mxu1 }
 0xa69   :  { %v2597_v61 = vmul.f32 0.17677669, %v2488_v48  ;;  %v4544_v18 = vpop.f32.mrb[75].mxu1  ;;  %v2604_v8 = vadd.f32 %v4949_v23, %v2596_v2 }
 0xa6b   :  { %v2605_v30 = vadd.f32 %v4950_v41, %v2597_v61  ;;  %v2616_v29 = vsel %vm810_vm2, %v2604_v8, -inf }
 0xa6c   :  { %2617 = vmax.xlane.f32.xlu0 %v2616_v29 }
 0xa6d   :  { %v2619_v47 = vsel %vm810_vm2, %v2605_v30, -inf }
 0xa6e   :  { %v2587_v26 = vpop.f32.mrb[76].mxu1 }
 0xa6f   :  { %v4555_v25 = vpop.f32.mrb[77].mxu1  ;;  %v2600_v1 = vmul.f32 0.17677669, %v2587_v26 }
 0xa70   :  { %2620 = vmax.xlane.f32.xlu0 %v2619_v47  ;;  %v2590_v20 = vpop.f32.mrb[78].mxu1 }
 0xa71   :  { %v4556_v27 = vpop.f32.mrb[79].mxu1  ;;  %v2601_v34 = vmul.f32 0.17677669, %v2590_v20  ;;  %v2608_v19 = vadd.f32 %v4949_v23, %v2600_v1 }
 0xa73   :  { %v2609_v7 = vadd.f32 %v4950_v41, %v2601_v34  ;;  %v2628_v39 = vsel %vm810_vm2, %v2608_v19, -inf }
 0xa75   :  { %v2631_v45 = vsel %vm810_vm2, %v2609_v7, -inf }
 0xaf1   :  { %v2612_v21 = vpop.xlane.xlu0 %2611 }
 0xaf2   :  { %v2634_v53 = vsub.f32 %v2602_v38, %v2612_v21 }
 0xaf3   :  { %v2615_v43 = vpop.xlane.xlu1 %2614 }
 0xaf4   :  { %v2635_v5 = vsub.f32 %v2603_v6, %v2615_v43  ;;  %v2642_v12 = vmul.f32 1.442695, %v2634_v53 }
 0xaf6   :  { %v2644_v57 = vmul.f32 1.442695, %v2635_v5  ;;  %4885 = vpow2.f32 %v2642_v12 }
 0xaf8   :  { %4887 = vpow2.f32 %v2644_v57 }
 0xaf9   :  { %v2618_v9 = vpop.xlane.xlu0 %2617 }
 0xafa   :  { %v2636_v52 = vsub.f32 %v2604_v8, %v2618_v9 }
 0xafc   :  { %v2646_v10 = vmul.f32 1.442695, %v2636_v52 }
 0xafd   :  { %v2621_v15 = vpop.xlane.xlu0 %2620 }
 0xafe   :  { %v2637_v51 = vsub.f32 %v2605_v30, %v2621_v15  ;;  %4889 = vpow2.f32 %v2646_v10 }
 0xb00   :  { %v2648_v16 = vmul.f32 1.442695, %v2637_v51  ;;  %v5872_v50 = vpop.eup %4885 }
 0xb01   :  { %v2658_v59 = vsel %vm810_vm2, %v5872_v50, 0.0 }
 0xb02   :  { %4891 = vpow2.f32 %v2648_v16  ;;  %v4888_v55 = vpop.eup %4887 }
 0xb03   :  { %v2661_v32 = vsel %vm810_vm2, %v4888_v55, 0.0 }
 0xb08   :  { %v4890_v58 = vpop.eup %4889 }
 0xb09   :  { %v2664_v38 = vsel %vm810_vm2, %v4890_v58, 0.0 }
 0xb36   :  { %v2536_v54 = vpop.f32.mrb[60].mxu0 }
 0xb37   :  { %v2598_v13 = vmul.f32 0.17677669, %v2536_v54  ;;  %v4549_v31 = vpop.f32.mrb[61].mxu0 }
 0xb38   :  { %v2539_v4 = vpop.f32.mrb[62].mxu0 }
 0xb39   :  { %v2606_v3 = vadd.f32 %v4949_v23, %v2598_v13  ;;  %v2599_v14 = vmul.f32 0.17677669, %v2539_v4  ;;  %v4550_v17 = vpop.f32.mrb[63].mxu0  ;;  %v4892_v23 = vpop.eup %4891 }
 0xb3a   :  { %v2667_v40 = vsel %vm810_vm2, %v4892_v23, 0.0 }
 0xb3b   :  { %v2607_v49 = vadd.f32 %v4950_v41, %v2599_v14  ;;  %v2622_v44 = vsel %vm810_vm2, %v2606_v3, -inf }
 0xb3c   :  { %2623 = vmax.xlane.f32.xlu0 %v2622_v44 }
 0xb3d   :  { %v2625_v46 = vsel %vm810_vm2, %v2607_v49, -inf }
 0xb3e   :  { %2626 = vmax.xlane.f32.xlu1 %v2625_v46 }
 0xb40   :  { %2629 = vmax.xlane.f32.xlu0 %v2628_v39 }
 0xb42   :  { %2632 = vmax.xlane.f32.xlu1 %v2631_v45 }
 0xb44   :  { %2659 = vadd.xlane.f32.xlu0 %v2658_v59  ;;  %v4676_v59 = vld [vmem:[#allocation8 + $0x38] sm:$0xff]  }
 0xb46   :  { %2662 = vadd.xlane.f32.xlu1 %v2661_v32 }
 0xb48   :  { %2665 = vadd.xlane.f32.xlu0 %v2664_v38 }
 0xb4a   :  { %2668 = vadd.xlane.f32.xlu1 %v2667_v40 }
 0xbc9   :  { %v2624_v41 = vpop.xlane.xlu0 %2623 }
 0xbca   :  { %v2638_v6 = vsub.f32 %v2606_v3, %v2624_v41 }
 0xbcb   :  { %v2627_v0 = vpop.xlane.xlu1 %2626 }
 0xbcc   :  { %v2650_v2 = vmul.f32 1.442695, %v2638_v6  ;;  %v2639_v20 = vsub.f32 %v2607_v49, %v2627_v0 }
 0xbcd   :  { %v2630_v42 = vpop.xlane.xlu0 %2629 }
 0xbce   :  { %v2640_v11 = vsub.f32 %v2608_v19, %v2630_v42  ;;  %v2652_v27 = vmul.f32 1.442695, %v2639_v20  ;;  %v4083_v20 = vld [vmem:[%s6085_s5] ss:$0 sm:$0xff] }
 0xbcf   :  { %v2633_v56 = vpop.xlane.xlu1 %2632 }
 0xbd0   :  { %v2654_v48 = vmul.f32 1.442695, %v2640_v11  ;;  %v2641_v61 = vsub.f32 %v2609_v7, %v2633_v56 }
 0xbd1   :  { %v2660_v53 = vpop.xlane.xlu0 %2659 }
 0xbd2   :  { %4893 = vpow2.f32 %v2654_v48  ;;  %v2656_v18 = vmul.f32 1.442695, %v2641_v61 }
 0xbd3   :  { %4895 = vpow2.f32 %v2650_v2  ;;  %v2663_v43 = vpop.xlane.xlu1 %2662 }
 0xbd4   :  { %4897 = vpow2.f32 %v2656_v18 }
 0xbd5   :  { %4899 = vpow2.f32 %v2652_v27 }
 0xbd7   :  { %v2669_v5 = vpop.xlane.xlu1 %2668 }
 0xbd8   :  { %4901 = vrcp.f32 %v2669_v5  ;;  %v4952_v5 = vld [vmem:[#allocation2 + $0x10] sm:$0xff] }
 0xbd9   :  { %4903 = vrcp.f32 %v2663_v43 }
 0xbdc   :  { %v4894_v8 = vpop.eup %4893 }
 0xbdd   :  { %v5880_v30 = vpop.eup %4895  ;;  %v2676_v29 = vsel %vm810_vm2, %v4894_v8, 0.0 }
 0xbde   :  { %v4898_v26 = vpop.eup %4897  ;;  %2677 = vadd.xlane.f32.xlu0 %v2676_v29  ;;  %v2670_v47 = vsel %vm810_vm2, %v5880_v30, 0.0 }
 0xbdf   :  { %v2679_v25 = vsel %vm810_vm2, %v4898_v26, 0.0  ;;  %v4900_v21 = vpop.eup %4899 }
 0xbe0   :  { %2680 = vadd.xlane.f32.xlu1 %v2679_v25  ;;  %v2673_v9 = vsel %vm810_vm2, %v4900_v21, 0.0 }
 0xbe2   :  { %2671 = vadd.xlane.f32.xlu0 %v2670_v47 }
 0xbf1   :  { %2749 = vrot.lane.b32.xlu1 %v5403_v60, %s5141_s15  ;;  %v2666_v60 = vpop.xlane.xlu0 %2665 }
 0xbf2   :  { %4905 = vrcp.f32 %v2666_v60 }
 0xbf3   :  { %4907 = vrcp.f32 %v2660_v53 }
 0xbf5   :  { %2796 = vrot.lane.b32.xlu1 %v5424_v24, %s5141_s15 }
 0xbf8   :  { %2702 = vrot.lane.b32.xlu0 %v5405_v62, %s5141_s15  ;;  %v4902_v62 = vpop.eup %4901 }
 0xbf9   :  { %v4904_v15 = vpop.eup %4903  ;;  %v2693_v57 = vmul.f32 %v4902_v62, %v4892_v23  ;;  %v4953_v62 = vld [vmem:[#allocation2 + $0x8] sm:$0xff] }
 0xbfa   :  { %v2691_v54 = vmul.f32 %v4904_v15, %v4888_v55  ;;  %v4675_v55 = vld [vmem:[#allocation8 + $0x30] sm:$0xff]  }
 0xbfc   :  { %v4906_v52 = vpop.eup %4905 }
 0xbfd   :  { %v4908_v10 = vpop.eup %4907  ;;  %v2692_v1 = vmul.f32 %v4906_v52, %v4890_v58 }
 0xbff   :  { %v2699_v16 = vpack.c.bf16 %v2693_v57, %v2692_v1  ;;  %v4954_v57 = vld [vmem:[#allocation2 + $0x18] sm:$0xff] }
 0xc19   :  { %2674 = vadd.xlane.f32.xlu1 %v2673_v9 }
 0xc2a   :  { %2843 = vrot.lane.b32.xlu1 %v5420_v22, %s5141_s15  ;;  %v2690_v22 = vmul.f32 %v4908_v10, %v5872_v50 }
 0xc2c   :  { %v2698_v4 = vpack.c.bf16 %v2691_v54, %v2690_v22 }
 0xc6b   :  { %v2678_v24 = vpop.xlane.xlu0 %2677 }
 0xc6d   :  { %v2681_v12 = vpop.xlane.xlu1 %2680 }
 0xc6e   :  { %4909 = vrcp.f32 %v2681_v12 }
 0xc6f   :  { %v2672_v51 = vpop.xlane.xlu0 %2671  ;;  %4911 = vrcp.f32 %v2678_v24 }
 0xc70   :  { %4913 = vrcp.f32 %v2672_v51 }
 0xc71   :  { %v2750_v13 = vpop.permute.xlu1 %2749 }
 0xc72   :  { %4564 = vmatpush3.bf16.msra.mxu1 %v2750_v13  ;;  %v4955_v13 = vld [vmem:[#allocation2 + $0x20] sm:$0xff] }
 0xc73   :  { %v2703_v31 = vpop.permute.xlu0 %2702  ;;  %4575 = vmatprep.subr.bf16.mxu1 %v5138_v28 }
 0xc74   :  { %4558 = vmatpush3.bf16.msra.mxu0 %v2703_v31 }
 0xc75   :  { %4566 = vmatmul.mubr.msk.bf16.vlgmr.msra.gmra.mrb[80].mxu1 %vm810_vm2, %v2699_v16  ;;  %4569 = vmatprep.subr.bf16.mxu0 %v5138_v28  ;;  %v2797_v34 = vpop.permute.xlu1 %2796 }
 0xc76   :  { %4577 = vmatprep.mubr.msk.bf16.mxu1 %vm5139_vm0, %v5138_v28 }
 0xc77   :  { %4560 = vmatmul.mubr.msk.bf16.vlgmr.msra.gmra.mrb[64].mxu0 %vm810_vm2, %v2698_v4  ;;  %v4956_v4 = vld [vmem:[#allocation2 + $0x30] sm:$0xff] }
 0xc78   :  { %4570 = vmatpush3.bf16.msra.mxu0 %v2797_v34  ;;  %4571 = vmatprep.mubr.msk.bf16.mxu0 %vm5139_vm0, %v5138_v28  ;;  %v4910_v3 = vpop.eup %4909 }
 0xc79   :  { %v4912_v17 = vpop.eup %4911  ;;  %v2697_v19 = vmul.f32 %v4910_v3, %v4898_v26  ;;  %4581 = vmatprep.subr.bf16.mxu0 %v4675_v55 }
 0xc7a   :  { %v2696_v49 = vmul.f32 %v4912_v17, %v4894_v8  ;;  %v4914_v46 = vpop.eup %4913 }
 0xc7b   :  { %v2694_v28 = vmul.f32 %v4914_v46, %v5880_v30 }
 0xc7c   :  { %v2701_v7 = vpack.c.bf16 %v2697_v19, %v2696_v49  ;;  %v4958_v19 = vld [vmem:[#allocation2 + $0x38] sm:$0xff] }
 0xca6   :  { %v2675_v14 = vpop.xlane.xlu1 %2674 }
 0xca7   :  { %4915 = vrcp.f32 %v2675_v14  ;;  %v4957_v14 = vld [vmem:[#allocation2 + $0x28] sm:$0xff] }
 0xcaa   :  { %v2844_v44 = vpop.permute.xlu1 %2843 }
 0xcab   :  { %4576 = vmatpush3.bf16.msra.mxu1 %v2844_v44 }
 0xcae   :  { %4578 = vmatmul.mubr.msk.bf16.vlgmr.msra.gmra.mrb[84].mxu1 %vm810_vm2, %v2701_v7 }
 0xcaf   :  { %3412 = vmatprep.mubr.bf16.mxu1 %v5137_v63 }
 0xcb1   :  { %v4916_v39 = vpop.eup %4915 }
 0xcb2   :  { %v2695_v50 = vmul.f32 %v4916_v39, %v4900_v21  ;;  %v4951_v21 = vld [vmem:[#allocation2] sm:$0xff] }
 0xcb4   :  { %v2700_v45 = vpack.c.bf16 %v2695_v50, %v2694_v28 }
 0xcb6   :  { %4572 = vmatmul.mubr.msk.bf16.vlgmr.msra.gmra.mrb[68].mxu0 %vm810_vm2, %v2700_v45 }
 0xcb7   :  { %4582 = vmatpush3.bf16.msra.mxu0 %v4675_v55 }
 0xcb8   :  { %4583 = vmatprep.subr.bf16.mxu0 %v4676_v59 }
 0xcbb   :  { %4584 = vmatpush3.bf16.msra.mxu0 %v4676_v59 }
 0xd48   :  { %v2789_v58 = vpop.f32.mrb[80].mxu1 }
 0xd49   :  { %v4567_v32 = vpop.f32.mrb[81].mxu1 }
 0xd4a   :  { %v2742_v23 = vpop.f32.mrb[64].mxu0  ;;  %v2792_v38 = vpop.f32.mrb[82].mxu1 }
 0xd4b   :  { %v2891_v40 = vpack.c.bf16 %v2792_v38, %v2789_v58  ;;  %v4561_v41 = vpop.f32.mrb[65].mxu0  ;;  %v4568_v6 = vpop.f32.mrb[83].mxu1 }
 0xd4c   :  { %v2745_v0 = vpop.f32.mrb[66].mxu0 }
 0xd4d   :  { %v2890_v42 = vpack.c.bf16 %v2745_v0, %v2742_v23  ;;  %v4562_v11 = vpop.f32.mrb[67].mxu0 }
 0xd4f   :  { %4585 = vmatprep.mubr.msk.bf16.mxu0 %vm605_vm1, %v2890_v42 }
 0xd50   :  { %4586 = vmatmul.mubr.msk.bf16.vlgmr.msra.gmra.mrb[44].mxu0 %vm605_vm1, %v2891_v40 }
 0xd81   :  { %v2883_v2 = vpop.f32.mrb[84].mxu1 }
 0xd82   :  { %v4579_v56 = vpop.f32.mrb[85].mxu1 }
 0xd83   :  { %v2886_v48 = vpop.f32.mrb[86].mxu1  ;;  %v4682_v56 = vld [vmem:[#allocation10 + $0xc] ss:$16 sps:$4 sm:$0xff]  }
 0xd84   :  { %v2893_v61 = vpack.c.bf16 %v2886_v48, %v2883_v2  ;;  %v4580_v18 = vpop.f32.mrb[87].mxu1  ;;  %v4679_v2 = vld [vmem:[#allocation10 + $0x4] ss:$16 sps:$4 sm:$0xff]   ;;  %v4677_v48 = vld [vmem:[#allocation10] ss:$16 sps:$4 sm:$0xff]   ;;  %3453 = vmatprep.subr.bf16.mxu0 %v4682_v56 }
 0xd85   :  { %3380 = vmatprep.subr.bf16.mxu1 %v4679_v2  ;;  %v4685_v18 = vld [vmem:[#allocation10 + $0x24] ss:$16 sps:$4 sm:$0xff]  }
 0xd86   :  { %3381 = vmatpush1.bf16.msra.mxu1 %v4677_v48  ;;  %v4725_v56 = vld [vmem:[#allocation11 + $0x40] sm:$0xff]  }
 0xd87   :  { %3382 = vmatprep.subr.bf16.mxu1 %v4685_v18  ;;  %v4726_v48 = vld [vmem:[#allocation11 + $0xc0] sm:$0xff]  }
 0xd89   :  { %v2836_v8 = vpop.f32.mrb[68].mxu0 }
 0xd8a   :  { %v4573_v30 = vpop.f32.mrb[69].mxu0 }
 0xd8b   :  { %v2839_v29 = vpop.f32.mrb[70].mxu0  ;;  %v4683_v30 = vld [vmem:[#allocation10 + $0x20] ss:$16 sps:$4 sm:$0xff]  }
 0xd8c   :  { %v2892_v26 = vpack.c.bf16 %v2839_v29, %v2836_v8  ;;  %v4574_v25 = vpop.f32.mrb[71].mxu0  ;;  %v4688_v8 = vld [vmem:[#allocation10 + $0x2c] ss:$16 sps:$4 sm:$0xff]   ;;  %v4686_v29 = vld [vmem:[#allocation10 + $0x28] ss:$16 sps:$4 sm:$0xff]   ;;  %3383 = vmatpush1.bf16.msra.mxu1 %v4683_v30 }
 0xd8d   :  { %v4694_v25 = vld [vmem:[#allocation10 + $0x4c] ss:$16 sps:$4 sm:$0xff]  }
 0xd8e   :  { %4589 = vmatprep.mubr.msk.bf16.mxu0 %vm605_vm1, %v2892_v26  ;;  %v4691_v26 = vld [vmem:[#allocation10 + $0x44] ss:$16 sps:$4 sm:$0xff]  }
 0xd8f   :  { %4590 = vmatmul.mubr.msk.bf16.gmra.mrb[48].mxu0 %vm605_vm1, %v2893_v61  ;;  %v4680_v61 = vld [vmem:[#allocation10 + $0x8] ss:$16 sps:$4 sm:$0xff]   ;;  %3384 = vmatprep.subr.bf16.mxu1 %v4691_v26 }
 0xd90   :  { %3485 = vmatprep.mubr.bf16.mxu0 %v5137_v63  ;;  %3454 = vmatpush1.bf16.msra.mxu0 %v4680_v61 }
 0xd91   :  { %3455 = vmatprep.subr.bf16.mxu0 %v4688_v8 }
 0xd94   :  { %3456 = vmatpush1.bf16.msra.mxu0 %v4686_v29 }
 0xd95   :  { %3457 = vmatprep.subr.bf16.mxu0 %v4694_v25 }
 0xe23   :  { %v4587_v47 = vpop.f32.mrb[44].mxu0 }
 0xe24   :  { %v2956_v27 = vpop.f32.mrb[45].mxu0  ;;  %v2997_v60 = vadd.f32 %v4952_v5, %v4587_v47  ;;  %v4689_v47 = vld [vmem:[#allocation10 + $0x40] ss:$16 sps:$4 sm:$0xff]   ;;  %v4706_v5 = vld [vmem:[#allocation10 + $0x8c] ss:$16 sps:$4 sm:$0xff]  }
 0xe25   :  { %v2995_v9 = vadd.f32 %v4951_v21, %v2956_v27  ;;  %v4588_v43 = vpop.f32.mrb[46].mxu0  ;;  %3385 = vmatpush1.bf16.msra.mxu1 %v4689_v47  ;;  %v4697_v27 = vld [vmem:[#allocation10 + $0x64] ss:$16 sps:$4 sm:$0xff]   ;;  %v4700_v21 = vld [vmem:[#allocation10 + $0x6c] ss:$16 sps:$4 sm:$0xff]  }
 0xe26   :  { %v2959_v53 = vpop.f32.mrb[47].mxu0  ;;  %v5921_v52 = vadd.f32 %v4083_v20, %v2997_v60  ;;  %v2998_v51 = vadd.f32 %v4954_v57, %v4588_v43  ;;  %v4698_v43 = vld [vmem:[#allocation10 + $0x68] ss:$16 sps:$4 sm:$0xff]   ;;  %3386 = vmatprep.subr.bf16.mxu1 %v4697_v27  ;;  %v4701_v60 = vld [vmem:[#allocation10 + $0x80] ss:$16 sps:$4 sm:$0xff]  }
 0xe27   :  { %v5916_v24 = vadd.f32 %v4083_v20, %v2995_v9  ;;  %v2996_v15 = vadd.f32 %v4953_v62, %v2959_v53  ;;  %v4695_v9 = vld [vmem:[#allocation10 + $0x60] ss:$16 sps:$4 sm:$0xff]   ;;  %v4703_v53 = vld [vmem:[#allocation10 + $0x84] ss:$16 sps:$4 sm:$0xff]   ;;  %v4704_v62 = vld [vmem:[#allocation10 + $0x88] ss:$16 sps:$4 sm:$0xff]  }
 0xe28   :  { %v5925_v10 = vadd.f32 %v4083_v20, %v2998_v51  ;;  %v4709_v57 = vld [vmem:[#allocation10 + $0xa4] ss:$16 sps:$4 sm:$0xff]   ;;  %v4710_v51 = vld [vmem:[#allocation10 + $0xa8] ss:$16 sps:$4 sm:$0xff]  }
 0xe29   :  { %v5918_v12 = vadd.f32 %v4083_v20, %v2996_v15  ;;  %3018 = vadd.xlane.f32.xlu0 %v5916_v24  ;;  %3387 = vmatpush1.bf16.msra.mxu1 %v4695_v9  ;;  %v4707_v15 = vld [vmem:[#allocation10 + $0xa0] ss:$16 sps:$4 sm:$0xff]  }
 0xe2a   :  { %3388 = vmatprep.subr.bf16.mxu1 %v4703_v53 }
 0xe2b   :  { %3020 = vadd.xlane.f32.xlu1 %v5918_v12 }
 0xe2d   :  { %3022 = vadd.xlane.f32.xlu0 %v5921_v52  ;;  %3389 = vmatpush1.bf16.msra.mxu1 %v4701_v60 }
 0xe2e   :  { %3390 = vmatprep.subr.bf16.mxu1 %v4709_v57 }
 0xe31   :  { %3024 = vadd.xlane.f32.xlu0 %v5925_v10  ;;  %3391 = vmatpush1.bf16.msra.mxu1 %v4707_v15 }
 0xe62   :  { %v4591_v54 = vpop.f32.mrb[48].mxu0 }
 0xe63   :  { %v2972_v1 = vpop.f32.mrb[49].mxu0  ;;  %v3001_v34 = vadd.f32 %v4956_v4, %v4591_v54  ;;  %v4712_v54 = vld [vmem:[#allocation10 + $0xac] ss:$16 sps:$4 sm:$0xff]  }
 0xe64   :  { %v2999_v22 = vadd.f32 %v4955_v13, %v2972_v1  ;;  %v4592_v31 = vpop.f32.mrb[50].mxu0  ;;  %v4715_v1 = vld [vmem:[#allocation10 + $0xc4] ss:$16 sps:$4 sm:$0xff]   ;;  %v4718_v13 = vld [vmem:[#allocation10 + $0xcc] ss:$16 sps:$4 sm:$0xff]  }
 0xe65   :  { %v2975_v16 = vpop.f32.mrb[51].mxu0  ;;  %v3002_v49 = vadd.f32 %v4958_v19, %v4592_v31  ;;  %v5933_v7 = vadd.f32 %v4083_v20, %v3001_v34  ;;  %3392 = vmatprep.subr.bf16.mxu1 %v4715_v1  ;;  %v4716_v31 = vld [vmem:[#allocation10 + $0xc8] ss:$16 sps:$4 sm:$0xff]   ;;  %v4724_v4 = vld [vmem:[#allocation10 + $0xec] ss:$16 sps:$4 sm:$0xff]  }
 0xe66   :  { %v5928_v3 = vadd.f32 %v4083_v20, %v2999_v22  ;;  %v3000_v17 = vadd.f32 %v4957_v14, %v2975_v16  ;;  %v4713_v22 = vld [vmem:[#allocation10 + $0xc0] ss:$16 sps:$4 sm:$0xff]   ;;  %v4721_v16 = vld [vmem:[#allocation10 + $0xe4] ss:$16 sps:$4 sm:$0xff]   ;;  %v4722_v14 = vld [vmem:[#allocation10 + $0xe8] ss:$16 sps:$4 sm:$0xff]  }
 0xe67   :  { %v5936_v46 = vadd.f32 %v4083_v20, %v3002_v49  ;;  %3393 = vmatpush1.bf16.msra.mxu1 %v4713_v22  ;;  %v4719_v34 = vld [vmem:[#allocation10 + $0xe0] ss:$16 sps:$4 sm:$0xff]  }
 0xe68   :  { %v5930_v44 = vadd.f32 %v4083_v20, %v3000_v17  ;;  %3026 = vadd.xlane.f32.xlu0 %v5928_v3  ;;  %v4692_v20 = vld [vmem:[#allocation10 + $0x48] ss:$16 sps:$4 sm:$0xff]   ;;  %3394 = vmatprep.subr.bf16.mxu1 %v4721_v16 }
 0xe69   :  { %3458 = vmatpush1.bf16.msra.mxu0 %v4692_v20 }
 0xe6a   :  { %3028 = vadd.xlane.f32.xlu1 %v5930_v44  ;;  %3459 = vmatprep.subr.bf16.mxu0 %v4700_v21 }
 0xe6b   :  { %3395 = vmatpush1.bf16.msra.mxu1 %v4719_v34 }
 0xe6c   :  { %3030 = vadd.xlane.f32.xlu0 %v5933_v7  ;;  %4249 = vmatprep.subr.bf16.mxu1 %v4725_v56 }
 0xe6d   :  { %3460 = vmatpush1.bf16.msra.mxu0 %v4698_v43 }
 0xe6e   :  { %3032 = vadd.xlane.f32.xlu1 %v5936_v46  ;;  %3461 = vmatprep.subr.bf16.mxu0 %v4706_v5 }
 0xe71   :  { %3462 = vmatpush1.bf16.msra.mxu0 %v4704_v62 }
 0xe72   :  { %3463 = vmatprep.subr.bf16.mxu0 %v4712_v54 }
 0xe75   :  { %3464 = vmatpush1.bf16.msra.mxu0 %v4710_v51 }
 0xe76   :  { %3465 = vmatprep.subr.bf16.mxu0 %v4718_v13 }
 0xe79   :  { %3466 = vmatpush1.bf16.msra.mxu0 %v4716_v31 }
 0xe7a   :  { %3467 = vmatprep.subr.bf16.mxu0 %v4724_v4 }
 0xe7d   :  { %3468 = vmatpush1.bf16.msra.mxu0 %v4722_v14 }
 0xe7e   :  { %4289 = vmatprep.subr.bf16.mxu0 %v4726_v48 }
 0xeb6   :  { %v3019_v39 = vpop.xlane.xlu0 %3018 }
 0xeb7   :  { %v3034_v28 = vmul.f32 0.0078125, %v3019_v39 }
 0xeb8   :  { %v3021_v50 = vpop.xlane.xlu1 %3020 }
 0xeb9   :  { %v5941_v45 = vsub.f32 %v5916_v24, %v3034_v28  ;;  %v3035_v55 = vmul.f32 0.0078125, %v3021_v50 }
 0xeba   :  { %v3023_v59 = vpop.xlane.xlu0 %3022 }
 0xebb   :  { %v5944_v58 = vsub.f32 %v5918_v12, %v3035_v55  ;;  %v3036_v32 = vmul.f32 0.0078125, %v3023_v59  ;;  %v3050_v23 = vmul.f32 %v5941_v45, %v5941_v45 }
 0xebd   :  { %v5949_v38 = vsub.f32 %v5921_v52, %v3036_v32  ;;  %3058 = vadd.xlane.f32.xlu0 %v3050_v23  ;;  %v3051_v40 = vmul.f32 %v5944_v58, %v5944_v58 }
 0xebe   :  { %v3025_v41 = vpop.xlane.xlu0 %3024 }
 0xebf   :  { %v3037_v6 = vmul.f32 0.0078125, %v3025_v41  ;;  %3060 = vadd.xlane.f32.xlu1 %v3051_v40  ;;  %v3052_v0 = vmul.f32 %v5949_v38, %v5949_v38 }
 0xec1   :  { %v5956_v42 = vsub.f32 %v5925_v10, %v3037_v6  ;;  %3062 = vadd.xlane.f32.xlu0 %v3052_v0 }
 0xec3   :  { %v3053_v11 = vmul.f32 %v5956_v42, %v5956_v42 }
 0xec5   :  { %3064 = vadd.xlane.f32.xlu1 %v3053_v11 }
 0xef5   :  { %v3027_v17 = vpop.xlane.xlu0 %3026 }
 0xef6   :  { %v3038_v19 = vmul.f32 0.0078125, %v3027_v17 }
 0xef7   :  { %v3029_v49 = vpop.xlane.xlu1 %3028 }
 0xef8   :  { %v5961_v39 = vsub.f32 %v5928_v3, %v3038_v19  ;;  %v3039_v28 = vmul.f32 0.0078125, %v3029_v49 }
 0xef9   :  { %v3031_v50 = vpop.xlane.xlu0 %3030 }
 0xefa   :  { %v5964_v55 = vsub.f32 %v5930_v44, %v3039_v28  ;;  %v3040_v59 = vmul.f32 0.0078125, %v3031_v50  ;;  %v3054_v32 = vmul.f32 %v5961_v39, %v5961_v39 }
 0xefb   :  { %v3033_v23 = vpop.xlane.xlu1 %3032 }
 0xefc   :  { %v5969_v40 = vsub.f32 %v5933_v7, %v3040_v59  ;;  %v3041_v41 = vmul.f32 0.0078125, %v3033_v23  ;;  %3066 = vadd.xlane.f32.xlu0 %v3054_v32  ;;  %v3055_v6 = vmul.f32 %v5964_v55, %v5964_v55 }
 0xefe   :  { %v5974_v0 = vsub.f32 %v5936_v46, %v3041_v41  ;;  %3068 = vadd.xlane.f32.xlu1 %v3055_v6  ;;  %v3056_v11 = vmul.f32 %v5969_v40, %v5969_v40  ;;  %v4727_v41 = vld [vmem:[#allocation11] sm:$0xff]  }
 0xeff   :  { %v4728_v6 = vld [vmem:[#allocation11 + $0x80] sm:$0xff]  }
 0xf00   :  { %3070 = vadd.xlane.f32.xlu0 %v3056_v11  ;;  %v3057_v2 = vmul.f32 %v5974_v0, %v5974_v0  ;;  %v4729_v11 = vld [vmem:[#allocation11 + $0x48] sm:$0xff]  }
 0xf02   :  { %3072 = vadd.xlane.f32.xlu1 %v3057_v2  ;;  %v4730_v2 = vld [vmem:[#allocation11 + $0xc8] sm:$0xff]  }
 0xf4a   :  { %v3059_v61 = vpop.xlane.xlu0 %3058 }
 0xf4b   :  { %v3074_v18 = vmul.f32 0.007874016, %v3059_v61 }
 0xf4c   :  { %v3061_v8 = vpop.xlane.xlu1 %3060 }
 0xf4d   :  { %4917 = vrsqrt.f32 %v3074_v18  ;;  %v3075_v30 = vmul.f32 0.007874016, %v3061_v8  ;;  %vm3084_vm3 = vcmp.eq.f32.partialorder %v3074_v18, inf  ;;  %v3087_v21 = vand.u32 2147483648, %v3074_v18  ;;  %v4734_v8 = vld [vmem:[#allocation11 + $0xd0] sm:$0xff]  }
 0xf4e   :  { %v3063_v29 = vpop.xlane.xlu0 %3062  ;;  %vm3086_vm4 = vcmp.eq.f32.partialorder %v3074_v18, 0.0 }
 0xf4f   :  { %v3076_v26 = vmul.f32 0.007874016, %v3063_v29  ;;  %4919 = vrsqrt.f32 %v3075_v30  ;;  %vm3091_vm5 = vcmp.eq.f32.partialorder %v3075_v30, inf  ;;  %v3094_v62 = vand.u32 2147483648, %v3075_v30 }
 0xf50   :  { %vm3093_vm6 = vcmp.eq.f32.partialorder %v3075_v30, 0.0 }
 0xf51   :  { %4921 = vrsqrt.f32 %v3076_v26  ;;  %vm3098_vm7 = vcmp.eq.f32.partialorder %v3076_v26, inf  ;;  %v3101_v13 = vand.u32 2147483648, %v3076_v26  ;;  %vm3100_vm8 = vcmp.eq.f32.partialorder %v3076_v26, 0.0 }
 0xf52   :  { %v3065_v25 = vpop.xlane.xlu1 %3064 }
 0xf53   :  { %v3077_v47 = vmul.f32 0.007874016, %v3065_v25  ;;  %v4736_v25 = vld [vmem:[#allocation11 + $0x90] sm:$0xff]  }
 0xf55   :  { %4923 = vrsqrt.f32 %v3077_v47  ;;  %vm3105_vm9 = vcmp.eq.f32.partialorder %v3077_v47, inf  ;;  %v3108_v34 = vand.u32 2147483648, %v3077_v47  ;;  %vm3107_vm10 = vcmp.eq.f32.partialorder %v3077_v47, 0.0 }
 0xf57   :  { %v4918_v20 = vpop.eup %4917 }
 0xf58   :  { %v3083_v27 = vmul.f32 %v4918_v20, %v3074_v18  ;;  %v4738_v20 = vld [vmem:[#allocation11 + $0xd8] sm:$0xff]  }
 0xf59   :  { %v4920_v9 = vpop.eup %4919 }
 0xf5a   :  { %v3085_v43 = vsel %vm3084_vm3, %v3074_v18, %v3083_v27  ;;  %v3090_v60 = vmul.f32 %v4920_v9, %v3075_v30  ;;  %v4732_v18 = vld [vmem:[#allocation11 + $0x88] sm:$0xff]   ;;  %v4740_v27 = vld [vmem:[#allocation11 + $0x98] sm:$0xff]   ;;  %v4743_v9 = vld [vmem:[#allocation11 + $0x20] sm:$0xff]  }
 0xf5b   :  { %v4922_v53 = vpop.eup %4921  ;;  %v3088_v5 = vsel %vm3086_vm4, %v3087_v21, %v3085_v43  ;;  %v4742_v21 = vld [vmem:[#allocation11 + $0xe0] sm:$0xff]  }
 0xf5c   :  { %v3097_v15 = vmul.f32 %v4922_v53, %v3076_v26  ;;  %v3138_v57 = vadd.f32 1e-06, %v3088_v5  ;;  %v3092_v51 = vsel %vm3091_vm5, %v3075_v30, %v3090_v60  ;;  %v4744_v43 = vld [vmem:[#allocation11 + $0xa0] sm:$0xff]   ;;  %v4745_v53 = vld [vmem:[#allocation11 + $0x68] sm:$0xff]  }
 0xf5d   :  { %v3095_v54 = vsel %vm3093_vm6, %v3094_v62, %v3092_v51  ;;  %v4746_v5 = vld [vmem:[#allocation11 + $0xe8] sm:$0xff]  }
 0xf5e   :  { %v3099_v1 = vsel %vm3098_vm7, %v3076_v26, %v3097_v15  ;;  %v3139_v31 = vadd.f32 1e-06, %v3095_v54  ;;  %4925 = vrcp.f32 %v3138_v57  ;;  %v4735_v26 = vld [vmem:[#allocation11 + $0x10] sm:$0xff]  }
 0xf5f   :  { %v4924_v22 = vpop.eup %4923  ;;  %v3102_v4 = vsel %vm3100_vm8, %v3101_v13, %v3099_v1 }
 0xf60   :  { %v3104_v16 = vmul.f32 %v4924_v22, %v3077_v47  ;;  %4927 = vrcp.f32 %v3139_v31  ;;  %v3140_v19 = vadd.f32 1e-06, %v3102_v4 }
 0xf62   :  { %v3106_v14 = vsel %vm3105_vm9, %v3077_v47, %v3104_v16  ;;  %v4737_v47 = vld [vmem:[#allocation11 + $0x58] sm:$0xff]  }
 0xf63   :  { %v3109_v17 = vsel %vm3107_vm10, %v3108_v34, %v3106_v14 }
 0xf64   :  { %v3141_v49 = vadd.f32 1e-06, %v3109_v17 }
 0xf66   :  { %4929 = vrcp.f32 %v3141_v49 }
 0xf67   :  { %4931 = vrcp.f32 %v3140_v19 }
 0xf68   :  { %v4926_v28 = vpop.eup %4925 }
 0xf69   :  { %v3154_v59 = vmul.f32 %v4926_v28, %v5941_v45  ;;  %v4731_v45 = vld [vmem:[#allocation11 + $0x8] sm:$0xff]  }
 0xf6a   :  { %v4928_v50 = vpop.eup %4927 }
 0xf6b   :  { %v3155_v32 = vmul.f32 %v4928_v50, %v5944_v58  ;;  %v4733_v58 = vld [vmem:[#allocation11 + $0x50] sm:$0xff]  }
 0xf6d   :  { %v3162_v23 = vpack.c.bf16 %v3155_v32, %v3154_v59 }
 0xf6f   :  { %3413 = vmatmul.mubr.bf16.vlgmr.msra.gmra.mrb[88].mxu1 %v3162_v23  ;;  %3486 = vmatmul.mubr.bf16.vlgmr.msra.gmra.mrb[72].mxu0 %v3162_v23 }
 0xf70   :  { %v4930_v56 = vpop.eup %4929  ;;  %3422 = vmatprep.mubr.bf16.mxu1 %v5137_v63  ;;  %3495 = vmatprep.mubr.bf16.mxu0 %v5137_v63 }
 0xf71   :  { %v4932_v48 = vpop.eup %4931  ;;  %v3157_v61 = vmul.f32 %v4930_v56, %v5956_v42  ;;  %4250 = vmatpush3.bf16.msra.mxu1 %v4727_v41  ;;  %4290 = vmatpush3.bf16.msra.mxu0 %v4728_v6  ;;  %v4739_v42 = vld [vmem:[#allocation11 + $0x18] sm:$0xff]  }
 0xf72   :  { %4251 = vmatprep.subr.bf16.mxu1 %v4729_v11  ;;  %4291 = vmatprep.subr.bf16.mxu0 %v4730_v2  ;;  %v3156_v30 = vmul.f32 %v4932_v48, %v5949_v38  ;;  %v4741_v38 = vld [vmem:[#allocation11 + $0x60] sm:$0xff]  }
 0xf74   :  { %v3163_v29 = vpack.c.bf16 %v3157_v61, %v3156_v30 }
 0xf75   :  { %4252 = vmatpush3.bf16.msra.mxu1 %v4731_v45  ;;  %4292 = vmatpush3.bf16.msra.mxu0 %v4732_v18 }
 0xf76   :  { %4253 = vmatprep.subr.bf16.mxu1 %v4733_v58  ;;  %4293 = vmatprep.subr.bf16.mxu0 %v4734_v8 }
 0xf77   :  { %3423 = vmatmul.mubr.bf16.gmra.mrb[92].mxu1 %v3163_v29  ;;  %3496 = vmatmul.mubr.bf16.gmra.mrb[76].mxu0 %v3163_v29 }
 0xf78   :  { %3432 = vmatprep.mubr.bf16.mxu1 %v5137_v63  ;;  %3505 = vmatprep.mubr.bf16.mxu0 %v5137_v63 }
 0xf79   :  { %4254 = vmatpush3.bf16.msra.mxu1 %v4735_v26  ;;  %4294 = vmatpush3.bf16.msra.mxu0 %v4736_v25 }
 0xf7a   :  { %4255 = vmatprep.subr.bf16.mxu1 %v4737_v47  ;;  %4295 = vmatprep.subr.bf16.mxu0 %v4738_v20 }
 0xf7d   :  { %4256 = vmatpush3.bf16.msra.mxu1 %v4739_v42  ;;  %4296 = vmatpush3.bf16.msra.mxu0 %v4740_v27 }
 0xf7e   :  { %4257 = vmatprep.subr.bf16.mxu1 %v4741_v38  ;;  %4297 = vmatprep.subr.bf16.mxu0 %v4742_v21  ;;  %v4747_v21 = vld [vmem:[#allocation11 + $0x28] sm:$0xff]  }
 0xf81   :  { %4258 = vmatpush3.bf16.msra.mxu1 %v4743_v9  ;;  %4298 = vmatpush3.bf16.msra.mxu0 %v4744_v43  ;;  %v4750_v9 = vld [vmem:[#allocation11 + $0xf0] sm:$0xff]  }
 0xf82   :  { %4259 = vmatprep.subr.bf16.mxu1 %v4745_v53  ;;  %4299 = vmatprep.subr.bf16.mxu0 %v4746_v5  ;;  %v4751_v43 = vld [vmem:[#allocation11 + $0x30] sm:$0xff]   ;;  %v4754_v5 = vld [vmem:[#allocation11 + $0xf8] sm:$0xff]  }
 0xf83   :  { %v4752_v53 = vld [vmem:[#allocation11 + $0xb0] sm:$0xff]  }
 0xf85   :  { %4260 = vmatpush3.bf16.msra.mxu1 %v4747_v21 }
 0xf89   :  { %v3067_v60 = vpop.xlane.xlu0 %3066 }
 0xf8a   :  { %v3078_v62 = vmul.f32 0.007874016, %v3067_v60  ;;  %v4756_v60 = vld [vmem:[#allocation11 + $0xb8] sm:$0xff]  }
 0xf8b   :  { %v3069_v15 = vpop.xlane.xlu1 %3068 }
 0xf8c   :  { %4933 = vrsqrt.f32 %v3078_v62  ;;  %v3079_v57 = vmul.f32 0.007874016, %v3069_v15  ;;  %vm3112_vm11 = vcmp.eq.f32.partialorder %v3078_v62, inf  ;;  %v3115_v16 = vand.u32 2147483648, %v3078_v62 }
 0xf8d   :  { %v3071_v51 = vpop.xlane.xlu0 %3070  ;;  %vm3114_vm12 = vcmp.eq.f32.partialorder %v3078_v62, 0.0 }
 0xf8e   :  { %v3080_v54 = vmul.f32 0.007874016, %v3071_v51  ;;  %4935 = vrsqrt.f32 %v3079_v57  ;;  %vm3119_vm13 = vcmp.eq.f32.partialorder %v3079_v57, inf  ;;  %v3122_v49 = vand.u32 2147483648, %v3079_v57 }
 0xf8f   :  { %v3073_v1 = vpop.xlane.xlu1 %3072  ;;  %vm3121_vm14 = vcmp.eq.f32.partialorder %v3079_v57, 0.0 }
 0xf90   :  { %4937 = vrsqrt.f32 %v3080_v54  ;;  %v3081_v13 = vmul.f32 0.007874016, %v3073_v1  ;;  %vm3126_vm15 = vcmp.eq.f32.partialorder %v3080_v54, inf  ;;  %v3129_v41 = vand.u32 2147483648, %v3080_v54 }
 0xf91   :  { %vm3128_vm0 = vcmp.eq.f32.partialorder %v3080_v54, 0.0 }
 0xf92   :  { %4939 = vrsqrt.f32 %v3081_v13  ;;  %vm3133_vm1 = vcmp.eq.f32.partialorder %v3081_v13, inf  ;;  %v3136_v56 = vand.u32 2147483648, %v3081_v13  ;;  %vm3135_vm2 = vcmp.eq.f32.partialorder %v3081_v13, 0.0 }
 0xf96   :  { %v4934_v22 = vpop.eup %4933 }
 0xf97   :  { %v3111_v31 = vmul.f32 %v4934_v22, %v3078_v62 }
 0xf98   :  { %v4936_v4 = vpop.eup %4935 }
 0xf99   :  { %v3113_v34 = vsel %vm3112_vm11, %v3078_v62, %v3111_v31  ;;  %v3118_v17 = vmul.f32 %v4936_v4, %v3079_v57  ;;  %v3214_v62 = vsub.s32 3, %v5375_v36 }
 0xf9a   :  { %v4938_v14 = vpop.eup %4937  ;;  %v3116_v19 = vsel %vm3114_vm12, %v3115_v16, %v3113_v34 }
 0xf9b   :  { %v3125_v28 = vmul.f32 %v4938_v14, %v3080_v54  ;;  %v3142_v50 = vadd.f32 1e-06, %v3116_v19  ;;  %v3120_v59 = vsel %vm3119_vm13, %v3079_v57, %v3118_v17 }
 0xf9c   :  { %v4940_v32 = vpop.eup %4939  ;;  %v3123_v6 = vsel %vm3121_vm14, %v3122_v49, %v3120_v59 }
 0xf9d   :  { %v3127_v23 = vsel %vm3126_vm15, %v3080_v54, %v3125_v28  ;;  %v3132_v11 = vmul.f32 %v4940_v32, %v3081_v13  ;;  %v3143_v2 = vadd.f32 1e-06, %v3123_v6  ;;  %4941 = vrcp.f32 %v3142_v50 }
 0xf9e   :  { %v3130_v48 = vsel %vm3128_vm0, %v3129_v41, %v3127_v23 }
 0xf9f   :  { %v3134_v61 = vsel %vm3133_vm1, %v3081_v13, %v3132_v11  ;;  %4943 = vrcp.f32 %v3143_v2  ;;  %v3144_v18 = vadd.f32 1e-06, %v3130_v48 }
 0xfa0   :  { %v3137_v45 = vsel %vm3135_vm2, %v3136_v56, %v3134_v61 }
 0xfa1   :  { %v3145_v58 = vadd.f32 1e-06, %v3137_v45 }
 0xfa3   :  { %4945 = vrcp.f32 %v3145_v58 }
 0xfa4   :  { %4947 = vrcp.f32 %v3144_v18 }
 0xfa7   :  { %v4942_v8 = vpop.eup %4941 }
 0xfa8   :  { %v3158_v29 = vmul.f32 %v4942_v8, %v5961_v39  ;;  %v4748_v39 = vld [vmem:[#allocation11 + $0xa8] sm:$0xff]  }
 0xfa9   :  { %v4944_v30 = vpop.eup %4943  ;;  %4300 = vmatpush3.bf16.msra.mxu0 %v4748_v39 }
 0xfaa   :  { %v3159_v26 = vmul.f32 %v4944_v30, %v5964_v55  ;;  %v4749_v55 = vld [vmem:[#allocation11 + $0x70] sm:$0xff]   ;;  %4301 = vmatprep.subr.bf16.mxu0 %v4750_v9 }
 0xfab   :  { %4261 = vmatprep.subr.bf16.mxu1 %v4749_v55 }
 0xfac   :  { %v3164_v25 = vpack.c.bf16 %v3159_v26, %v3158_v29  ;;  %4262 = vmatpush3.bf16.msra.mxu1 %v4751_v43 }
 0xfad   :  { %v4946_v47 = vpop.eup %4945  ;;  %4302 = vmatpush3.bf16.msra.mxu0 %v4752_v53 }
 0xfae   :  { %3433 = vmatmul.mubr.bf16.gmra.mrb[96].mxu1 %v3164_v25  ;;  %3506 = vmatmul.mubr.bf16.gmra.mrb[80].mxu0 %v3164_v25  ;;  %v4948_v20 = vpop.eup %4947  ;;  %v3161_v42 = vmul.f32 %v4946_v47, %v5974_v0  ;;  %v4755_v0 = vld [vmem:[#allocation11 + $0x38] sm:$0xff]  }
 0xfaf   :  { %3442 = vmatprep.mubr.bf16.mxu1 %v5137_v63  ;;  %3515 = vmatprep.mubr.bf16.mxu0 %v5137_v63  ;;  %v3160_v27 = vmul.f32 %v4948_v20, %v5969_v40  ;;  %v4753_v63 = vld [vmem:[#allocation11 + $0x78] sm:$0xff]   ;;  %v3198_v40 = vld [vmem:[%s6087_s7] sm:$0xf] }
 0xfb0   :  { %4263 = vmatprep.subr.bf16.mxu1 %v4753_v63  ;;  %4303 = vmatprep.subr.bf16.mxu0 %v4754_v5  ;;  %v6000_v15 = vrot.slane %v3198_v40, %v312_v37  ;;  %v6004_v57 = vrot.slane %v3198_v40, %v320_v35  ;;  %v6008_v51 = vrot.slane %v3198_v40, %v316_v33 }
 0xfb1   :  { %v3165_v38 = vpack.c.bf16 %v3161_v42, %v3160_v27  ;;  %4264 = vmatpush3.bf16.msra.mxu1 %v4755_v0  ;;  %4304 = vmatpush3.bf16.msra.mxu0 %v4756_v60  ;;  %v6010_v54 = vrot.slane %v3198_v40, %v3214_v62 }
 0xfb6   :  { %3443 = vmatmul.mubr.bf16.gmra.mrb[100].mxu1 %v3165_v38  ;;  %3516 = vmatmul.mubr.bf16.gmra.mrb[84].mxu0 %v3165_v38 }
0x1042   :  { %v3414_v1 = vpop.f32.mrb[88].mxu1  ;;  %v3487_v13 = vpop.f32.mrb[72].mxu0 }
0x1043   :  { %v3415_v22 = vadd.f32 %v3414_v1, %v6000_v15  ;;  %v3488_v31 = vadd.f32 %v3487_v13, %v6004_v57  ;;  %v3416_v16 = vpop.f32.mrb[89].mxu1  ;;  %v3489_v4 = vpop.f32.mrb[73].mxu0 }
0x1044   :  { %v3417_v37 = vadd.f32 %v3416_v16, %v6008_v51  ;;  %v3490_v34 = vadd.f32 %v3489_v4, %v6010_v54  ;;  %v3418_v35 = vpop.f32.mrb[90].mxu1  ;;  %v3491_v14 = vpop.f32.mrb[74].mxu0 }
0x1045   :  { %v3419_v36 = vadd.f32 %v3418_v35, %v6000_v15  ;;  %v3492_v33 = vadd.f32 %v3491_v14, %v6004_v57  ;;  %v3420_v17 = vpop.f32.mrb[91].mxu1  ;;  %v3493_v19 = vpop.f32.mrb[75].mxu0  ;;  %v3526_v50 = vmax.f32 %v3415_v22, 0.0  ;;  %v3528_v59 = vmax.f32 %v3488_v31, 0.0 }
0x1046   :  { %v3421_v49 = vadd.f32 %v3420_v17, %v6008_v51  ;;  %v3494_v28 = vadd.f32 %v3493_v19, %v6010_v54  ;;  %v3527_v41 = vmax.f32 %v3417_v37, 0.0  ;;  %v3529_v6 = vmax.f32 %v3490_v34, 0.0 }
0x1047   :  { %v3530_v32 = vmax.f32 %v3419_v36, 0.0  ;;  %v3532_v23 = vmax.f32 %v3492_v33, 0.0 }
0x1048   :  { %v3531_v11 = vmax.f32 %v3421_v49, 0.0  ;;  %v3533_v2 = vmax.f32 %v3494_v28, 0.0 }
0x1049   :  { %v3558_v56 = vpack.c.bf16 %v3530_v32, %v3526_v50  ;;  %v3560_v48 = vpack.c.bf16 %v3532_v23, %v3528_v59 }
0x104a   :  { %v3559_v61 = vpack.c.bf16 %v3531_v11, %v3527_v41  ;;  %v3561_v45 = vpack.c.bf16 %v3533_v2, %v3529_v6  ;;  %v3424_v18 = vpop.f32.mrb[92].mxu1  ;;  %v3497_v58 = vpop.f32.mrb[76].mxu0 }
0x104b   :  { %v3425_v8 = vadd.f32 %v3424_v18, %v6000_v15  ;;  %v3498_v30 = vadd.f32 %v3497_v58, %v6004_v57  ;;  %v3426_v29 = vpop.f32.mrb[93].mxu1  ;;  %v3499_v26 = vpop.f32.mrb[77].mxu0 }
0x104c   :  { %v3427_v25 = vadd.f32 %v3426_v29, %v6008_v51  ;;  %v3500_v47 = vadd.f32 %v3499_v26, %v6010_v54  ;;  %v3428_v20 = vpop.f32.mrb[94].mxu1  ;;  %v3501_v42 = vpop.f32.mrb[78].mxu0  ;;  %3869 = vmatprep.mubr.bf16.mxu1 %v3559_v61  ;;  %3934 = vmatprep.mubr.bf16.mxu0 %v3561_v45 }
0x104d   :  { %v3429_v27 = vadd.f32 %v3428_v20, %v6000_v15  ;;  %v3502_v38 = vadd.f32 %v3501_v42, %v6004_v57  ;;  %v3430_v21 = vpop.f32.mrb[95].mxu1  ;;  %v3503_v39 = vpop.f32.mrb[79].mxu0  ;;  %3870 = vmatmul.mubr.bf16.vlgmr.msra.gmra.mrb[104].mxu1 %v3558_v56  ;;  %3935 = vmatmul.mubr.bf16.vlgmr.msra.gmra.mrb[88].mxu0 %v3560_v48  ;;  %v3534_v43 = vmax.f32 %v3425_v8, 0.0  ;;  %v3536_v53 = vmax.f32 %v3498_v30, 0.0 }
0x104e   :  { %v3431_v55 = vadd.f32 %v3430_v21, %v6008_v51  ;;  %v3504_v9 = vadd.f32 %v3503_v39, %v6010_v54  ;;  %v3535_v0 = vmax.f32 %v3427_v25, 0.0  ;;  %v3537_v60 = vmax.f32 %v3500_v47, 0.0 }
0x104f   :  { %v3538_v63 = vmax.f32 %v3429_v27, 0.0  ;;  %v3540_v5 = vmax.f32 %v3502_v38, 0.0 }
0x1050   :  { %v3539_v40 = vmax.f32 %v3431_v55, 0.0  ;;  %v3541_v62 = vmax.f32 %v3504_v9, 0.0 }
0x1051   :  { %v3562_v1 = vpack.c.bf16 %v3538_v63, %v3534_v43  ;;  %v3564_v13 = vpack.c.bf16 %v3540_v5, %v3536_v53 }
0x1052   :  { %v3563_v22 = vpack.c.bf16 %v3539_v40, %v3535_v0  ;;  %v3565_v31 = vpack.c.bf16 %v3541_v62, %v3537_v60 }
0x1054   :  { %3877 = vmatprep.mubr.bf16.mxu1 %v3563_v22  ;;  %3942 = vmatprep.mubr.bf16.mxu0 %v3565_v31 }
0x1055   :  { %3878 = vmatmul.mubr.bf16.gmra.mrb[108].mxu1 %v3562_v1  ;;  %3943 = vmatmul.mubr.bf16.gmra.mrb[92].mxu0 %v3564_v13 }
0x1081   :  { %v3434_v16 = vpop.f32.mrb[96].mxu1  ;;  %v3507_v4 = vpop.f32.mrb[80].mxu0 }
0x1082   :  { %v3435_v37 = vadd.f32 %v3434_v16, %v6000_v15  ;;  %v3508_v34 = vadd.f32 %v3507_v4, %v6004_v57  ;;  %v3436_v35 = vpop.f32.mrb[97].mxu1  ;;  %v3509_v14 = vpop.f32.mrb[81].mxu0 }
0x1083   :  { %v3437_v36 = vadd.f32 %v3436_v35, %v6008_v51  ;;  %v3510_v33 = vadd.f32 %v3509_v14, %v6010_v54  ;;  %v3438_v17 = vpop.f32.mrb[98].mxu1  ;;  %v3511_v19 = vpop.f32.mrb[82].mxu0 }
0x1084   :  { %v3439_v49 = vadd.f32 %v3438_v17, %v6000_v15  ;;  %v3512_v28 = vadd.f32 %v3511_v19, %v6004_v57  ;;  %v3440_v50 = vpop.f32.mrb[99].mxu1  ;;  %v3513_v59 = vpop.f32.mrb[83].mxu0  ;;  %v3542_v41 = vmax.f32 %v3435_v37, 0.0  ;;  %v3544_v6 = vmax.f32 %v3508_v34, 0.0 }
0x1085   :  { %v3441_v32 = vadd.f32 %v3440_v50, %v6008_v51  ;;  %v3514_v23 = vadd.f32 %v3513_v59, %v6010_v54  ;;  %v3543_v56 = vmax.f32 %v3437_v36, 0.0  ;;  %v3545_v48 = vmax.f32 %v3510_v33, 0.0 }
0x1086   :  { %v3546_v11 = vmax.f32 %v3439_v49, 0.0  ;;  %v3548_v2 = vmax.f32 %v3512_v28, 0.0 }
0x1087   :  { %v3547_v61 = vmax.f32 %v3441_v32, 0.0  ;;  %v3549_v45 = vmax.f32 %v3514_v23, 0.0 }
0x1088   :  { %v3566_v18 = vpack.c.bf16 %v3546_v11, %v3542_v41  ;;  %v3568_v58 = vpack.c.bf16 %v3548_v2, %v3544_v6 }
0x1089   :  { %v3567_v8 = vpack.c.bf16 %v3547_v61, %v3543_v56  ;;  %v3569_v30 = vpack.c.bf16 %v3549_v45, %v3545_v48  ;;  %v3444_v29 = vpop.f32.mrb[100].mxu1  ;;  %v3517_v26 = vpop.f32.mrb[84].mxu0 }
0x108a   :  { %v3445_v25 = vadd.f32 %v3444_v29, %v6000_v15  ;;  %v3518_v47 = vadd.f32 %v3517_v26, %v6004_v57  ;;  %v3446_v20 = vpop.f32.mrb[101].mxu1  ;;  %v3519_v42 = vpop.f32.mrb[85].mxu0 }
0x108b   :  { %v3447_v27 = vadd.f32 %v3446_v20, %v6008_v51  ;;  %v3520_v38 = vadd.f32 %v3519_v42, %v6010_v54  ;;  %v3448_v21 = vpop.f32.mrb[102].mxu1  ;;  %v3521_v39 = vpop.f32.mrb[86].mxu0  ;;  %3885 = vmatprep.mubr.bf16.mxu1 %v3567_v8  ;;  %3950 = vmatprep.mubr.bf16.mxu0 %v3569_v30 }
0x108c   :  { %v3449_v55 = vadd.f32 %v3448_v21, %v6000_v15  ;;  %v3522_v9 = vadd.f32 %v3521_v39, %v6004_v57  ;;  %v3450_v43 = vpop.f32.mrb[103].mxu1  ;;  %v3523_v53 = vpop.f32.mrb[87].mxu0  ;;  %3886 = vmatmul.mubr.bf16.gmra.mrb[112].mxu1 %v3566_v18  ;;  %3951 = vmatmul.mubr.bf16.gmra.mrb[96].mxu0 %v3568_v58  ;;  %v3550_v0 = vmax.f32 %v3445_v25, 0.0  ;;  %v3552_v60 = vmax.f32 %v3518_v47, 0.0 }
0x108d   :  { %v3451_v63 = vadd.f32 %v3450_v43, %v6008_v51  ;;  %v3524_v5 = vadd.f32 %v3523_v53, %v6010_v54  ;;  %v3551_v1 = vmax.f32 %v3447_v27, 0.0  ;;  %v3553_v13 = vmax.f32 %v3520_v38, 0.0  ;;  %v6047_v54 = vld [vmem:[%s6089_s9] ss:$0 sm:$0xff]  ;;  %s5142_s9 = smov [#allocation13]  }
0x108e   :  { %v3554_v40 = vmax.f32 %v3449_v55, 0.0  ;;  %v3556_v62 = vmax.f32 %v3522_v9, 0.0  ;;  %s3988_s20 = sshll.u32 %s5142_s9, 4  ;;  %s3989_s20 = int_to_ptr.vmem [resolvable:$true] %s3988_s20 }
0x108f   :  { %v3555_v22 = vmax.f32 %v3451_v63, 0.0  ;;  %v3557_v31 = vmax.f32 %v3524_v5, 0.0  ;;  %s5091_s2 = scalar_lea.vmem %s3989_s20, 1024  ;;  %p5096_p7 = scmp.lt.s32.totalorder %s3989_s20, %s3989_s20 }
0x1090   :  { %v3570_v16 = vpack.c.bf16 %v3554_v40, %v3550_v0  ;;  %v3572_v15 = vpack.c.bf16 %v3556_v62, %v3552_v60  ;;  %p5092_p6 = scmp.ne.s32.totalorder %s3989_s20, %s5091_s2  ;;  %p5097_p8 = scmp.lt.s32.totalorder %s5091_s2, %s5091_s2 }
0x1091   :  { %v3571_v4 = vpack.c.bf16 %v3555_v22, %v3551_v1  ;;  %v3573_v57 = vpack.c.bf16 %v3557_v31, %v3553_v13 }
0x1092   :  { %p5098_p9 = por %p5097_p8, %p5096_p7 }
0x1093   :  { %3893 = vmatprep.mubr.bf16.mxu1 %v3571_v4  ;;  %3958 = vmatprep.mubr.bf16.mxu0 %v3573_v57 }
0x1094   :  { %3894 = vmatmul.mubr.bf16.gmra.mrb[116].mxu1 %v3570_v16  ;;  %3959 = vmatmul.mubr.bf16.gmra.mrb[100].mxu0 %v3572_v15  ;;  %p5099_p10 = pnand %p5098_p9, %p5092_p6 }
0x1120   :  { %v4265_v37 = vpop.f32.mrb[104].mxu1  ;;  %v4305_v51 = vpop.f32.mrb[88].mxu0 }
0x1121   :  { %v4266_v34 = vpop.f32.mrb[105].mxu1  ;;  %v4306_v35 = vpop.f32.mrb[89].mxu0 }
0x1122   :  { %v4267_v14 = vadd.f32 %v4266_v34, %v4265_v37  ;;  %v4307_v36 = vadd.f32 %v4306_v35, %v4305_v51  ;;  %v4268_v33 = vpop.f32.mrb[106].mxu1  ;;  %v4308_v17 = vpop.f32.mrb[90].mxu0 }
0x1123   :  { %v4269_v19 = vpop.f32.mrb[107].mxu1  ;;  %v4309_v49 = vpop.f32.mrb[91].mxu0 }
0x1124   :  { %v3872_v28 = vadd.f32 %v4267_v14, %v6047_v54  ;;  %v4270_v50 = vadd.f32 %v4269_v19, %v4268_v33  ;;  %v4310_v59 = vadd.f32 %v4309_v49, %v4308_v17 }
0x1126   :  { %v3937_v32 = vadd.f32 %v4307_v36, %v3872_v28  ;;  %v3875_v23 = vadd.f32 %v4270_v50, %v6047_v54 }
0x1128   :  { %v3967_v41 = vadd.f32 %v3937_v32, %v5916_v24  ;;  %v3940_v6 = vadd.f32 %v4310_v59, %v3875_v23  ;;  %v4271_v11 = vpop.f32.mrb[108].mxu1  ;;  %v4311_v2 = vpop.f32.mrb[92].mxu0 }
0x1129   :  { %v4272_v56 = vpop.f32.mrb[109].mxu1  ;;  %v4312_v48 = vpop.f32.mrb[93].mxu0 }
0x112a   :  { %3975 = vst [vmem:[#allocation13] sm:$0xff] %v3967_v41  ;;  %v3968_v61 = vadd.f32 %v3940_v6, %v5918_v12  ;;  %v4273_v45 = vadd.f32 %v4272_v56, %v4271_v11  ;;  %v4313_v18 = vadd.f32 %v4312_v48, %v4311_v2  ;;  %v4274_v58 = vpop.f32.mrb[110].mxu1  ;;  %v4314_v8 = vpop.f32.mrb[94].mxu0 }
0x112b   :  { %v4275_v30 = vpop.f32.mrb[111].mxu1  ;;  %v4315_v29 = vpop.f32.mrb[95].mxu0 }
0x112c   :  { %3976 = vst [vmem:[#allocation13 + $0x8] sm:$0xff] %v3968_v61  ;;  %v3880_v26 = vadd.f32 %v4273_v45, %v6047_v54  ;;  %v4276_v25 = vadd.f32 %v4275_v30, %v4274_v58  ;;  %v4316_v47 = vadd.f32 %v4315_v29, %v4314_v8 }
0x112e   :  { %v3945_v24 = vadd.f32 %v4313_v18, %v3880_v26  ;;  %v3883_v20 = vadd.f32 %v4276_v25, %v6047_v54 }
0x1130   :  { %v3969_v42 = vadd.f32 %v3945_v24, %v5921_v52  ;;  %v3948_v27 = vadd.f32 %v4316_v47, %v3883_v20 }
0x1132   :  { %3977 = vst [vmem:[#allocation13 + $0x10] sm:$0xff] %v3969_v42  ;;  %v3970_v12 = vadd.f32 %v3948_v27, %v5925_v10 }
0x1134   :  { %3978 = vst [vmem:[#allocation13 + $0x18] sm:$0xff] %v3970_v12 }
0x115f   :  { %v4277_v38 = vpop.f32.mrb[112].mxu1  ;;  %v4317_v21 = vpop.f32.mrb[96].mxu0 }
0x1160   :  { %v4278_v39 = vpop.f32.mrb[113].mxu1  ;;  %v4318_v55 = vpop.f32.mrb[97].mxu0 }
0x1161   :  { %v4279_v9 = vadd.f32 %v4278_v39, %v4277_v38  ;;  %v4319_v43 = vadd.f32 %v4318_v55, %v4317_v21  ;;  %v4280_v53 = vpop.f32.mrb[114].mxu1  ;;  %v4320_v63 = vpop.f32.mrb[98].mxu0 }
0x1162   :  { %v4281_v5 = vpop.f32.mrb[115].mxu1  ;;  %v4321_v0 = vpop.f32.mrb[99].mxu0 }
0x1163   :  { %v3888_v60 = vadd.f32 %v4279_v9, %v6047_v54  ;;  %v4282_v40 = vadd.f32 %v4281_v5, %v4280_v53  ;;  %v4322_v62 = vadd.f32 %v4321_v0, %v4320_v63 }
0x1165   :  { %v3953_v52 = vadd.f32 %v4319_v43, %v3888_v60  ;;  %v3891_v1 = vadd.f32 %v4282_v40, %v6047_v54 }
0x1167   :  { %v3971_v10 = vadd.f32 %v3953_v52, %v5928_v3  ;;  %v3956_v13 = vadd.f32 %v4322_v62, %v3891_v1  ;;  %v4283_v22 = vpop.f32.mrb[116].mxu1  ;;  %v4323_v31 = vpop.f32.mrb[100].mxu0 }
0x1168   :  { %v4284_v16 = vpop.f32.mrb[117].mxu1  ;;  %v4324_v15 = vpop.f32.mrb[101].mxu0 }
0x1169   :  { %3979 = vst [vmem:[#allocation13 + $0x20] sm:$0xff] %v3971_v10  ;;  %v3972_v4 = vadd.f32 %v3956_v13, %v5930_v44  ;;  %v4285_v57 = vadd.f32 %v4284_v16, %v4283_v22  ;;  %v4325_v37 = vadd.f32 %v4324_v15, %v4323_v31  ;;  %v4286_v51 = vpop.f32.mrb[118].mxu1  ;;  %v4326_v34 = vpop.f32.mrb[102].mxu0 }
0x116a   :  { %v4287_v35 = vpop.f32.mrb[119].mxu1  ;;  %v4327_v14 = vpop.f32.mrb[103].mxu0 }
0x116b   :  { %3980 = vst [vmem:[#allocation13 + $0x28] sm:$0xff] %v3972_v4  ;;  %v3896_v36 = vadd.f32 %v4285_v57, %v6047_v54  ;;  %v4288_v33 = vadd.f32 %v4287_v35, %v4286_v51  ;;  %v4328_v17 = vadd.f32 %v4327_v14, %v4326_v34 }
0x116d   :  { %v3961_v3 = vadd.f32 %v4325_v37, %v3896_v36  ;;  %v3899_v19 = vadd.f32 %v4288_v33, %v6047_v54 }
0x116f   :  { %v3973_v49 = vadd.f32 %v3961_v3, %v5933_v7  ;;  %v3964_v28 = vadd.f32 %v4328_v17, %v3899_v19 }
0x1171   :  { %3981 = vst [vmem:[#allocation13 + $0x30] sm:$0xff] %v3973_v49  ;;  %v3974_v44 = vadd.f32 %v3964_v28, %v5936_v46 }
0x1173   :  { %3982 = vst [vmem:[#allocation13 + $0x38] sm:$0xff] %v3974_v44 }
0x1174   :  { %5102 = shalt.err (!%p5099_p10)
}
0x1175   :  { %s5103_s23 = scalar_lea.hbm %s6090_s10, 1024 }
0x1176   :  { %p5104_p11 = scmp.ne.s32.totalorder %s6090_s10, %s5103_s23  ;;  %p5107_p12 = scmp.lt.u32.totalorder %s5103_s23, %s6090_s10 }
0x1178   :  { %p5109_p13 = pnand %p5107_p12, %p5104_p11 }
0x117a   :  { %5112 = shalt.err (!%p5109_p13)
}
0x117b   :  { %3994 = dma.vmem_to_hbm [thread:$0]  %s3989_s20, 1024, %s6090_s10, [#allocation4], %s5125_s25, %s5125_s25, %s5126_s26  }
0x117c   :  { %5121 = dma.done.wait [#allocation4], 1024  }
0x117d   :  { %5122 = vsyncadd [#allocation4], 4294966272 }
0x117e   :  { %3998 = vsyncpa [#allocation3], 1 }
0x117f   :  { %3999 = vsyncpa [#allocation6], 1 }
0x1180   :  { %4000 = vsyncpa [#allocation9], 1 }
0x1181   :  { %4001 = vsyncpa [#allocation12], 1 }
0x1182   :  { %4002 = vsyncpa [#allocation4], 1 }

</bundles_post_ra>
